<compile_context>
chip_gen: v5e
topology: v5e:2x2
jax: 0.10.0
libtpu: 0.0.40
codegen_flags: <defaults>
</compile_context>

<pallas_src>
import jax
import jax.numpy as jnp
from jax.experimental import pallas as pl
from jax.experimental.pallas import tpu as pltpu

GPT_DIM = 768
STGCN_DIM = 512
HIDDEN = 256
LN_EPS = 1e-5


def _layernorm(x, gamma, beta):
    mu = jnp.mean(x, axis=-1, keepdims=True)
    var = jnp.mean((x - mu) ** 2, axis=-1, keepdims=True)
    return (x - mu) * jax.lax.rsqrt(var + LN_EPS) * gamma + beta


def fusion_kernel(
    gpt_ref, stgcn_ref,
    wg_ref, bg_ref, gg_ref, btg_ref,          # gpt_down: Linear(bf16 W) + LayerNorm
    ws_ref, bs_ref, gs_ref, bts_ref,          # stgcn_down: Linear(bf16 W) + LayerNorm
    wa1_ref, ba1_ref, ga_ref, bta_ref,        # attention: Linear(512->256, bf16 W) + LayerNorm
    wa2d_ref,                                 # attention head folded to one diff row (1, 256) f32
    wf1_ref, bf1_ref, gf_ref, btf_ref,        # fusion: Linear(256->256, bf16 W) + LayerNorm
    wf2_ref, bf2_ref,                         # fusion: Linear(256->768, bf16 W)
    scalars_ref,                              # SMEM: [alpha, attn_bias_diff]
    out_ref,
):
    g = gpt_ref[...]       # (tm, GPT_DIM)   f32 (kept f32 for the residual path)
    s = stgcn_ref[...]     # (tm, STGCN_DIM) f32

    g_bf = g.astype(jnp.bfloat16)
    s_bf = s.astype(jnp.bfloat16)

    # gpt_down / stgcn_down branches (Dropout is identity in eval mode).
    gh = jnp.dot(g_bf, wg_ref[...], preferred_element_type=jnp.float32) + bg_ref[...]
    gh = jnp.maximum(_layernorm(gh, gg_ref[...], btg_ref[...]), 0.0)

    sh = jnp.dot(s_bf, ws_ref[...], preferred_element_type=jnp.float32) + bs_ref[...]
    sh = jnp.maximum(_layernorm(sh, gs_ref[...], bts_ref[...]), 0.0)

    # attention on concat([gh, sh]): split the (512, 256) weight instead of concatenating.
    gh_bf = gh.astype(jnp.bfloat16)
    sh_bf = sh.astype(jnp.bfloat16)
    ah = (jnp.dot(gh_bf, wa1_ref[0:HIDDEN, :], preferred_element_type=jnp.float32)
          + jnp.dot(sh_bf, wa1_ref[HIDDEN:2 * HIDDEN, :], preferred_element_type=jnp.float32)
          + ba1_ref[...])
    ah = jnp.maximum(_layernorm(ah, ga_ref[...], bta_ref[...]), 0.0)

    # softmax over 2 logits == sigmoid of the logit difference:
    #   w0 = softmax([l0, l1])[0] = sigmoid(l0 - l1)
    alpha = scalars_ref[0]
    bias_diff = scalars_ref[1]
    diff = jnp.sum(ah * wa2d_ref[...], axis=-1, keepdims=True) + bias_diff   # (tm, 1) f32
    w0 = 1.0 / (1.0 + jnp.exp(-diff))
    w1 = 1.0 - w0

    weighted = w0 * gh + w1 * sh

    # fusion head
    fh = (jnp.dot(weighted.astype(jnp.bfloat16), wf1_ref[...],
                  preferred_element_type=jnp.float32) + bf1_ref[...])
    fh = jnp.maximum(_layernorm(fh, gf_ref[...], btf_ref[...]), 0.0)
    fused = (jnp.dot(fh.astype(jnp.bfloat16), wf2_ref[...],
                     preferred_element_type=jnp.float32) + bf2_ref[...])

    out_ref[...] = alpha * fused + (1.0 - alpha) * g


def _round_up(x, m):
    return ((x + m - 1) // m) * m


def _row_spec(tm, d):
    return pl.BlockSpec((tm, d), lambda i: (i, 0))


def _const_spec(shape):
    nd = len(shape)
    return pl.BlockSpec(shape, lambda i, _nd=nd: (0,) * _nd)


def _default_row_tile():
    # 512 rows on v6e/v7x, 256 on v5e; any multiple of 8 works.
    try:
        kind = jax.devices()[0].device_kind.lower()
        if "v5 lite" in kind or "v5e" in kind:
            return 256
    except Exception:
        pass
    return 512


def enhanced_feature_fusion(gpt_feat, stgcn_feat, params, *, tm=None,
                            compute_dtype=jnp.bfloat16):
    """gpt_feat: (..., GPT_DIM), stgcn_feat: (..., STGCN_DIM)."""
    lead = gpt_feat.shape[:-1]
    g2 = gpt_feat.reshape(-1, GPT_DIM).astype(jnp.float32)
    s2 = stgcn_feat.reshape(-1, STGCN_DIM).astype(jnp.float32)
    n = g2.shape[0]

    if tm is None:
        tm = _default_row_tile()

    # Pad rows instead of asserting divisibility; keep >= 2 grid steps when
    # the row count allows (megacore sharding + lower padding waste).
    n_pad8 = _round_up(max(n, 1), 8)
    tm_cap = _round_up(-(-n_pad8 // 2), 8) if n_pad8 >= 16 else n_pad8
    tm_eff = max(8, min(tm, tm_cap))
    n_padded = _round_up(n, tm_eff)
    if n_padded != n:
        g2 = jnp.pad(g2, ((0, n_padded - n), (0, 0)))
        s2 = jnp.pad(s2, ((0, n_padded - n), (0, 0)))
    grid = n_padded // tm_eff

    p = params
    wdt = compute_dtype
    # Fold the 2-logit attention head into a single difference row + bias diff.
    wa2_diff = (p["wa2_small"][:, 0] - p["wa2_small"][:, 1]).reshape(1, HIDDEN).astype(jnp.float32)
    bias_diff = (p["ba2_small"][0, 0] - p["ba2_small"][0, 1]).astype(jnp.float32)

    weight_inputs = (
        p["wg"].astype(wdt), p["bg"], p["gg"], p["btg"],
        p["ws"].astype(wdt), p["bs"], p["gs"], p["bts"],
        p["wa1"].astype(wdt), p["ba1"], p["ga"], p["bta"],
        wa2_diff,
        p["wf1"].astype(wdt), p["bf1"], p["gf"], p["btf"],
        p["wf2"].astype(wdt), p["bf2"],
    )
    scalars = jnp.stack([p["alpha"][0].astype(jnp.float32), bias_diff])  # (2,) SMEM

    flops = 2 * n_padded * (GPT_DIM * HIDDEN + STGCN_DIM * HIDDEN
                            + 2 * HIDDEN * HIDDEN + HIDDEN * HIDDEN + HIDDEN * GPT_DIM)
    bytes_accessed = (n_padded * (GPT_DIM + STGCN_DIM + GPT_DIM) * 4
                      + sum(int(w.size) * w.dtype.itemsize for w in weight_inputs))
    cost = pl.CostEstimate(flops=int(flops), transcendentals=int(8 * n_padded),
                           bytes_accessed=int(bytes_accessed))

    in_specs = (
        [_row_spec(tm_eff, GPT_DIM), _row_spec(tm_eff, STGCN_DIM)]
        + [_const_spec(tuple(w.shape)) for w in weight_inputs]
        + [pl.BlockSpec(memory_space=pltpu.MemorySpace.SMEM)]   # scalars
    )

    out = pl.pallas_call(
        fusion_kernel,
        out_shape=jax.ShapeDtypeStruct((n_padded, GPT_DIM), jnp.float32),
        grid=(grid,),
        in_specs=in_specs,
        out_specs=_row_spec(tm_eff, GPT_DIM),
        compiler_params=pltpu.CompilerParams(
            dimension_semantics=("parallel",),
        ),
        cost_estimate=cost,
    )(g2, s2, *weight_inputs, scalars)

    out = out[:n]
    return out.reshape(*lead, GPT_DIM)


def init_params(key):
    ks = jax.random.split(key, 16)

    def lin(k, fan_in, fan_out, scale=0.02):
        kw, kb = jax.random.split(k)
        w = jax.random.normal(kw, (fan_in, fan_out), jnp.float32) * scale
        b = jax.random.normal(kb, (1, fan_out), jnp.float32) * 0.01
        return w, b

    def ln(k, dim):
        kg, kb = jax.random.split(k)
        gamma = 1.0 + 0.05 * jax.random.normal(kg, (1, dim), jnp.float32)
        beta = 0.05 * jax.random.normal(kb, (1, dim), jnp.float32)
        return gamma, beta

    wg, bg = lin(ks[0], GPT_DIM, HIDDEN)
    gg, btg = ln(ks[1], HIDDEN)
    ws, bs = lin(ks[2], STGCN_DIM, HIDDEN)
    gs, bts = ln(ks[3], HIDDEN)
    wa1, ba1 = lin(ks[4], 2 * HIDDEN, HIDDEN)
    ga, bta = ln(ks[5], HIDDEN)
    wa2_small, ba2_small = lin(ks[6], HIDDEN, 2, scale=0.1)
    wf1, bf1 = lin(ks[7], HIDDEN, HIDDEN)
    gf, btf = ln(ks[8], HIDDEN)
    wf2, bf2 = lin(ks[9], HIDDEN, GPT_DIM)

    alpha = jnp.array([0.5], jnp.float32)

    return dict(
        wg=wg, bg=bg, gg=gg, btg=btg,
        ws=ws, bs=bs, gs=gs, bts=bts,
        wa1=wa1, ba1=ba1, ga=ga, bta=bta,
        wa2_small=wa2_small, ba2_small=ba2_small,
        wf1=wf1, bf1=bf1, gf=gf, btf=btf,
        wf2=wf2, bf2=bf2, alpha=alpha,
    )


def reference_forward(gpt_feat, stgcn_feat, p):
    def ln(x, g, b):
        mu = jnp.mean(x, axis=-1, keepdims=True)
        var = jnp.mean((x - mu) ** 2, axis=-1, keepdims=True)
        return (x - mu) * jax.lax.rsqrt(var + LN_EPS) * g + b

    gh = jnp.maximum(ln(gpt_feat @ p["wg"] + p["bg"], p["gg"], p["btg"]), 0.0)
    sh = jnp.maximum(ln(stgcn_feat @ p["ws"] + p["bs"], p["gs"], p["bts"]), 0.0)
    comb = jnp.concatenate([gh, sh], axis=-1)
    ah = jnp.maximum(ln(comb @ p["wa1"] + p["ba1"], p["ga"], p["bta"]), 0.0)
    logits = ah @ p["wa2_small"] + p["ba2_small"]
    w = jax.nn.softmax(logits, axis=-1)
    weighted = w[..., 0:1] * gh + w[..., 1:2] * sh
    fh = jnp.maximum(ln(weighted @ p["wf1"] + p["bf1"], p["gf"], p["btf"]), 0.0)
    fused = fh @ p["wf2"] + p["bf2"]
    return p["alpha"][0] * fused + (1.0 - p["alpha"][0]) * gpt_feat


if __name__ == "__main__":
    key = jax.random.PRNGKey(0)
    k_p, k_g, k_s = jax.random.split(key, 3)

    B, S = 2, 8
    gpt_feat = jax.random.normal(k_g, (B, S, GPT_DIM), jnp.float32)
    stgcn_feat = jax.random.normal(k_s, (B, S, STGCN_DIM), jnp.float32)

    params = init_params(k_p)

    out = enhanced_feature_fusion(gpt_feat, stgcn_feat, params)
    out = jax.block_until_ready(out)

    ref = reference_forward(gpt_feat, stgcn_feat, params)
    assert out.shape == (B, S, GPT_DIM)
    # bf16 MXU operands vs the pure-f32 reference -> loosened tolerance.
    assert jnp.allclose(out, ref, atol=5e-2, rtol=5e-2), "mismatch vs reference"

    print("KERNEL_OK")
</pallas_src>

<mosaic_0001>
module attributes {stable_mosaic.version = 11 : i64} {
  func.func @fusion_kernel(%arg0: i32, %arg1: memref<8x768xf32, #tpu.memory_space<vmem>>, %arg2: memref<8x512xf32, #tpu.memory_space<vmem>>, %arg3: memref<768x256xbf16, #tpu.memory_space<vmem>>, %arg4: memref<1x256xf32, #tpu.memory_space<vmem>>, %arg5: memref<1x256xf32, #tpu.memory_space<vmem>>, %arg6: memref<1x256xf32, #tpu.memory_space<vmem>>, %arg7: memref<512x256xbf16, #tpu.memory_space<vmem>>, %arg8: memref<1x256xf32, #tpu.memory_space<vmem>>, %arg9: memref<1x256xf32, #tpu.memory_space<vmem>>, %arg10: memref<1x256xf32, #tpu.memory_space<vmem>>, %arg11: memref<512x256xbf16, #tpu.memory_space<vmem>>, %arg12: memref<1x256xf32, #tpu.memory_space<vmem>>, %arg13: memref<1x256xf32, #tpu.memory_space<vmem>>, %arg14: memref<1x256xf32, #tpu.memory_space<vmem>>, %arg15: memref<1x256xf32, #tpu.memory_space<vmem>>, %arg16: memref<256x256xbf16, #tpu.memory_space<vmem>>, %arg17: memref<1x256xf32, #tpu.memory_space<vmem>>, %arg18: memref<1x256xf32, #tpu.memory_space<vmem>>, %arg19: memref<1x256xf32, #tpu.memory_space<vmem>>, %arg20: memref<256x768xbf16, #tpu.memory_space<vmem>>, %arg21: memref<1x768xf32, #tpu.memory_space<vmem>>, %arg22: memref<2xf32, #tpu.memory_space<smem>>, %arg23: memref<8x768xf32, #tpu.memory_space<vmem>>) attributes {dimension_semantics = [#tpu.dimension_semantics<parallel>], iteration_bounds = array<i64: 2>, scalar_prefetch = 0 : i64, scratch_operands = 0 : i64, tpu.core_type = #tpu.core_type<tc>, window_params = [{transform_indices = @transform_0, window_bounds = array<i64: 8, 768>}, {transform_indices = @transform_1, window_bounds = array<i64: 8, 512>}, {pipeline_mode = #tpu.pipeline_mode<synchronous>, transform_indices = @transform_2, window_bounds = array<i64: 768, 256>}, {pipeline_mode = #tpu.pipeline_mode<synchronous>, transform_indices = @transform_3, window_bounds = array<i64: 1, 256>}, {pipeline_mode = #tpu.pipeline_mode<synchronous>, transform_indices = @transform_4, window_bounds = array<i64: 1, 256>}, {pipeline_mode = #tpu.pipeline_mode<synchronous>, transform_indices = @transform_5, window_bounds = array<i64: 1, 256>}, {pipeline_mode = #tpu.pipeline_mode<synchronous>, transform_indices = @transform_6, window_bounds = array<i64: 512, 256>}, {pipeline_mode = #tpu.pipeline_mode<synchronous>, transform_indices = @transform_7, window_bounds = array<i64: 1, 256>}, {pipeline_mode = #tpu.pipeline_mode<synchronous>, transform_indices = @transform_8, window_bounds = array<i64: 1, 256>}, {pipeline_mode = #tpu.pipeline_mode<synchronous>, transform_indices = @transform_9, window_bounds = array<i64: 1, 256>}, {pipeline_mode = #tpu.pipeline_mode<synchronous>, transform_indices = @transform_10, window_bounds = array<i64: 512, 256>}, {pipeline_mode = #tpu.pipeline_mode<synchronous>, transform_indices = @transform_11, window_bounds = array<i64: 1, 256>}, {pipeline_mode = #tpu.pipeline_mode<synchronous>, transform_indices = @transform_12, window_bounds = array<i64: 1, 256>}, {pipeline_mode = #tpu.pipeline_mode<synchronous>, transform_indices = @transform_13, window_bounds = array<i64: 1, 256>}, {pipeline_mode = #tpu.pipeline_mode<synchronous>, transform_indices = @transform_14, window_bounds = array<i64: 1, 256>}, {pipeline_mode = #tpu.pipeline_mode<synchronous>, transform_indices = @transform_15, window_bounds = array<i64: 256, 256>}, {pipeline_mode = #tpu.pipeline_mode<synchronous>, transform_indices = @transform_16, window_bounds = array<i64: 1, 256>}, {pipeline_mode = #tpu.pipeline_mode<synchronous>, transform_indices = @transform_17, window_bounds = array<i64: 1, 256>}, {pipeline_mode = #tpu.pipeline_mode<synchronous>, transform_indices = @transform_18, window_bounds = array<i64: 1, 256>}, {pipeline_mode = #tpu.pipeline_mode<synchronous>, transform_indices = @transform_19, window_bounds = array<i64: 256, 768>}, {pipeline_mode = #tpu.pipeline_mode<synchronous>, transform_indices = @transform_20, window_bounds = array<i64: 1, 768>}, {transform_indices = @transform_21, window_bounds = array<i64: 2>}, {transform_indices = @transform_22, window_bounds = array<i64: 8, 768>}]} {
    %c0 = arith.constant 0 : index
    %c0_0 = arith.constant 0 : index
    %0 = vector.load %arg1[%c0, %c0_0] : memref<8x768xf32, #tpu.memory_space<vmem>>, vector<8x768xf32>
    %c0_1 = arith.constant 0 : index
    %c0_2 = arith.constant 0 : index
    %1 = vector.load %arg2[%c0_1, %c0_2] : memref<8x512xf32, #tpu.memory_space<vmem>>, vector<8x512xf32>
    %2 = arith.truncf %0 : vector<8x768xf32> to vector<8x768xbf16>
    %3 = arith.truncf %1 : vector<8x512xf32> to vector<8x512xbf16>
    %c0_3 = arith.constant 0 : index
    %c0_4 = arith.constant 0 : index
    %4 = vector.load %arg3[%c0_3, %c0_4] : memref<768x256xbf16, #tpu.memory_space<vmem>>, vector<768x256xbf16>
    %cst = arith.constant dense<0.000000e+00> : vector<8x256xf32>
    %5 = tpu.matmul %2, %4, %cst {dimension_numbers = #tpu.dot_dimension_numbers<[1], [0], [0], [1], [0, 0, 1, 1], [], []>} : vector<8x768xbf16>, vector<768x256xbf16>, vector<8x256xf32> -> vector<8x256xf32>
    %c0_5 = arith.constant 0 : index
    %c0_6 = arith.constant 0 : index
    %6 = vector.load %arg4[%c0_5, %c0_6] : memref<1x256xf32, #tpu.memory_space<vmem>>, vector<1x256xf32>
    %7 = vector.broadcast %6 : vector<1x256xf32> to vector<8x256xf32>
    %8 = arith.addf %5, %7 : vector<8x256xf32>
    %c0_7 = arith.constant 0 : index
    %c0_8 = arith.constant 0 : index
    %9 = vector.load %arg5[%c0_7, %c0_8] : memref<1x256xf32, #tpu.memory_space<vmem>>, vector<1x256xf32>
    %c0_9 = arith.constant 0 : index
    %c0_10 = arith.constant 0 : index
    %10 = vector.load %arg6[%c0_9, %c0_10] : memref<1x256xf32, #tpu.memory_space<vmem>>, vector<1x256xf32>
    %cst_11 = arith.constant dense<0.000000e+00> : vector<8xf32>
    %11 = vector.multi_reduction <add>, %8, %cst_11 [1] : vector<8x256xf32> to vector<8xf32>
    %12 = vector.shape_cast %11 : vector<8xf32> to vector<8x1xf32>
    %cst_12 = arith.constant 2.560000e+02 : f32
    %13 = vector.broadcast %cst_12 : f32 to vector<8x1xf32>
    %14 = arith.divf %12, %13 : vector<8x1xf32>
    %15 = vector.broadcast %14 : vector<8x1xf32> to vector<8x256xf32>
    %16 = arith.subf %8, %15 : vector<8x256xf32>
    %17 = arith.mulf %16, %16 : vector<8x256xf32>
    %cst_13 = arith.constant dense<0.000000e+00> : vector<8xf32>
    %18 = vector.multi_reduction <add>, %17, %cst_13 [1] : vector<8x256xf32> to vector<8xf32>
    %19 = vector.shape_cast %18 : vector<8xf32> to vector<8x1xf32>
    %cst_14 = arith.constant 2.560000e+02 : f32
    %20 = vector.broadcast %cst_14 : f32 to vector<8x1xf32>
    %21 = arith.divf %19, %20 : vector<8x1xf32>
    %22 = vector.broadcast %14 : vector<8x1xf32> to vector<8x256xf32>
    %23 = arith.subf %8, %22 : vector<8x256xf32>
    %cst_15 = arith.constant 9.99999974E-6 : f32
    %24 = vector.broadcast %cst_15 : f32 to vector<8x1xf32>
    %25 = arith.addf %21, %24 : vector<8x1xf32>
    %26 = math.rsqrt %25 : vector<8x1xf32>
    %27 = vector.broadcast %26 : vector<8x1xf32> to vector<8x256xf32>
    %28 = arith.mulf %23, %27 : vector<8x256xf32>
    %29 = vector.broadcast %9 : vector<1x256xf32> to vector<8x256xf32>
    %30 = arith.mulf %28, %29 : vector<8x256xf32>
    %31 = vector.broadcast %10 : vector<1x256xf32> to vector<8x256xf32>
    %32 = arith.addf %30, %31 : vector<8x256xf32>
    %cst_16 = arith.constant 0.000000e+00 : f32
    %33 = vector.broadcast %cst_16 : f32 to vector<8x256xf32>
    %34 = arith.maximumf %32, %33 : vector<8x256xf32>
    %c0_17 = arith.constant 0 : index
    %c0_18 = arith.constant 0 : index
    %35 = vector.load %arg7[%c0_17, %c0_18] : memref<512x256xbf16, #tpu.memory_space<vmem>>, vector<512x256xbf16>
    %cst_19 = arith.constant dense<0.000000e+00> : vector<8x256xf32>
    %36 = tpu.matmul %3, %35, %cst_19 {dimension_numbers = #tpu.dot_dimension_numbers<[1], [0], [0], [1], [0, 0, 1, 1], [], []>} : vector<8x512xbf16>, vector<512x256xbf16>, vector<8x256xf32> -> vector<8x256xf32>
    %c0_20 = arith.constant 0 : index
    %c0_21 = arith.constant 0 : index
    %37 = vector.load %arg8[%c0_20, %c0_21] : memref<1x256xf32, #tpu.memory_space<vmem>>, vector<1x256xf32>
    %38 = vector.broadcast %37 : vector<1x256xf32> to vector<8x256xf32>
    %39 = arith.addf %36, %38 : vector<8x256xf32>
    %c0_22 = arith.constant 0 : index
    %c0_23 = arith.constant 0 : index
    %40 = vector.load %arg9[%c0_22, %c0_23] : memref<1x256xf32, #tpu.memory_space<vmem>>, vector<1x256xf32>
    %c0_24 = arith.constant 0 : index
    %c0_25 = arith.constant 0 : index
    %41 = vector.load %arg10[%c0_24, %c0_25] : memref<1x256xf32, #tpu.memory_space<vmem>>, vector<1x256xf32>
    %cst_26 = arith.constant dense<0.000000e+00> : vector<8xf32>
    %42 = vector.multi_reduction <add>, %39, %cst_26 [1] : vector<8x256xf32> to vector<8xf32>
    %43 = vector.shape_cast %42 : vector<8xf32> to vector<8x1xf32>
    %cst_27 = arith.constant 2.560000e+02 : f32
    %44 = vector.broadcast %cst_27 : f32 to vector<8x1xf32>
    %45 = arith.divf %43, %44 : vector<8x1xf32>
    %46 = vector.broadcast %45 : vector<8x1xf32> to vector<8x256xf32>
    %47 = arith.subf %39, %46 : vector<8x256xf32>
    %48 = arith.mulf %47, %47 : vector<8x256xf32>
    %cst_28 = arith.constant dense<0.000000e+00> : vector<8xf32>
    %49 = vector.multi_reduction <add>, %48, %cst_28 [1] : vector<8x256xf32> to vector<8xf32>
    %50 = vector.shape_cast %49 : vector<8xf32> to vector<8x1xf32>
    %cst_29 = arith.constant 2.560000e+02 : f32
    %51 = vector.broadcast %cst_29 : f32 to vector<8x1xf32>
    %52 = arith.divf %50, %51 : vector<8x1xf32>
    %53 = vector.broadcast %45 : vector<8x1xf32> to vector<8x256xf32>
    %54 = arith.subf %39, %53 : vector<8x256xf32>
    %cst_30 = arith.constant 9.99999974E-6 : f32
    %55 = vector.broadcast %cst_30 : f32 to vector<8x1xf32>
    %56 = arith.addf %52, %55 : vector<8x1xf32>
    %57 = math.rsqrt %56 : vector<8x1xf32>
    %58 = vector.broadcast %57 : vector<8x1xf32> to vector<8x256xf32>
    %59 = arith.mulf %54, %58 : vector<8x256xf32>
    %60 = vector.broadcast %40 : vector<1x256xf32> to vector<8x256xf32>
    %61 = arith.mulf %59, %60 : vector<8x256xf32>
    %62 = vector.broadcast %41 : vector<1x256xf32> to vector<8x256xf32>
    %63 = arith.addf %61, %62 : vector<8x256xf32>
    %cst_31 = arith.constant 0.000000e+00 : f32
    %64 = vector.broadcast %cst_31 : f32 to vector<8x256xf32>
    %65 = arith.maximumf %63, %64 : vector<8x256xf32>
    %66 = arith.truncf %34 : vector<8x256xf32> to vector<8x256xbf16>
    %67 = arith.truncf %65 : vector<8x256xf32> to vector<8x256xbf16>
    %c0_32 = arith.constant 0 : index
    %c0_33 = arith.constant 0 : index
    %68 = vector.load %arg11[%c0_32, %c0_33] : memref<512x256xbf16, #tpu.memory_space<vmem>>, vector<256x256xbf16>
    %cst_34 = arith.constant dense<0.000000e+00> : vector<8x256xf32>
    %69 = tpu.matmul %66, %68, %cst_34 {dimension_numbers = #tpu.dot_dimension_numbers<[1], [0], [0], [1], [0, 0, 1, 1], [], []>} : vector<8x256xbf16>, vector<256x256xbf16>, vector<8x256xf32> -> vector<8x256xf32>
    %c256 = arith.constant 256 : index
    %c0_35 = arith.constant 0 : index
    %70 = vector.load %arg11[%c256, %c0_35] : memref<512x256xbf16, #tpu.memory_space<vmem>>, vector<256x256xbf16>
    %cst_36 = arith.constant dense<0.000000e+00> : vector<8x256xf32>
    %71 = tpu.matmul %67, %70, %cst_36 {dimension_numbers = #tpu.dot_dimension_numbers<[1], [0], [0], [1], [0, 0, 1, 1], [], []>} : vector<8x256xbf16>, vector<256x256xbf16>, vector<8x256xf32> -> vector<8x256xf32>
    %72 = arith.addf %69, %71 : vector<8x256xf32>
    %c0_37 = arith.constant 0 : index
    %c0_38 = arith.constant 0 : index
    %73 = vector.load %arg12[%c0_37, %c0_38] : memref<1x256xf32, #tpu.memory_space<vmem>>, vector<1x256xf32>
    %74 = vector.broadcast %73 : vector<1x256xf32> to vector<8x256xf32>
    %75 = arith.addf %72, %74 : vector<8x256xf32>
    %c0_39 = arith.constant 0 : index
    %c0_40 = arith.constant 0 : index
    %76 = vector.load %arg13[%c0_39, %c0_40] : memref<1x256xf32, #tpu.memory_space<vmem>>, vector<1x256xf32>
    %c0_41 = arith.constant 0 : index
    %c0_42 = arith.constant 0 : index
    %77 = vector.load %arg14[%c0_41, %c0_42] : memref<1x256xf32, #tpu.memory_space<vmem>>, vector<1x256xf32>
    %cst_43 = arith.constant dense<0.000000e+00> : vector<8xf32>
    %78 = vector.multi_reduction <add>, %75, %cst_43 [1] : vector<8x256xf32> to vector<8xf32>
    %79 = vector.shape_cast %78 : vector<8xf32> to vector<8x1xf32>
    %cst_44 = arith.constant 2.560000e+02 : f32
    %80 = vector.broadcast %cst_44 : f32 to vector<8x1xf32>
    %81 = arith.divf %79, %80 : vector<8x1xf32>
    %82 = vector.broadcast %81 : vector<8x1xf32> to vector<8x256xf32>
    %83 = arith.subf %75, %82 : vector<8x256xf32>
    %84 = arith.mulf %83, %83 : vector<8x256xf32>
    %cst_45 = arith.constant dense<0.000000e+00> : vector<8xf32>
    %85 = vector.multi_reduction <add>, %84, %cst_45 [1] : vector<8x256xf32> to vector<8xf32>
    %86 = vector.shape_cast %85 : vector<8xf32> to vector<8x1xf32>
    %cst_46 = arith.constant 2.560000e+02 : f32
    %87 = vector.broadcast %cst_46 : f32 to vector<8x1xf32>
    %88 = arith.divf %86, %87 : vector<8x1xf32>
    %89 = vector.broadcast %81 : vector<8x1xf32> to vector<8x256xf32>
    %90 = arith.subf %75, %89 : vector<8x256xf32>
    %cst_47 = arith.constant 9.99999974E-6 : f32
    %91 = vector.broadcast %cst_47 : f32 to vector<8x1xf32>
    %92 = arith.addf %88, %91 : vector<8x1xf32>
    %93 = math.rsqrt %92 : vector<8x1xf32>
    %94 = vector.broadcast %93 : vector<8x1xf32> to vector<8x256xf32>
    %95 = arith.mulf %90, %94 : vector<8x256xf32>
    %96 = vector.broadcast %76 : vector<1x256xf32> to vector<8x256xf32>
    %97 = arith.mulf %95, %96 : vector<8x256xf32>
    %98 = vector.broadcast %77 : vector<1x256xf32> to vector<8x256xf32>
    %99 = arith.addf %97, %98 : vector<8x256xf32>
    %cst_48 = arith.constant 0.000000e+00 : f32
    %100 = vector.broadcast %cst_48 : f32 to vector<8x256xf32>
    %101 = arith.maximumf %99, %100 : vector<8x256xf32>
    %c0_49 = arith.constant 0 : index
    %102 = memref.load %arg22[%c0_49] : memref<2xf32, #tpu.memory_space<smem>>
    %c1 = arith.constant 1 : index
    %103 = memref.load %arg22[%c1] : memref<2xf32, #tpu.memory_space<smem>>
    %c0_50 = arith.constant 0 : index
    %c0_51 = arith.constant 0 : index
    %104 = vector.load %arg15[%c0_50, %c0_51] : memref<1x256xf32, #tpu.memory_space<vmem>>, vector<1x256xf32>
    %105 = vector.broadcast %104 : vector<1x256xf32> to vector<8x256xf32>
    %106 = arith.mulf %101, %105 : vector<8x256xf32>
    %cst_52 = arith.constant dense<0.000000e+00> : vector<8xf32>
    %107 = vector.multi_reduction <add>, %106, %cst_52 [1] : vector<8x256xf32> to vector<8xf32>
    %108 = vector.shape_cast %107 : vector<8xf32> to vector<8x1xf32>
    %109 = vector.broadcast %103 : f32 to vector<8x1xf32>
    %110 = arith.addf %108, %109 : vector<8x1xf32>
    %cst_53 = arith.constant 0.000000e+00 : f32
    %111 = vector.broadcast %cst_53 : f32 to vector<8x1xf32>
    %112 = arith.subf %111, %110 : vector<8x1xf32>
    %113 = math.exp %112 : vector<8x1xf32>
    %cst_54 = arith.constant 1.000000e+00 : f32
    %114 = vector.broadcast %cst_54 : f32 to vector<8x1xf32>
    %115 = arith.addf %114, %113 : vector<8x1xf32>
    %cst_55 = arith.constant 1.000000e+00 : f32
    %116 = vector.broadcast %cst_55 : f32 to vector<8x1xf32>
    %117 = arith.divf %116, %115 : vector<8x1xf32>
    %cst_56 = arith.constant 1.000000e+00 : f32
    %118 = vector.broadcast %cst_56 : f32 to vector<8x1xf32>
    %119 = arith.subf %118, %117 : vector<8x1xf32>
    %120 = vector.broadcast %117 : vector<8x1xf32> to vector<8x256xf32>
    %121 = arith.mulf %120, %34 : vector<8x256xf32>
    %122 = vector.broadcast %119 : vector<8x1xf32> to vector<8x256xf32>
    %123 = arith.mulf %122, %65 : vector<8x256xf32>
    %124 = arith.addf %121, %123 : vector<8x256xf32>
    %125 = arith.truncf %124 : vector<8x256xf32> to vector<8x256xbf16>
    %c0_57 = arith.constant 0 : index
    %c0_58 = arith.constant 0 : index
    %126 = vector.load %arg16[%c0_57, %c0_58] : memref<256x256xbf16, #tpu.memory_space<vmem>>, vector<256x256xbf16>
    %cst_59 = arith.constant dense<0.000000e+00> : vector<8x256xf32>
    %127 = tpu.matmul %125, %126, %cst_59 {dimension_numbers = #tpu.dot_dimension_numbers<[1], [0], [0], [1], [0, 0, 1, 1], [], []>} : vector<8x256xbf16>, vector<256x256xbf16>, vector<8x256xf32> -> vector<8x256xf32>
    %c0_60 = arith.constant 0 : index
    %c0_61 = arith.constant 0 : index
    %128 = vector.load %arg17[%c0_60, %c0_61] : memref<1x256xf32, #tpu.memory_space<vmem>>, vector<1x256xf32>
    %129 = vector.broadcast %128 : vector<1x256xf32> to vector<8x256xf32>
    %130 = arith.addf %127, %129 : vector<8x256xf32>
    %c0_62 = arith.constant 0 : index
    %c0_63 = arith.constant 0 : index
    %131 = vector.load %arg18[%c0_62, %c0_63] : memref<1x256xf32, #tpu.memory_space<vmem>>, vector<1x256xf32>
    %c0_64 = arith.constant 0 : index
    %c0_65 = arith.constant 0 : index
    %132 = vector.load %arg19[%c0_64, %c0_65] : memref<1x256xf32, #tpu.memory_space<vmem>>, vector<1x256xf32>
    %cst_66 = arith.constant dense<0.000000e+00> : vector<8xf32>
    %133 = vector.multi_reduction <add>, %130, %cst_66 [1] : vector<8x256xf32> to vector<8xf32>
    %134 = vector.shape_cast %133 : vector<8xf32> to vector<8x1xf32>
    %cst_67 = arith.constant 2.560000e+02 : f32
    %135 = vector.broadcast %cst_67 : f32 to vector<8x1xf32>
    %136 = arith.divf %134, %135 : vector<8x1xf32>
    %137 = vector.broadcast %136 : vector<8x1xf32> to vector<8x256xf32>
    %138 = arith.subf %130, %137 : vector<8x256xf32>
    %139 = arith.mulf %138, %138 : vector<8x256xf32>
    %cst_68 = arith.constant dense<0.000000e+00> : vector<8xf32>
    %140 = vector.multi_reduction <add>, %139, %cst_68 [1] : vector<8x256xf32> to vector<8xf32>
    %141 = vector.shape_cast %140 : vector<8xf32> to vector<8x1xf32>
    %cst_69 = arith.constant 2.560000e+02 : f32
    %142 = vector.broadcast %cst_69 : f32 to vector<8x1xf32>
    %143 = arith.divf %141, %142 : vector<8x1xf32>
    %144 = vector.broadcast %136 : vector<8x1xf32> to vector<8x256xf32>
    %145 = arith.subf %130, %144 : vector<8x256xf32>
    %cst_70 = arith.constant 9.99999974E-6 : f32
    %146 = vector.broadcast %cst_70 : f32 to vector<8x1xf32>
    %147 = arith.addf %143, %146 : vector<8x1xf32>
    %148 = math.rsqrt %147 : vector<8x1xf32>
    %149 = vector.broadcast %148 : vector<8x1xf32> to vector<8x256xf32>
    %150 = arith.mulf %145, %149 : vector<8x256xf32>
    %151 = vector.broadcast %131 : vector<1x256xf32> to vector<8x256xf32>
    %152 = arith.mulf %150, %151 : vector<8x256xf32>
    %153 = vector.broadcast %132 : vector<1x256xf32> to vector<8x256xf32>
    %154 = arith.addf %152, %153 : vector<8x256xf32>
    %cst_71 = arith.constant 0.000000e+00 : f32
    %155 = vector.broadcast %cst_71 : f32 to vector<8x256xf32>
    %156 = arith.maximumf %154, %155 : vector<8x256xf32>
    %157 = arith.truncf %156 : vector<8x256xf32> to vector<8x256xbf16>
    %c0_72 = arith.constant 0 : index
    %c0_73 = arith.constant 0 : index
    %158 = vector.load %arg20[%c0_72, %c0_73] : memref<256x768xbf16, #tpu.memory_space<vmem>>, vector<256x768xbf16>
    %cst_74 = arith.constant dense<0.000000e+00> : vector<8x768xf32>
    %159 = tpu.matmul %157, %158, %cst_74 {dimension_numbers = #tpu.dot_dimension_numbers<[1], [0], [0], [1], [0, 0, 1, 1], [], []>} : vector<8x256xbf16>, vector<256x768xbf16>, vector<8x768xf32> -> vector<8x768xf32>
    %c0_75 = arith.constant 0 : index
    %c0_76 = arith.constant 0 : index
    %160 = vector.load %arg21[%c0_75, %c0_76] : memref<1x768xf32, #tpu.memory_space<vmem>>, vector<1x768xf32>
    %161 = vector.broadcast %160 : vector<1x768xf32> to vector<8x768xf32>
    %162 = arith.addf %159, %161 : vector<8x768xf32>
    %163 = vector.broadcast %102 : f32 to vector<8x768xf32>
    %164 = arith.mulf %163, %162 : vector<8x768xf32>
    %cst_77 = arith.constant 1.000000e+00 : f32
    %165 = arith.subf %cst_77, %102 : f32
    %166 = vector.broadcast %165 : f32 to vector<8x768xf32>
    %167 = arith.mulf %166, %0 : vector<8x768xf32>
    %168 = arith.addf %164, %167 : vector<8x768xf32>
    %c0_78 = arith.constant 0 : index
    %c0_79 = arith.constant 0 : index
    %169 = vector.load %arg23[%c0_78, %c0_79] : memref<8x768xf32, #tpu.memory_space<vmem>>, vector<8x768xf32>
    tpu.vector_store %arg23[%c0_78, %c0_79], %168 {strides = array<i32>} : memref<8x768xf32, #tpu.memory_space<vmem>>, vector<8x768xf32>,
    return
  }
  func.func @transform_0(%arg0: i32) -> (i32, i32) {
    %c0_i32 = arith.constant 0 : i32
    %c0_i32_0 = arith.constant 0 : i32
    return %arg0, %c0_i32 : i32, i32
  }
  func.func @transform_1(%arg0: i32) -> (i32, i32) {
    %c0_i32 = arith.constant 0 : i32
    %c0_i32_0 = arith.constant 0 : i32
    return %arg0, %c0_i32 : i32, i32
  }
  func.func @transform_2(%arg0: i32) -> (i32, i32) {
    %c0_i32 = arith.constant 0 : i32
    %c0_i32_0 = arith.constant 0 : i32
    %c0_i32_1 = arith.constant 0 : i32
    return %c0_i32, %c0_i32_0 : i32, i32
  }
  func.func @transform_3(%arg0: i32) -> (i32, i32) {
    %c0_i32 = arith.constant 0 : i32
    %c0_i32_0 = arith.constant 0 : i32
    %c0_i32_1 = arith.constant 0 : i32
    return %c0_i32, %c0_i32_0 : i32, i32
  }
  func.func @transform_4(%arg0: i32) -> (i32, i32) {
    %c0_i32 = arith.constant 0 : i32
    %c0_i32_0 = arith.constant 0 : i32
    %c0_i32_1 = arith.constant 0 : i32
    return %c0_i32, %c0_i32_0 : i32, i32
  }
  func.func @transform_5(%arg0: i32) -> (i32, i32) {
    %c0_i32 = arith.constant 0 : i32
    %c0_i32_0 = arith.constant 0 : i32
    %c0_i32_1 = arith.constant 0 : i32
    return %c0_i32, %c0_i32_0 : i32, i32
  }
  func.func @transform_6(%arg0: i32) -> (i32, i32) {
    %c0_i32 = arith.constant 0 : i32
    %c0_i32_0 = arith.constant 0 : i32
    %c0_i32_1 = arith.constant 0 : i32
    return %c0_i32, %c0_i32_0 : i32, i32
  }
  func.func @transform_7(%arg0: i32) -> (i32, i32) {
    %c0_i32 = arith.constant 0 : i32
    %c0_i32_0 = arith.constant 0 : i32
    %c0_i32_1 = arith.constant 0 : i32
    return %c0_i32, %c0_i32_0 : i32, i32
  }
  func.func @transform_8(%arg0: i32) -> (i32, i32) {
    %c0_i32 = arith.constant 0 : i32
    %c0_i32_0 = arith.constant 0 : i32
    %c0_i32_1 = arith.constant 0 : i32
    return %c0_i32, %c0_i32_0 : i32, i32
  }
  func.func @transform_9(%arg0: i32) -> (i32, i32) {
    %c0_i32 = arith.constant 0 : i32
    %c0_i32_0 = arith.constant 0 : i32
    %c0_i32_1 = arith.constant 0 : i32
    return %c0_i32, %c0_i32_0 : i32, i32
  }
  func.func @transform_10(%arg0: i32) -> (i32, i32) {
    %c0_i32 = arith.constant 0 : i32
    %c0_i32_0 = arith.constant 0 : i32
    %c0_i32_1 = arith.constant 0 : i32
    return %c0_i32, %c0_i32_0 : i32, i32
  }
  func.func @transform_11(%arg0: i32) -> (i32, i32) {
    %c0_i32 = arith.constant 0 : i32
    %c0_i32_0 = arith.constant 0 : i32
    %c0_i32_1 = arith.constant 0 : i32
    return %c0_i32, %c0_i32_0 : i32, i32
  }
  func.func @transform_12(%arg0: i32) -> (i32, i32) {
    %c0_i32 = arith.constant 0 : i32
    %c0_i32_0 = arith.constant 0 : i32
    %c0_i32_1 = arith.constant 0 : i32
    return %c0_i32, %c0_i32_0 : i32, i32
  }
  func.func @transform_13(%arg0: i32) -> (i32, i32) {
    %c0_i32 = arith.constant 0 : i32
    %c0_i32_0 = arith.constant 0 : i32
    %c0_i32_1 = arith.constant 0 : i32
    return %c0_i32, %c0_i32_0 : i32, i32
  }
  func.func @transform_14(%arg0: i32) -> (i32, i32) {
    %c0_i32 = arith.constant 0 : i32
    %c0_i32_0 = arith.constant 0 : i32
    %c0_i32_1 = arith.constant 0 : i32
    return %c0_i32, %c0_i32_0 : i32, i32
  }
  func.func @transform_15(%arg0: i32) -> (i32, i32) {
    %c0_i32 = arith.constant 0 : i32
    %c0_i32_0 = arith.constant 0 : i32
    %c0_i32_1 = arith.constant 0 : i32
    return %c0_i32, %c0_i32_0 : i32, i32
  }
  func.func @transform_16(%arg0: i32) -> (i32, i32) {
    %c0_i32 = arith.constant 0 : i32
    %c0_i32_0 = arith.constant 0 : i32
    %c0_i32_1 = arith.constant 0 : i32
    return %c0_i32, %c0_i32_0 : i32, i32
  }
  func.func @transform_17(%arg0: i32) -> (i32, i32) {
    %c0_i32 = arith.constant 0 : i32
    %c0_i32_0 = arith.constant 0 : i32
    %c0_i32_1 = arith.constant 0 : i32
    return %c0_i32, %c0_i32_0 : i32, i32
  }
  func.func @transform_18(%arg0: i32) -> (i32, i32) {
    %c0_i32 = arith.constant 0 : i32
    %c0_i32_0 = arith.constant 0 : i32
    %c0_i32_1 = arith.constant 0 : i32
    return %c0_i32, %c0_i32_0 : i32, i32
  }
  func.func @transform_19(%arg0: i32) -> (i32, i32) {
    %c0_i32 = arith.constant 0 : i32
    %c0_i32_0 = arith.constant 0 : i32
    %c0_i32_1 = arith.constant 0 : i32
    return %c0_i32, %c0_i32_0 : i32, i32
  }
  func.func @transform_20(%arg0: i32) -> (i32, i32) {
    %c0_i32 = arith.constant 0 : i32
    %c0_i32_0 = arith.constant 0 : i32
    %c0_i32_1 = arith.constant 0 : i32
    return %c0_i32, %c0_i32_0 : i32, i32
  }
  func.func @transform_21(%arg0: i32) -> i32 {
    %c0_i32 = arith.constant 0 : i32
    %c0_i32_0 = arith.constant 0 : i32
    return %c0_i32 : i32
  }
  func.func @transform_22(%arg0: i32) -> (i32, i32) {
    %c0_i32 = arith.constant 0 : i32
    %c0_i32_0 = arith.constant 0 : i32
    return %arg0, %c0_i32 : i32, i32
  }
}

</mosaic_0001>

<bundles_post_ra>
// kernel: tpu_custom_call.1
= control target key start
LH: loop header
LB: loop body
LE: loop exit
PB: predicated region body
PF: predicated region fallthrough
CT: control target
= control target key end

     0   :  { %s7426_s0 = inlined_call_operand.hbm [shape: f32[16,768], index: 0, kind: input, shape index: {}]   ;;  %s7427_s1 = inlined_call_operand.hbm [shape: f32[16,512], index: 1, kind: input, shape index: {}]   ;;  %s7428_s2 = inlined_call_operand.hbm [shape: bf16[768,256], index: 2, kind: input, shape index: {}]   ;;  %s7429_s3 = inlined_call_operand.vmem [shape: f32[1,256], index: 3, kind: input, shape index: {}]   ;;  %s7430_s4 = inlined_call_operand.hbm [shape: f32[1,256], index: 4, kind: input, shape index: {}]   ;;  %s7431_s5 = inlined_call_operand.vmem [shape: f32[1,256], index: 5, kind: input, shape index: {}]   ;;  %s7432_s6 = inlined_call_operand.hbm [shape: bf16[512,256], index: 6, kind: input, shape index: {}]   ;;  %s7433_s7 = inlined_call_operand.hbm [shape: f32[1,256], index: 7, kind: input, shape index: {}]   ;;  %s7434_s8 = inlined_call_operand.hbm [shape: f32[1,256], index: 8, kind: input, shape index: {}]   ;;  %s7435_s9 = inlined_call_operand.hbm [shape: f32[1,256], index: 9, kind: input, shape index: {}]   ;;  %s7436_s10 = inlined_call_operand.hbm [shape: bf16[512,256], index: 10, kind: input, shape index: {}]   ;;  %s7437_s11 = inlined_call_operand.hbm [shape: f32[1,256], index: 11, kind: input, shape index: {}]   ;;  %s7438_s12 = inlined_call_operand.hbm [shape: f32[1,256], index: 12, kind: input, shape index: {}]   ;;  %s7439_s13 = inlined_call_operand.vmem [shape: f32[1,256], index: 13, kind: input, shape index: {}]   ;;  %s7440_s14 = inlined_call_operand.hbm [shape: f32[1,256], index: 14, kind: input, shape index: {}]   ;;  %s7441_s15 = inlined_call_operand.hbm [shape: bf16[256,256], index: 15, kind: input, shape index: {}]   ;;  %s7442_s16 = inlined_call_operand.vmem [shape: f32[1,256], index: 16, kind: input, shape index: {}]   ;;  %s7443_s17 = inlined_call_operand.vmem [shape: f32[1,256], index: 17, kind: input, shape index: {}]   ;;  %s7444_s18 = inlined_call_operand.hbm [shape: f32[1,256], index: 18, kind: input, shape index: {}]   ;;  %s7445_s19 = inlined_call_operand.hbm [shape: bf16[256,768], index: 19, kind: input, shape index: {}]   ;;  %s7446_s20 = inlined_call_operand.vmem [shape: f32[1,768], index: 20, kind: input, shape index: {}]   ;;  %s7447_s21 = inlined_call_operand.vmem [shape: f32[2], index: 21, kind: input, shape index: {}]   ;;  %s7448_s22 = inlined_call_operand.hbm [shape: f32[16,768], index: 22, kind: output, shape index: {}]  }
   0x1   :  { %7456 = sst [smem:[#allocation42_spill]] %s7426_s0 }
   0x2   :  { %7457 = sst [smem:[#allocation43_spill]] %s7427_s1 }
   0x3   :  { %7458 = sst [smem:[#allocation44_spill]] %s7428_s2 }
   0x4   :  { %7459 = sst [smem:[#allocation45_spill]] %s7429_s3 }
   0x5   :  { %7460 = sst [smem:[#allocation46_spill]] %s7430_s4 }
   0x6   :  { %7461 = sst [smem:[#allocation47_spill]] %s7431_s5 }
   0x7   :  { %7462 = sst [smem:[#allocation48_spill]] %s7432_s6 }
   0x8   :  { %7463 = sst [smem:[#allocation49_spill]] %s7433_s7 }
   0x9   :  { %7464 = sst [smem:[#allocation50_spill]] %s7434_s8 }
   0xa   :  { %7465 = sst [smem:[#allocation51_spill]] %s7435_s9 }
   0xb   :  { %7466 = sst [smem:[#allocation52_spill]] %s7436_s10 }
   0xc   :  { %7467 = sst [smem:[#allocation53_spill]] %s7437_s11 }
   0xd   :  { %7468 = sst [smem:[#allocation54_spill]] %s7438_s12 }
   0xe   :  { %7469 = sst [smem:[#allocation55_spill]] %s7439_s13 }
   0xf   :  { %7470 = sst [smem:[#allocation56_spill]] %s7440_s14 }
  0x10   :  { %7471 = sst [smem:[#allocation57_spill]] %s7441_s15 }
  0x11   :  { %7472 = sst [smem:[#allocation58_spill]] %s7442_s16 }
  0x12   :  { %7473 = sst [smem:[#allocation59_spill]] %s7443_s17 }
  0x13   :  { %7474 = sst [smem:[#allocation60_spill]] %s7446_s20 }
  0x14   :  { %7475 = sst [smem:[#allocation61_spill]] %s7448_s22 }
  0x15   :  { %27 = vsyncpa [#allocation3], 0 }
  0x16   :  { %29 = vsyncpa [#allocation3 + $0x1], 0 }
  0x17   :  { %30 = vsyncpa [#allocation7], 0 }
  0x18   :  { %32 = vsyncpa [#allocation7 + $0x1], 0 }
  0x19   :  { %33 = vsyncpa [#allocation10], 0 }
  0x1a   :  { %34 = vsyncpa [#allocation13], 0 }
  0x1b   :  { %35 = vsyncpa [#allocation16], 0 }
  0x1c   :  { %36 = vsyncpa [#allocation19], 0 }
  0x1d   :  { %37 = vsyncpa [#allocation22], 0 }
  0x1e   :  { %38 = vsyncpa [#allocation25], 0 }
  0x1f   :  { %39 = vsyncpa [#allocation5], 0 }
  0x20   :  { %40 = vsyncpa [#allocation4], 0 }
  0x21   :  { %42 = vsyncpa [#allocation4 + $0x1], 0  ;;  %s6924_s3 = smov 0   ;;  %s6926_s28 = smov 0  }
  0x22   :  { %s6928_s29 = smov 0   ;;  %s6930_s30 = smov 0  }
  0x23 LB: > { %s7476_s23 = sld [smem:[#allocation44_spill]]  ;;  %s6948_s5 = sadd.s32 4294967295, %s6788_s30   ;;  %s6788_s30 = sphi %s6930_s30, %s7512_s30   ;;  %s6784_s29 = sphi %s6928_s29, %s7511_s29   ;;  %s6780_s28 = sphi %s6926_s28, %s7510_s28   ;;  %s6776_s3 = sphi %s6924_s3, %s7509_s3  }
  0x24   : > { %7477 = sst [smem:[#allocation40_spill]] %s6948_s5  ;;  %p4199_p0 = scmp.ge.s32.totalorder %s6788_s30, 1 }
  0x25   : > { %p69_p1 = scmp.eq.s32.totalorder %s6948_s5, 0  ;;  %p551_p2 = scmp.lt.s32.totalorder %s6788_s30, 3 }
  0x26   : > { %s6790_s6 = smov [#allocation8]   ;;  %s7480_s27 = sld [smem:[#allocation46_spill]] }
  0x27   : > { %p6953_p3 = pnand %p4199_p0, %p551_p2  ;;  %s564_s25 = sshll.u32 %s6790_s6, 4  ;;  %s565_s25 = int_to_ptr.vmem [resolvable:$true] %s564_s25 }
  0x28   : > { %s7482_s7 = sld [smem:[#allocation49_spill]]  ;;  %s6791_s20 = smov [#allocation9]  }
  0x29   : > { %s562_s1 = sshll.u32 %s7476_s23, 4  ;;  %p6066_p4 = pneg %p6953_p3  ;;  %s563_s1 = int_to_ptr.hbm [resolvable:$true] %s562_s1 }
  0x2a   : > { %s7478_s24 = scalar_select %p6953_p3, 1, 0 }
  0x2b   : > { %p6965_p6 = pnand %p6066_p4, %p69_p1  ;;  %s582_s17 = sshll.u32 %s6791_s20, 4  ;;  %s583_s17 = int_to_ptr.vmem [resolvable:$true] %s582_s17 }
  0x2c   : > { %7479 = sst [smem:[#allocation41_spill]] %s7478_s24  ;;  %s580_s4 = sshll.u32 %s7480_s27, 4  ;;  %s581_s4 = int_to_ptr.hbm [resolvable:$true] %s580_s4 }
  0x2d   : > { %s6792_s16 = smov 128   ;;  %s6793_s13 = smov 8  }
  0x2e   : > { %s609_s6 = sshll.u32 %s7482_s7, 4  ;;  %s7483_s9 = sld [smem:[#allocation51_spill]]  ;;  %s610_s6 = int_to_ptr.hbm [resolvable:$true] %s609_s6 }
  0x2f   : > { %6069 = dma.hbm_to_vmem [thread:$0]  (!%p6965_p6), %s563_s1, 12288, %s565_s25, [#allocation7], %s6792_s16, %s6792_s16, %s6793_s13  }
  0x30   : > { %6072 = dma.hbm_to_vmem [thread:$0]  (!%p6965_p6), %s581_s4, 32, %s583_s17, [#allocation10]  }
  0x31   : > { %s6794_s22 = smov [#allocation12]   ;;  %s6795_s20 = smov [#allocation15]  }
  0x32   : > { %s611_s23 = sshll.u32 %s6794_s22, 4  ;;  %s635_s7 = sshll.u32 %s6795_s20, 4  ;;  %s612_s23 = int_to_ptr.vmem [resolvable:$true] %s611_s23  ;;  %s636_s7 = int_to_ptr.vmem [resolvable:$true] %s635_s7 }
  0x33   : > { %6078 = dma.hbm_to_vmem [thread:$0]  (!%p6965_p6), %s610_s6, 32, %s612_s23, [#allocation13]  }
  0x34   : > { %s633_s27 = sshll.u32 %s7483_s9, 4  ;;  %s7484_s11 = sld [smem:[#allocation53_spill]]  ;;  %s634_s27 = int_to_ptr.hbm [resolvable:$true] %s633_s27 }
  0x35   : > { %6084 = dma.hbm_to_vmem [thread:$0]  (!%p6965_p6), %s634_s27, 32, %s636_s7, [#allocation16]  }
  0x36   : > { %s7485_s14 = sld [smem:[#allocation56_spill]]  ;;  %s6796_s26 = smov [#allocation18]  }
  0x37   : > { %s661_s2 = sshll.u32 %s6796_s26, 4  ;;  %s6797_s6 = smov [#allocation21]   ;;  %s662_s2 = int_to_ptr.vmem [resolvable:$true] %s661_s2 }
  0x38   : > { %s688_s22 = sshll.u32 %s6797_s6, 4  ;;  %s718_s23 = sshll.u32 %s7444_s18, 4  ;;  %s689_s22 = int_to_ptr.vmem [resolvable:$true] %s688_s22  ;;  %s719_s23 = int_to_ptr.hbm [resolvable:$true] %s718_s23 }
  0x39   : > { %s7486_s20 = sld [smem:[#allocation48_spill]]  ;;  %s6798_s25 = smov [#allocation24]  }
  0x3a   : > { %s659_s1 = sshll.u32 %s7484_s11, 4  ;;  %s720_s26 = sshll.u32 %s6798_s25, 4  ;;  %s660_s1 = int_to_ptr.hbm [resolvable:$true] %s659_s1  ;;  %s721_s26 = int_to_ptr.vmem [resolvable:$true] %s720_s26 }
  0x3b   : > { %6090 = dma.hbm_to_vmem [thread:$0]  (!%p6965_p6), %s660_s1, 32, %s662_s2, [#allocation19]  }
  0x3c   : > { %s686_s4 = sshll.u32 %s7485_s14, 4  ;;  %s6799_s1 = smov [#allocation11]   ;;  %s687_s4 = int_to_ptr.hbm [resolvable:$true] %s686_s4 }
  0x3d   : > { %6096 = dma.hbm_to_vmem [thread:$0]  (!%p6965_p6), %s687_s4, 32, %s689_s22, [#allocation22]  }
  0x3e   : > { %6102 = dma.hbm_to_vmem [thread:$0]  (!%p6965_p6), %s719_s23, 32, %s721_s26, [#allocation25]  }
  0x3f   : > { %s594_s17 = sshll.u32 %s7486_s20, 4  ;;  %s596_s2 = sshll.u32 %s6799_s1, 4  ;;  %s595_s17 = int_to_ptr.hbm [resolvable:$true] %s594_s17  ;;  %s597_s2 = int_to_ptr.vmem [resolvable:$true] %s596_s2 }
  0x40   : > { %s7487_s8 = sld [smem:[#allocation50_spill]]  ;;  %s6800_s27 = smov [#allocation14]  }
  0x41   : > { %6075 = dma.hbm_to_vmem [thread:$0]  (!%p6965_p6), %s595_s17, 8192, %s597_s2, [#allocation10], %s6792_s16, %s6792_s16, %s6793_s13  }
  0x42   : > { %s7488_s10 = sld [smem:[#allocation52_spill]]  ;;  %s623_s23 = sshll.u32 %s6800_s27, 4  ;;  %s624_s23 = int_to_ptr.vmem [resolvable:$true] %s623_s23 }
  0x43   : > { %s6801_s20 = smov [#allocation17]   ;;  %s7489_s12 = sld [smem:[#allocation54_spill]] }
  0x44   : > { %s646_s25 = sshll.u32 %s6801_s20, 4  ;;  %s7490_s15 = sld [smem:[#allocation57_spill]]  ;;  %s647_s25 = int_to_ptr.vmem [resolvable:$true] %s646_s25 }
  0x45   : > { %s6802_s4 = smov [#allocation20]   ;;  %s6803_s22 = smov [#allocation23]  }
  0x46   : > { %s621_s24 = sshll.u32 %s7487_s8, 4  ;;  %s699_s27 = sshll.u32 %s6803_s22, 4  ;;  %s622_s24 = int_to_ptr.hbm [resolvable:$true] %s621_s24  ;;  %s700_s27 = int_to_ptr.vmem [resolvable:$true] %s699_s27 }
  0x47   : > { %6081 = dma.hbm_to_vmem [thread:$0]  (!%p6965_p6), %s622_s24, 32, %s624_s23, [#allocation13]  }
  0x48   : > { %s644_s7 = sshll.u32 %s7488_s10, 4  ;;  %s673_s24 = sshll.u32 %s6802_s4, 4  ;;  %s645_s7 = int_to_ptr.hbm [resolvable:$true] %s644_s7  ;;  %s674_s24 = int_to_ptr.vmem [resolvable:$true] %s673_s24 }
  0x49   : > { %s671_s6 = sshll.u32 %s7489_s12, 4  ;;  %s747_s17 = sshll.u32 %s7447_s21, 4  ;;  %s672_s6 = int_to_ptr.hbm [resolvable:$true] %s671_s6  ;;  %s748_s17 = int_to_ptr.vmem [resolvable:$true] %s747_s17 }
  0x4a   : > { %6087 = dma.hbm_to_vmem [thread:$0]  (!%p6965_p6), %s645_s7, 8192, %s647_s25, [#allocation16], %s6792_s16, %s6792_s16, %s6793_s13  }
  0x4b   : > { %s697_s5 = sshll.u32 %s7490_s15, 4  ;;  %s729_s7 = sshll.u32 %s7445_s19, 4  ;;  %s698_s5 = int_to_ptr.hbm [resolvable:$true] %s697_s5  ;;  %s730_s7 = int_to_ptr.hbm [resolvable:$true] %s729_s7 }
  0x4c   : > { %6093 = dma.hbm_to_vmem [thread:$0]  (!%p6965_p6), %s672_s6, 32, %s674_s24, [#allocation19]  }
  0x4d   : > { %6099 = dma.hbm_to_vmem [thread:$0]  (!%p6965_p6), %s698_s5, 4096, %s700_s27, [#allocation22], %s6792_s16, %s6792_s16, %s6793_s13  }
  0x4e   : > { %s6804_s25 = smov [#allocation26]   ;;  %s6805_s2 = smov 384  }
  0x4f   : > { %s731_s26 = sshll.u32 %s6804_s25, 4  ;;  %s7491_s4 = sld [smem:[#allocation40_spill]]  ;;  %s732_s26 = int_to_ptr.vmem [resolvable:$true] %s731_s26 }
  0x50   : > { %s6806_s24 = smov 24   ;;  %s6807_s13 = smov [#allocation27]  }
  0x51   : > { %6105 = dma.hbm_to_vmem [thread:$0]  (!%p6965_p6), %s730_s7, 12288, %s732_s26, [#allocation25], %s6805_s2, %s6805_s2, %s6806_s24  }
  0x52   : > { %6108 = dma.vmem_to_smem (!%p6965_p6), %s748_s17, 16, %s6807_s13, [#allocation5]  }
  0x53   : > { %s4198_s16 = sadd.s32 4294967294, %s6788_s30   ;;  %s7047_s5 = sadd.s32 1, %s6788_s30  }
  0x54   : > { %s52_s22 = ssub.s32 %s6788_s30, %s7047_s5  ;;  %s55_s27 = sadd.s32 1, %s6784_s29 }
  0x55   : > { %p53_p7 = scmp.eq.s32.totalorder %s52_s22, 0  ;;  %p62_p8 = scmp.ne.s32.totalorder %s6784_s29, %s6780_s28 }
  0x56   : > { %p63_p9 = scmp.eq.s32.totalorder %s6788_s30, 0  ;;  %p68_p10 = scmp.ne.s32.totalorder %s6780_s28, %s6776_s3 }
  0x57   : > { %s7058_s23 = scalar_select %p53_p7, %s6784_s29, %s55_s27  }
  0x58   : > { %p64_p11 = por %p63_p9, %p62_p8  ;;  %p7062_p12 = por %p69_p1, %p68_p10 }
  0x59   : > { %p538_p13 = scmp.eq.s32.totalorder %s7491_s4, 1  ;;  %p544_p0 = scmp.eq.s32.totalorder %s4198_s16, 1 }
  0x5a   : > { %p6134_p2 = scmp.lt.s32.totalorder %s6788_s30, 2  ;;  %s7069_s20 = sand.u32 1, %s6784_s29  }
  0x5b   : > { %p7071_p4 = por %p538_p13, %p62_p8  ;;  %p7075_p6 = por %p544_p0, %p68_p10 }
  0x5c   : > { %s6000_s26 = smul.u32 48, %s7069_s20  ;;  %p7081_p7 = pnand %p6134_p2, %p64_p11 }
  0x5d   : > { %s6001_s1 = smul.u32 48, %s6788_s30  ;;  %s7496_s24 = sld [smem:[#allocation42_spill]] }
  0x5e   : > { %s762_s16 = scalar_lea.vmem [#allocation2], %s6000_s26  ;;  %s759_s8 = scalar_lea.sflag [#allocation3], %s7069_s20 }
  0x5f   : > { %s771_s22 = sshll.u32 %s762_s16, 4  ;;  %p6630_p9 = pneg %p7081_p7  ;;  %s772_s22 = int_to_ptr.vmem [resolvable:$true] %s771_s22 }
  0x63   : > { %s767_s13 = scalar_lea.hbm %s7496_s24, %s6001_s1  ;;  %s6633_s1 = scalar_lea.hbm %s7496_s24, 96 }
  0x64   : > { %s769_s27 = sshll.u32 %s767_s13, 4  ;;  %s770_s27 = int_to_ptr.hbm [resolvable:$true] %s769_s27 }
  0x65   : > { %s6626_s9 = sshra.s32 %s770_s27, 4  ;;  %s6627_s9 = int_to_ptr.hbm [resolvable:$true] %s6626_s9 }
  0x66   : > { %s6628_s10 = scalar_lea.hbm %s6627_s9, 48  ;;  %p6634_p13 = scmp.lt.s32.totalorder %s6627_s9, %s7496_s24 }
  0x67   : > { %p6629_p8 = scmp.ne.s32.totalorder %s6627_s9, %s6628_s10  ;;  %p6635_p0 = scmp.lt.s32.totalorder %s6633_s1, %s6628_s10 }
  0x69   : > { %p6631_p10 = pnand %p6630_p9, %p6629_p8  ;;  %p6636_p2 = por %p6635_p0, %p6634_p13 }
  0x6b   : > { %p6632_p11 = pneg %p6631_p10 }
  0x6d   : > { %p6637_p5 = pnand %p6636_p2, %p6632_p11 }
  0x6f   : > { %6640 = shalt.err (!%p6637_p5)
}
  0x70   : > { %6112 = dma.hbm_to_vmem [thread:$0]  (!%p7081_p7), %s770_s27, 768, %s772_s22, %s759_s8  }
  0x71   : > { %s4216_s4 = sshll.u32 %s7069_s20, 5  ;;  %s5647_s13 = sshll.u32 %s6788_s30, 5 }
  0x72   : > { %s7497_s17 = sld [smem:[#allocation43_spill]]  ;;  %s782_s14 = scalar_lea.vmem [#allocation6], %s4216_s4 }
  0x73   : > { %s791_s26 = sshll.u32 %s782_s14, 4  ;;  %s7498_s10 = sand.u32 1, %s6788_s30   ;;  %s792_s26 = int_to_ptr.vmem [resolvable:$true] %s791_s26 }
  0x74   : > { %s779_s1 = scalar_lea.sflag [#allocation7], %s7498_s10 }
  0x78   : > { %s787_s12 = scalar_lea.hbm %s7497_s17, %s5647_s13  ;;  %s6663_s22 = scalar_lea.hbm %s7497_s17, 64 }
  0x79   : > { %s789_s9 = sshll.u32 %s787_s12, 4  ;;  %s790_s9 = int_to_ptr.hbm [resolvable:$true] %s789_s9 }
  0x7a   : > { %s6656_s2 = sshra.s32 %s790_s9, 4  ;;  %s6657_s2 = int_to_ptr.hbm [resolvable:$true] %s6656_s2 }
  0x7b   : > { %s6658_s15 = scalar_lea.hbm %s6657_s2, 32  ;;  %p6664_p11 = scmp.lt.s32.totalorder %s6657_s2, %s7497_s17 }
  0x7c   : > { %p6659_p5 = scmp.ne.s32.totalorder %s6657_s2, %s6658_s15  ;;  %p6665_p13 = scmp.lt.s32.totalorder %s6663_s22, %s6658_s15 }
  0x7e   : > { %p6661_p8 = pnand %p6659_p5, %p6630_p9  ;;  %p6666_p0 = por %p6665_p13, %p6664_p11 }
  0x80   : > { %p6662_p10 = pneg %p6661_p8 }
  0x82   : > { %p6667_p2 = pnand %p6666_p0, %p6662_p10 }
  0x84   : > { %6670 = shalt.err (!%p6667_p2)
}
  0x85   : > { %6115 = dma.hbm_to_vmem [thread:$0]  (!%p7081_p7), %s790_s9, 512, %s792_s26, %s779_s1  }
  0x86   : > { %800 = sbr.rel (%p6953_p3) target bundleno = 1916 (0x77c), region = 108  ;;  %s7124_s14 = sand.u32 (!%p6953_p3), 1, %s6780_s28  }
  0x87   : > { %s6002_s13 = smul.u32 (!%p6953_p3), 48, %s7124_s14  ;;  %s803_s16 = scalar_lea.sflag (!%p6953_p3), [#allocation3], %s7124_s14 }
  0x89   : > { %s7130_s15 = scalar_lea.vmem (!%p6953_p3), [#allocation2], %s6002_s13 }
  0x8b   : > { %6731 = dma.done.wait (%p7062_p12), %s803_s16, 768  }
  0x8c   : > { %6733 = vsyncadd (%p7062_p12), %s803_s16, 4294966528  ;;  %s7500_s6 = sld [smem:[#allocation40_spill]]  ;;  %s4220_s26 = sshll.u32 %s7124_s14, 5 }
  0x8d   : > { %s7138_s10 = scalar_lea.vmem [#allocation6], %s4220_s26 }
  0x92   : > { %s812_s11 = sand.u32 1, %s7500_s6  }
  0x93   : > { %s813_s9 = scalar_lea.sflag [#allocation7], %s812_s11 }
  0x94   : > { %6735 = dma.done.wait (%p7062_p12), %s813_s9, 512  }
  0x95   : > { %6737 = vsyncadd (%p7062_p12), %s813_s9, 4294966784 }
  0x96   : > { %6739 = dma.done.wait (%p69_p1), [#allocation7], 12288  }
  0x97   : > { %6741 = vsyncadd (%p69_p1), [#allocation7], 4294955008 }
  0x98   : > { %6743 = dma.done.wait (%p69_p1), [#allocation10], 8224  }
  0x99   : > { %6745 = vsyncadd (%p69_p1), [#allocation10], 4294959072 }
  0x9a   : > { %6747 = dma.done.wait (%p69_p1), [#allocation13], 64  }
  0x9b   : > { %6749 = vsyncadd (%p69_p1), [#allocation13], 4294967232 }
  0x9c   : > { %6751 = dma.done.wait (%p69_p1), [#allocation16], 8224  }
  0x9d   : > { %6753 = vsyncadd (%p69_p1), [#allocation16], 4294959072 }
  0x9e   : > { %6755 = dma.done.wait (%p69_p1), [#allocation19], 64  }
  0x9f   : > { %6757 = vsyncadd (%p69_p1), [#allocation19], 4294967232 }
  0xa0   : > { %6759 = dma.done.wait (%p69_p1), [#allocation22], 4128  }
  0xa1   : > { %6761 = vsyncadd (%p69_p1), [#allocation22], 4294963168 }
  0xa2   : > { %6763 = dma.done.wait (%p69_p1), [#allocation25], 12320  }
  0xa3   : > { %6765 = vsyncadd (%p69_p1), [#allocation25], 4294954976 }
  0xa4   : > { %6767 = dma.done.wait (%p69_p1), [#allocation5], 16  }
  0xa5   : > { %6769 = vsyncadd (%p69_p1), [#allocation5], 4294967280 }
  0xa6   : > { %892 = sfence }
  0xa7   : > { %v4293_v0 = vld [vmem:[#allocation8 + $0x70] sm:$0xf]  ;;  %v5663_v1 = vld [vmem:[#allocation8 + $0x74] sm:$0xf0]  ;;  %v4285_v11 = vld [vmem:[#allocation8 + $0x60] sm:$0xf] }
  0xa8   : > { %v4357_v2 = vld [vmem:[#allocation8 + $0xf0] sm:$0xf]  ;;  %v4294_v3 = vor.u32 %v5663_v1, %v4293_v0  ;;  %v5679_v4 = vld [vmem:[#allocation8 + $0xf4] sm:$0xf0]  ;;  %v5661_v13 = vld [vmem:[#allocation8 + $0x64] sm:$0xf0] }
  0xa9   : > { %v4421_v5 = vld [vmem:[#allocation8 + $0x170] sm:$0xf]  ;;  %v5695_v6 = vld [vmem:[#allocation8 + $0x174] sm:$0xf0]  ;;  %v4358_v7 = vor.u32 %v5679_v4, %v4357_v2  ;;  %v4349_v14 = vld [vmem:[#allocation8 + $0xe0] sm:$0xf]  ;;  %v4286_v16 = vor.u32 %v5661_v13, %v4285_v11 }
  0xaa   : > { %v4422_v8 = vor.u32 %v5695_v6, %v4421_v5  ;;  %v4485_v9 = vld [vmem:[#allocation8 + $0x1f0] sm:$0xf]  ;;  %v5711_v10 = vld [vmem:[#allocation8 + $0x1f4] sm:$0xf0]  ;;  %1556 = vmatpush.bf16.msra.mxu0 %v4294_v3  ;;  %v5677_v15 = vld [vmem:[#allocation8 + $0xe4] sm:$0xf0] }
  0xab   : > { %v4486_v12 = vor.u32 %v5711_v10, %v4485_v9  ;;  %1569 = vmatpush.bf16.msra.mxu1 %v4358_v7  ;;  %v4350_v17 = vor.u32 %v5677_v15, %v4349_v14  ;;  %v4413_v18 = vld [vmem:[#allocation8 + $0x160] sm:$0xf]  ;;  %v5693_v19 = vld [vmem:[#allocation8 + $0x164] sm:$0xf0]  ;;  %v4277_v23 = vld [vmem:[#allocation8 + $0x50] sm:$0xf] }
  0xac   : > { %1582 = vmatpush.bf16.msra.mxu2 %v4422_v8  ;;  %v4477_v20 = vld [vmem:[#allocation8 + $0x1e0] sm:$0xf]  ;;  %v4414_v21 = vor.u32 %v5693_v19, %v4413_v18  ;;  %v5709_v22 = vld [vmem:[#allocation8 + $0x1e4] sm:$0xf0]  ;;  %v5659_v24 = vld [vmem:[#allocation8 + $0x54] sm:$0xf0] }
  0xad   : > { %1595 = vmatpush.bf16.msra.mxu3 %v4486_v12  ;;  %v4478_v25 = vor.u32 %v5709_v22, %v4477_v20  ;;  %v4341_v26 = vld [vmem:[#allocation8 + $0xd0] sm:$0xf]  ;;  %v5675_v27 = vld [vmem:[#allocation8 + $0xd4] sm:$0xf0]  ;;  %v4278_v29 = vor.u32 %v5659_v24, %v4277_v23  ;;  %v4269_v35 = vld [vmem:[#allocation8 + $0x40] sm:$0xf] }
  0xae   : > { %v4405_v28 = vld [vmem:[#allocation8 + $0x150] sm:$0xf]  ;;  %1557 = vmatpush.bf16.msra.mxu0 %v4286_v16  ;;  %v5691_v30 = vld [vmem:[#allocation8 + $0x154] sm:$0xf0]  ;;  %v4342_v33 = vor.u32 %v5675_v27, %v4341_v26  ;;  %v5657_v36 = vld [vmem:[#allocation8 + $0x44] sm:$0xf0] }
  0xaf   : > { %v4469_v31 = vld [vmem:[#allocation8 + $0x1d0] sm:$0xf]  ;;  %v5707_v32 = vld [vmem:[#allocation8 + $0x1d4] sm:$0xf0]  ;;  %1570 = vmatpush.bf16.msra.mxu1 %v4350_v17  ;;  %v4406_v34 = vor.u32 %v5691_v30, %v4405_v28  ;;  %v4333_v37 = vld [vmem:[#allocation8 + $0xc0] sm:$0xf]  ;;  %v4270_v44 = vor.u32 %v5657_v36, %v4269_v35 }
  0xb0   : > { %1583 = vmatpush.bf16.msra.mxu2 %v4414_v21  ;;  %v4470_v38 = vor.u32 %v5707_v32, %v4469_v31  ;;  %v5673_v39 = vld [vmem:[#allocation8 + $0xc4] sm:$0xf0]  ;;  %v4397_v40 = vld [vmem:[#allocation8 + $0x140] sm:$0xf]  ;;  %v4261_v47 = vld [vmem:[#allocation8 + $0x30] sm:$0xf] }
  0xb1   : > { %1596 = vmatpush.bf16.msra.mxu3 %v4478_v25  ;;  %v5689_v41 = vld [vmem:[#allocation8 + $0x144] sm:$0xf0]  ;;  %v4461_v42 = vld [vmem:[#allocation8 + $0x1c0] sm:$0xf]  ;;  %v4334_v45 = vor.u32 %v5673_v39, %v4333_v37  ;;  %v5655_v48 = vld [vmem:[#allocation8 + $0x34] sm:$0xf0] }
  0xb2   : > { %v5705_v43 = vld [vmem:[#allocation8 + $0x1c4] sm:$0xf0]  ;;  %1558 = vmatpush.bf16.msra.mxu0 %v4278_v29  ;;  %v4398_v46 = vor.u32 %v5689_v41, %v4397_v40  ;;  %v4325_v49 = vld [vmem:[#allocation8 + $0xb0] sm:$0xf]  ;;  %v5671_v51 = vld [vmem:[#allocation8 + $0xb4] sm:$0xf0]  ;;  %v4262_v56 = vor.u32 %v5655_v48, %v4261_v47 }
  0xb3   : > { %1571 = vmatpush.bf16.msra.mxu1 %v4342_v33  ;;  %v4462_v50 = vor.u32 %v5705_v43, %v4461_v42  ;;  %v4389_v52 = vld [vmem:[#allocation8 + $0x130] sm:$0xf]  ;;  %v5687_v53 = vld [vmem:[#allocation8 + $0x134] sm:$0xf0]  ;;  %v4326_v57 = vor.u32 %v5671_v51, %v4325_v49  ;;  %v4253_v59 = vld [vmem:[#allocation8 + $0x20] sm:$0xf] }
  0xb4   : > { %1584 = vmatpush.bf16.msra.mxu2 %v4406_v34  ;;  %v4453_v54 = vld [vmem:[#allocation8 + $0x1b0] sm:$0xf]  ;;  %v5703_v55 = vld [vmem:[#allocation8 + $0x1b4] sm:$0xf0]  ;;  %v4390_v58 = vor.u32 %v5687_v53, %v4389_v52  ;;  %v5653_v60 = vld [vmem:[#allocation8 + $0x24] sm:$0xf0] }
  0xb5   : > { %1597 = vmatpush.bf16.msra.mxu3 %v4470_v38  ;;  %v4317_v61 = vld [vmem:[#allocation8 + $0xa0] sm:$0xf]  ;;  %v4454_v62 = vor.u32 %v5703_v55, %v4453_v54  ;;  %v5669_v63 = vld [vmem:[#allocation8 + $0xa4] sm:$0xf0]  ;;  %v4254_v4 = vor.u32 %v5653_v60, %v4253_v59  ;;  %v4245_v7 = vld [vmem:[#allocation8 + $0x10] sm:$0xf] }
  0xb6   : > { %1559 = vmatpush.bf16.msra.mxu0 %v4270_v44  ;;  %v4381_v0 = vld [vmem:[#allocation8 + $0x120] sm:$0xf]  ;;  %v5685_v1 = vld [vmem:[#allocation8 + $0x124] sm:$0xf0]  ;;  %v4318_v5 = vor.u32 %v5669_v63, %v4317_v61  ;;  %v5651_v8 = vld [vmem:[#allocation8 + $0x14] sm:$0xf0] }
  0xb7   : > { %1572 = vmatpush.bf16.msra.mxu1 %v4334_v45  ;;  %v4445_v2 = vld [vmem:[#allocation8 + $0x1a0] sm:$0xf]  ;;  %v5701_v3 = vld [vmem:[#allocation8 + $0x1a4] sm:$0xf0]  ;;  %v4382_v6 = vor.u32 %v5685_v1, %v4381_v0  ;;  %v4309_v9 = vld [vmem:[#allocation8 + $0x90] sm:$0xf]  ;;  %v4246_v16 = vor.u32 %v5651_v8, %v4245_v7 }
  0xb8   : > { %1585 = vmatpush.bf16.msra.mxu2 %v4398_v46  ;;  %v4446_v10 = vor.u32 %v5701_v3, %v4445_v2  ;;  %v5667_v11 = vld [vmem:[#allocation8 + $0x94] sm:$0xf0]  ;;  %v4373_v12 = vld [vmem:[#allocation8 + $0x110] sm:$0xf]  ;;  %v4237_v17 = vld [vmem:[#allocation8] sm:$0xf] }
  0xb9   : > { %1598 = vmatpush.bf16.msra.mxu3 %v4462_v50  ;;  %v5683_v13 = vld [vmem:[#allocation8 + $0x114] sm:$0xf0]  ;;  %v4437_v14 = vld [vmem:[#allocation8 + $0x190] sm:$0xf]  ;;  %v5649_v18 = vld [vmem:[#allocation8 + $0x4] sm:$0xf0]  ;;  %v4310_v19 = vor.u32 %v5667_v11, %v4309_v9 }
  0xba   : > { %1560 = vmatpush.bf16.msra.mxu0 %v4262_v56  ;;  %v5699_v15 = vld [vmem:[#allocation8 + $0x194] sm:$0xf0]  ;;  %v4374_v20 = vor.u32 %v5683_v13, %v4373_v12  ;;  %v4301_v21 = vld [vmem:[#allocation8 + $0x80] sm:$0xf]  ;;  %v5665_v22 = vld [vmem:[#allocation8 + $0x84] sm:$0xf0]  ;;  %v4238_v31 = vor.u32 %v5649_v18, %v4237_v17 }
  0xbb   : > { %1573 = vmatpush.bf16.msra.mxu1 %v4326_v57  ;;  %v4365_v23 = vld [vmem:[#allocation8 + $0x100] sm:$0xf]  ;;  %v4438_v24 = vor.u32 %v5699_v15, %v4437_v14  ;;  %v5681_v25 = vld [vmem:[#allocation8 + $0x104] sm:$0xf0]  ;;  %v4549_v28 = vld [vmem:[#allocation8 + $0x270] sm:$0xf]  ;;  %v4302_v35 = vor.u32 %v5665_v22, %v4301_v21 }
  0xbc   : > { %1586 = vmatpush.bf16.msra.mxu2 %v4390_v58  ;;  %v4429_v26 = vld [vmem:[#allocation8 + $0x180] sm:$0xf]  ;;  %v5697_v27 = vld [vmem:[#allocation8 + $0x184] sm:$0xf0]  ;;  %v5727_v29 = vld [vmem:[#allocation8 + $0x274] sm:$0xf0]  ;;  %v4366_v36 = vor.u32 %v5681_v25, %v4365_v23 }
  0xbd   : > { %1599 = vmatpush.bf16.msra.mxu3 %v4454_v62  ;;  %v4613_v30 = vld [vmem:[#allocation8 + $0x2f0] sm:$0xf]  ;;  %v5743_v32 = vld [vmem:[#allocation8 + $0x2f4] sm:$0xf0]  ;;  %v5662_v33 = vld [vmem:[#allocation8 + $0x74] sm:$0xf]  ;;  %v4430_v39 = vor.u32 %v5697_v27, %v4429_v26  ;;  %v4550_v40 = vor.u32 %v5727_v29, %v4549_v28 }
  0xbe   : > { %1561 = vmatpush.bf16.msra.mxu0 %v4254_v4  ;;  %v4295_v34 = vld [vmem:[#allocation8 + $0x78] sm:$0xf0]  ;;  %v5678_v37 = vld [vmem:[#allocation8 + $0xf4] sm:$0xf]  ;;  %v4614_v41 = vor.u32 %v5743_v32, %v4613_v30  ;;  %v4541_v43 = vld [vmem:[#allocation8 + $0x260] sm:$0xf] }
  0xbf   : > { %1574 = vmatpush.bf16.msra.mxu1 %v4318_v5  ;;  %v4359_v38 = vld [vmem:[#allocation8 + $0xf8] sm:$0xf0]  ;;  %v4298_v42 = vor.u32 %v5662_v33, %v4295_v34  ;;  %v5725_v44 = vld [vmem:[#allocation8 + $0x264] sm:$0xf0]  ;;  %v4605_v45 = vld [vmem:[#allocation8 + $0x2e0] sm:$0xf] }
  0xc0   : > { %1587 = vmatpush.bf16.msra.mxu2 %v4382_v6  ;;  %v4362_v46 = vor.u32 %v5678_v37, %v4359_v38  ;;  %v5741_v47 = vld [vmem:[#allocation8 + $0x2e4] sm:$0xf0]  ;;  %v5660_v48 = vld [vmem:[#allocation8 + $0x64] sm:$0xf]  ;;  %v4287_v49 = vld [vmem:[#allocation8 + $0x68] sm:$0xf0]  ;;  %v4542_v52 = vor.u32 %v5725_v44, %v4541_v43 }
  0xc1   : > { %1600 = vmatpush.bf16.msra.mxu3 %v4446_v10  ;;  %v5676_v50 = vld [vmem:[#allocation8 + $0xe4] sm:$0xf]  ;;  %v4351_v51 = vld [vmem:[#allocation8 + $0xe8] sm:$0xf0]  ;;  %v4533_v53 = vld [vmem:[#allocation8 + $0x250] sm:$0xf]  ;;  %v4606_v54 = vor.u32 %v5741_v47, %v4605_v45  ;;  %v4290_v55 = vor.u32 %v5660_v48, %v4287_v49 }
  0xc2   : > { %1562 = vmatpush.bf16.msra.mxu0 %v4246_v16  ;;  %v5723_v56 = vld [vmem:[#allocation8 + $0x254] sm:$0xf0]  ;;  %v4597_v57 = vld [vmem:[#allocation8 + $0x2d0] sm:$0xf]  ;;  %v4354_v59 = vor.u32 %v5676_v50, %v4351_v51  ;;  %v5658_v60 = vld [vmem:[#allocation8 + $0x54] sm:$0xf] }
  0xc3   : > { %1575 = vmatpush.bf16.msra.mxu1 %v4310_v19  ;;  %v5739_v58 = vld [vmem:[#allocation8 + $0x2d4] sm:$0xf0]  ;;  %v4279_v61 = vld [vmem:[#allocation8 + $0x58] sm:$0xf0]  ;;  %v5674_v62 = vld [vmem:[#allocation8 + $0xd4] sm:$0xf]  ;;  %v4534_v0 = vor.u32 %v5723_v56, %v4533_v53 }
  0xc4   : > { %1588 = vmatpush.bf16.msra.mxu2 %v4374_v20  ;;  %v4343_v63 = vld [vmem:[#allocation8 + $0xd8] sm:$0xf0]  ;;  %v4598_v1 = vor.u32 %v5739_v58, %v4597_v57  ;;  %v4525_v2 = vld [vmem:[#allocation8 + $0x240] sm:$0xf]  ;;  %v4282_v5 = vor.u32 %v5658_v60, %v4279_v61  ;;  %v5721_v6 = vld [vmem:[#allocation8 + $0x244] sm:$0xf0] }
  0xc5   : > { %1601 = vmatpush.bf16.msra.mxu3 %v4438_v24  ;;  %v956_v3 = vld [vmem:[%s7130_s15 + $0x10] sm:$0xff]  ;;  %v954_v4 = vld [vmem:[%s7130_s15] sm:$0xff]  ;;  %v957_v10 = vld [vmem:[%s7130_s15 + $0x18] sm:$0xff]  ;;  %v4346_v11 = vor.u32 %v5674_v62, %v4343_v63  ;;  %v4526_v18 = vor.u32 %v5721_v6, %v4525_v2  ;;  %s7501_s2 = sld [smem:[#allocation45_spill]]  ;;  %s7365_s4 = scalar_lea.vmem [#allocation28], %s6002_s13 }
  0xc6   : > { %1563 = vmatpush.bf16.msra.mxu0 %v4238_v31  ;;  %v4589_v7 = vld [vmem:[#allocation8 + $0x2c0] sm:$0xf]  ;;  %v7178_v8 = vpack.c.bf16 %v956_v3, %v956_v3  ;;  %v7180_v9 = vpack.c.bf16 %v954_v4, %v954_v4  ;;  %v5737_v12 = vld [vmem:[#allocation8 + $0x2c4] sm:$0xf0]  ;;  %v5656_v13 = vld [vmem:[#allocation8 + $0x44] sm:$0xf]  ;;  %v7183_v15 = vpack.c.bf16 %v957_v10, %v957_v10 }
  0xc7   : > { %1576 = vmatpush.bf16.msra.mxu1 %v4302_v35  ;;  %v4271_v14 = vld [vmem:[#allocation8 + $0x48] sm:$0xf0]  ;;  %v5672_v16 = vld [vmem:[#allocation8 + $0xc4] sm:$0xf]  ;;  %v4590_v20 = vor.u32 %v5737_v12, %v4589_v7  ;;  %v4517_v22 = vld [vmem:[#allocation8 + $0x230] sm:$0xf] }
  0xc8   : > { %1589 = vmatpush.bf16.msra.mxu2 %v4366_v36  ;;  %v4335_v17 = vld [vmem:[#allocation8 + $0xc8] sm:$0xf0]  ;;  %v4274_v21 = vor.u32 %v5656_v13, %v4271_v14  ;;  %v5719_v23 = vld [vmem:[#allocation8 + $0x234] sm:$0xf0]  ;;  %v4581_v24 = vld [vmem:[#allocation8 + $0x2b0] sm:$0xf] }
  0xc9   : > { %1602 = vmatpush.bf16.msra.mxu3 %v4430_v39  ;;  %1564 = vmatmul.bf16.vlgmr.msra.gmra.mxu0 %v7180_v9  ;;  %v955_v19 = vld [vmem:[%s7130_s15 + $0x8] sm:$0xff]  ;;  %v4338_v26 = vor.u32 %v5672_v16, %v4335_v17  ;;  %v5654_v28 = vld [vmem:[#allocation8 + $0x34] sm:$0xf]  ;;  %v4518_v32 = vor.u32 %v5719_v23, %v4517_v22  ;;  %v4509_v35 = vld [vmem:[#allocation8 + $0x220] sm:$0xf]  ;;  %s7502_s22 = sld [smem:[#allocation47_spill]] }
  0xca   : > { %1608 = vmatpush.bf16.msrb.mxu0 %v4550_v40  ;;  %v7189_v25 = vpack.c.bf16 %v955_v19, %v955_v19  ;;  %v5735_v27 = vld [vmem:[#allocation8 + $0x2b4] sm:$0xf0]  ;;  %v4263_v29 = vld [vmem:[#allocation8 + $0x38] sm:$0xf0]  ;;  %v5670_v30 = vld [vmem:[#allocation8 + $0xb4] sm:$0xf] }
  0xcb   : > { %1621 = vmatpush.bf16.msrb.mxu1 %v4614_v41  ;;  %1590 = vmatmul.bf16.vlgmr.msra.gmra.mxu2 %v7178_v8  ;;  %v4327_v31 = vld [vmem:[#allocation8 + $0xb8] sm:$0xf0]  ;;  %v4582_v33 = vor.u32 %v5735_v27, %v4581_v24  ;;  %v4266_v34 = vor.u32 %v5654_v28, %v4263_v29  ;;  %v5717_v36 = vld [vmem:[#allocation8 + $0x224] sm:$0xf0]  ;;  %v4573_v37 = vld [vmem:[#allocation8 + $0x2a0] sm:$0xf] }
  0xcc   : > { %1634 = vmatpush.bf16.msrb.mxu2 %v4298_v42  ;;  %1603 = vmatmul.bf16.vlgmr.msra.gmra.mxu3 %v7183_v15  ;;  %v4330_v38 = vor.u32 %v5670_v30, %v4327_v31  ;;  %v5733_v39 = vld [vmem:[#allocation8 + $0x2a4] sm:$0xf0]  ;;  %v5652_v40 = vld [vmem:[#allocation8 + $0x24] sm:$0xf]  ;;  %v4255_v41 = vld [vmem:[#allocation8 + $0x28] sm:$0xf0]  ;;  %v4510_v44 = vor.u32 %v5717_v36, %v4509_v35 }
  0xcd   : > { %1647 = vmatpush.bf16.msrb.mxu3 %v4362_v46  ;;  %1577 = vmatmul.bf16.vlgmr.msra.gmra.mxu1 %v7189_v25  ;;  %v5668_v42 = vld [vmem:[#allocation8 + $0xa4] sm:$0xf]  ;;  %v4319_v43 = vld [vmem:[#allocation8 + $0xa8] sm:$0xf0]  ;;  %v4574_v45 = vor.u32 %v5733_v39, %v4573_v37  ;;  %v4258_v46 = vor.u32 %v5652_v40, %v4255_v41  ;;  %v4501_v47 = vld [vmem:[#allocation8 + $0x210] sm:$0xf] }
  0xce   : > { %1609 = vmatpush.bf16.msrb.mxu0 %v4542_v52  ;;  %v5715_v48 = vld [vmem:[#allocation8 + $0x214] sm:$0xf0]  ;;  %v4565_v49 = vld [vmem:[#allocation8 + $0x290] sm:$0xf]  ;;  %v4322_v50 = vor.u32 %v5668_v42, %v4319_v43  ;;  %v5650_v52 = vld [vmem:[#allocation8 + $0x14] sm:$0xf] }
  0xcf   : > { %1622 = vmatpush.bf16.msrb.mxu1 %v4606_v54  ;;  %v5731_v51 = vld [vmem:[#allocation8 + $0x294] sm:$0xf0]  ;;  %v4247_v53 = vld [vmem:[#allocation8 + $0x18] sm:$0xf0]  ;;  %v5666_v54 = vld [vmem:[#allocation8 + $0x94] sm:$0xf]  ;;  %v4502_v56 = vor.u32 %v5715_v48, %v4501_v47 }
  0xd0   : > { %1635 = vmatpush.bf16.msrb.mxu2 %v4290_v55  ;;  %v4311_v55 = vld [vmem:[#allocation8 + $0x98] sm:$0xf0]  ;;  %v4493_v57 = vld [vmem:[#allocation8 + $0x200] sm:$0xf]  ;;  %v5713_v58 = vld [vmem:[#allocation8 + $0x204] sm:$0xf0]  ;;  %v4250_v60 = vor.u32 %v5650_v52, %v4247_v53 }
  0xd1   : > { %1648 = vmatpush.bf16.msrb.mxu3 %v4354_v59  ;;  %v4566_v59 = vor.u32 %v5731_v51, %v4565_v49  ;;  %v4557_v61 = vld [vmem:[#allocation8 + $0x280] sm:$0xf]  ;;  %v5729_v62 = vld [vmem:[#allocation8 + $0x284] sm:$0xf0]  ;;  %v5648_v63 = vld [vmem:[#allocation8 + $0x4] sm:$0xf]  ;;  %v4494_v7 = vor.u32 %v5713_v58, %v4493_v57 }
  0xd2   : > { %1610 = vmatpush.bf16.msrb.mxu0 %v4534_v0  ;;  %v4314_v0 = vor.u32 %v5666_v54, %v4311_v55  ;;  %v5664_v2 = vld [vmem:[#allocation8 + $0x84] sm:$0xf]  ;;  %v4303_v3 = vld [vmem:[#allocation8 + $0x88] sm:$0xf0]  ;;  %v5694_v4 = vld [vmem:[#allocation8 + $0x174] sm:$0xf]  ;;  %v4558_v13 = vor.u32 %v5729_v62, %v4557_v61 }
  0xd3   : > { %1623 = vmatpush.bf16.msrb.mxu1 %v4598_v1  ;;  %v4239_v1 = vld [vmem:[#allocation8 + $0x8] sm:$0xf0]  ;;  %v5710_v6 = vld [vmem:[#allocation8 + $0x1f4] sm:$0xf]  ;;  %v4487_v10 = vld [vmem:[#allocation8 + $0x1f8] sm:$0xf0]  ;;  %v4306_v19 = vor.u32 %v5664_v2, %v4303_v3 }
  0xd4   : > { %1636 = vmatpush.bf16.msrb.mxu2 %v4282_v5  ;;  %v4423_v5 = vld [vmem:[#allocation8 + $0x178] sm:$0xf0]  ;;  %v4242_v14 = vor.u32 %v5648_v63, %v4239_v1  ;;  %v5742_v16 = vld [vmem:[#allocation8 + $0x2f4] sm:$0xf]  ;;  %v4490_v22 = vor.u32 %v5710_v6, %v4487_v10  ;;  %v5692_v24 = vld [vmem:[#allocation8 + $0x164] sm:$0xf] }
  0xd5   : > { %1649 = vmatpush.bf16.msrb.mxu3 %v4346_v11  ;;  %v5726_v11 = vld [vmem:[#allocation8 + $0x274] sm:$0xf]  ;;  %v4551_v12 = vld [vmem:[#allocation8 + $0x278] sm:$0xf0]  ;;  %v5708_v27 = vld [vmem:[#allocation8 + $0x1e4] sm:$0xf] }
  0xd6   : > { %1611 = vmatpush.bf16.msrb.mxu0 %v4526_v18  ;;  %v4615_v17 = vld [vmem:[#allocation8 + $0x2f8] sm:$0xf0]  ;;  %v958_v18 = vld [vmem:[%s7130_s15 + $0x20] sm:$0xff]  ;;  %v4554_v23 = vor.u32 %v5726_v11, %v4551_v12  ;;  %v4479_v29 = vld [vmem:[#allocation8 + $0x1e8] sm:$0xf0]  ;;  %s7503_s12 = sld [smem:[#allocation55_spill]] }
  0xd7   : > { %1624 = vmatpush.bf16.msrb.mxu1 %v4590_v20  ;;  %v4426_v20 = vor.u32 %v5694_v4, %v4423_v5  ;;  %v4618_v28 = vor.u32 %v5742_v16, %v4615_v17  ;;  %v5724_v30 = vld [vmem:[#allocation8 + $0x264] sm:$0xf]  ;;  %v4543_v31 = vld [vmem:[#allocation8 + $0x268] sm:$0xf0]  ;;  %v4482_v37 = vor.u32 %v5708_v27, %v4479_v29  ;;  %v5690_v39 = vld [vmem:[#allocation8 + $0x154] sm:$0xf] }
  0xd8   : > { %1637 = vmatpush.bf16.msrb.mxu2 %v4274_v21  ;;  %v959_v21 = vld [vmem:[%s7130_s15 + $0x28] sm:$0xff]  ;;  %v5706_v41 = vld [vmem:[#allocation8 + $0x1d4] sm:$0xf]  ;;  %v5688_v51 = vld [vmem:[#allocation8 + $0x144] sm:$0xf]  ;;  %s7300_s16 = sld [smem:[#allocation27 + $0x1]] }
  0xd9   : > { %1650 = vmatpush.bf16.msrb.mxu3 %v4338_v26  ;;  %v4415_v26 = vld [vmem:[#allocation8 + $0x168] sm:$0xf0]  ;;  %v7196_v35 = vpack.c.bf16 %v959_v21, %v959_v21  ;;  %v4407_v40 = vld [vmem:[#allocation8 + $0x158] sm:$0xf0]  ;;  %v5704_v53 = vld [vmem:[#allocation8 + $0x1c4] sm:$0xf] }
  0xda   : > { %1612 = vmatpush.bf16.msrb.mxu0 %v4518_v32  ;;  %v7194_v32 = vpack.c.bf16 %v958_v18, %v958_v18  ;;  %v4418_v36 = vor.u32 %v5692_v24, %v4415_v26  ;;  %v4471_v43 = vld [vmem:[#allocation8 + $0x1d8] sm:$0xf0]  ;;  %v4410_v48 = vor.u32 %v5690_v39, %v4407_v40  ;;  %v4399_v52 = vld [vmem:[#allocation8 + $0x148] sm:$0xf0]  ;;  %v5736_v58 = vld [vmem:[#allocation8 + $0x2c4] sm:$0xf] }
  0xdb   : > { %1625 = vmatpush.bf16.msrb.mxu1 %v4582_v33  ;;  %v5740_v33 = vld [vmem:[#allocation8 + $0x2e4] sm:$0xf]  ;;  %v4599_v47 = vld [vmem:[#allocation8 + $0x2d8] sm:$0xf0]  ;;  %v4474_v49 = vor.u32 %v5706_v41, %v4471_v43  ;;  %v4463_v55 = vld [vmem:[#allocation8 + $0x1c8] sm:$0xf0] }
  0xdc   : > { %1638 = vmatpush.bf16.msrb.mxu2 %v4266_v34  ;;  %v4607_v34 = vld [vmem:[#allocation8 + $0x2e8] sm:$0xf0]  ;;  %v5686_v61 = vld [vmem:[#allocation8 + $0x134] sm:$0xf]  ;;  %v4391_v62 = vld [vmem:[#allocation8 + $0x138] sm:$0xf0] }
  0xdd   : > { %1651 = vmatpush.bf16.msrb.mxu3 %v4330_v38  ;;  %v4546_v38 = vor.u32 %v5724_v30, %v4543_v31  ;;  %v4610_v42 = vor.u32 %v5740_v33, %v4607_v34  ;;  %v4527_v57 = vld [vmem:[#allocation8 + $0x248] sm:$0xf0]  ;;  %v5702_v63 = vld [vmem:[#allocation8 + $0x1b4] sm:$0xf]  ;;  %v4455_v1 = vld [vmem:[#allocation8 + $0x1b8] sm:$0xf0]  ;;  %v4394_v6 = vor.u32 %v5686_v61, %v4391_v62 }
  0xde   : > { %1613 = vmatpush.bf16.msrb.mxu0 %v4510_v44  ;;  %v5722_v44 = vld [vmem:[#allocation8 + $0x254] sm:$0xf]  ;;  %v4519_v3 = vld [vmem:[#allocation8 + $0x238] sm:$0xf0]  ;;  %v5684_v11 = vld [vmem:[#allocation8 + $0x124] sm:$0xf] }
  0xdf   : > { %1626 = vmatpush.bf16.msrb.mxu1 %v4574_v45  ;;  %v4535_v45 = vld [vmem:[#allocation8 + $0x258] sm:$0xf0]  ;;  %v5718_v2 = vld [vmem:[#allocation8 + $0x234] sm:$0xf]  ;;  %v4383_v12 = vld [vmem:[#allocation8 + $0x128] sm:$0xf0] }
  0xe0   : > { %1639 = vmatpush.bf16.msrb.mxu2 %v4258_v46  ;;  %v5738_v46 = vld [vmem:[#allocation8 + $0x2d4] sm:$0xf]  ;;  %v4583_v5 = vld [vmem:[#allocation8 + $0x2b8] sm:$0xf0]  ;;  %v4522_v10 = vor.u32 %v5718_v2, %v4519_v3  ;;  %v4447_v16 = vld [vmem:[#allocation8 + $0x1a8] sm:$0xf0]  ;;  %v4386_v21 = vor.u32 %v5684_v11, %v4383_v12 }
  0xe1   : > { %1652 = vmatpush.bf16.msrb.mxu3 %v4322_v50  ;;  %v4538_v50 = vor.u32 %v5722_v44, %v4535_v45  ;;  %v4602_v54 = vor.u32 %v5738_v46, %v4599_v47  ;;  %v5734_v4 = vld [vmem:[#allocation8 + $0x2b4] sm:$0xf]  ;;  %v5716_v17 = vld [vmem:[#allocation8 + $0x224] sm:$0xf]  ;;  %v4511_v18 = vld [vmem:[#allocation8 + $0x228] sm:$0xf0] }
  0xe2   : > { %1614 = vmatpush.bf16.msrb.mxu0 %v4502_v56  ;;  %v5720_v56 = vld [vmem:[#allocation8 + $0x244] sm:$0xf]  ;;  %v5682_v24 = vld [vmem:[#allocation8 + $0x114] sm:$0xf]  ;;  %v4375_v26 = vld [vmem:[#allocation8 + $0x118] sm:$0xf0] }
  0xe3   : > { %1627 = vmatpush.bf16.msrb.mxu1 %v4566_v59  ;;  %v4591_v59 = vld [vmem:[#allocation8 + $0x2c8] sm:$0xf0]  ;;  %v5698_v27 = vld [vmem:[#allocation8 + $0x194] sm:$0xf]  ;;  %v4439_v29 = vld [vmem:[#allocation8 + $0x198] sm:$0xf0] }
  0xe4   : > { %1640 = vmatpush.bf16.msrb.mxu2 %v4250_v60  ;;  %v4466_v60 = vor.u32 %v5704_v53, %v4463_v55  ;;  %v5714_v30 = vld [vmem:[#allocation8 + $0x214] sm:$0xf]  ;;  %v4503_v31 = vld [vmem:[#allocation8 + $0x218] sm:$0xf0]  ;;  %v4442_v39 = vor.u32 %v5698_v27, %v4439_v29  ;;  %v5696_v41 = vld [vmem:[#allocation8 + $0x184] sm:$0xf] }
  0xe5   : > { %1653 = vmatpush.bf16.msrb.mxu3 %v4314_v0  ;;  %v4594_v0 = vor.u32 %v5736_v58, %v4591_v59  ;;  %v5730_v33 = vld [vmem:[#allocation8 + $0x294] sm:$0xf]  ;;  %v4567_v34 = vld [vmem:[#allocation8 + $0x298] sm:$0xf0]  ;;  %v4506_v40 = vor.u32 %v5714_v30, %v4503_v31  ;;  %v5712_v43 = vld [vmem:[#allocation8 + $0x204] sm:$0xf] }
  0xe6   : > { %1615 = vmatpush.bf16.msrb.mxu0 %v4494_v7  ;;  %v4458_v7 = vor.u32 %v5702_v63, %v4455_v1  ;;  %v4570_v44 = vor.u32 %v5730_v33, %v4567_v34  ;;  %v4495_v45 = vld [vmem:[#allocation8 + $0x208] sm:$0xf0]  ;;  %v5728_v46 = vld [vmem:[#allocation8 + $0x284] sm:$0xf]  ;;  %v4805_v53 = vld [vmem:[#allocation11 + $0x170] sm:$0xf] }
  0xe7   : > { %1628 = vmatpush.bf16.msrb.mxu1 %v4558_v13  ;;  %v5700_v13 = vld [vmem:[#allocation8 + $0x1a4] sm:$0xf]  ;;  %v4559_v47 = vld [vmem:[#allocation8 + $0x288] sm:$0xf0]  ;;  %v5807_v58 = vld [vmem:[#allocation11 + $0x1f4] sm:$0xf0] }
  0xe8   : > { %1641 = vmatpush.bf16.msrb.mxu2 %v4242_v14  ;;  %v4586_v14 = vor.u32 %v5734_v4, %v4583_v5  ;;  %v4562_v59 = vor.u32 %v5728_v46, %v4559_v47  ;;  %v4669_v61 = vld [vmem:[#allocation11 + $0x60] sm:$0xf]  ;;  %v5757_v62 = vld [vmem:[#allocation11 + $0x64] sm:$0xf0]  ;;  %v4661_v11 = vld [vmem:[#allocation11 + $0x50] sm:$0xf] }
  0xe9   : > { %1654 = vmatpush.bf16.msrb.mxu3 %v4306_v19  ;;  %1616 = vmatmul.bf16.vlgmr.msrb.gmra.mxu0 %v7194_v32  ;;  %v5732_v19 = vld [vmem:[#allocation8 + $0x2a4] sm:$0xf]  ;;  %v5773_v1 = vld [vmem:[#allocation11 + $0xe4] sm:$0xf0]  ;;  %v5755_v12 = vld [vmem:[#allocation11 + $0x54] sm:$0xf0] }
  0xea   : > { %1660 = vmatpush.bf16.msra.mxu0 %v4426_v20  ;;  %1629 = vmatmul.bf16.vlgmr.msrb.gmra.mxu1 %v7196_v35  ;;  %v4575_v20 = vld [vmem:[#allocation8 + $0x2a8] sm:$0xf0]  ;;  %v4733_v63 = vld [vmem:[#allocation11 + $0xe0] sm:$0xf]  ;;  %v4645_v34 = vld [vmem:[#allocation11 + $0x30] sm:$0xf] }
  0xeb   : > { %1673 = vmatpush.bf16.msra.mxu1 %v4490_v22  ;;  %1642 = vmatmul.bf16.vlgmr.msrb.gmra.mxu2 %v7180_v9  ;;  %v4402_v9 = vor.u32 %v5688_v51, %v4399_v52  ;;  %v4450_v22 = vor.u32 %v5700_v13, %v4447_v16  ;;  %v5775_v52 = vld [vmem:[#allocation11 + $0xf4] sm:$0xf0]  ;;  %v4797_v2 = vld [vmem:[#allocation11 + $0x160] sm:$0xf]  ;;  %v5789_v3 = vld [vmem:[#allocation11 + $0x164] sm:$0xf0] }
  0xec   : > { %1686 = vmatpush.bf16.msra.mxu2 %v4554_v23  ;;  %1655 = vmatmul.bf16.vlgmr.msrb.gmra.mxu3 %v7189_v25  ;;  %v4530_v25 = vor.u32 %v5720_v56, %v4527_v57  ;;  %v4514_v23 = vor.u32 %v5716_v17, %v4511_v18  ;;  %v4498_v56 = vor.u32 %v5712_v43, %v4495_v45  ;;  %v4869_v57 = vld [vmem:[#allocation11 + $0x1f0] sm:$0xf]  ;;  %v4861_v4 = vld [vmem:[#allocation11 + $0x1e0] sm:$0xf]  ;;  %v5805_v5 = vld [vmem:[#allocation11 + $0x1e4] sm:$0xf0] }
  0xed   : > { %1699 = vmatpush.bf16.msra.mxu3 %v4618_v28  ;;  %v4578_v28 = vor.u32 %v5732_v19, %v4575_v20  ;;  %v4725_v13 = vld [vmem:[#allocation11 + $0xd0] sm:$0xf]  ;;  %v5771_v16 = vld [vmem:[#allocation11 + $0xd4] sm:$0xf0]  ;;  %v4781_v29 = vld [vmem:[#allocation11 + $0x140] sm:$0xf] }
  0xee   : > { %1661 = vmatpush.bf16.msra.mxu0 %v4418_v36  ;;  %v4378_v36 = vor.u32 %v5682_v24, %v4375_v26  ;;  %v4789_v17 = vld [vmem:[#allocation11 + $0x150] sm:$0xf]  ;;  %v5787_v18 = vld [vmem:[#allocation11 + $0x154] sm:$0xf0]  ;;  %v4653_v24 = vld [vmem:[#allocation11 + $0x40] sm:$0xf] }
  0xef   : > { %1674 = vmatpush.bf16.msra.mxu1 %v4482_v37  ;;  %v5680_v37 = vld [vmem:[#allocation8 + $0x104] sm:$0xf]  ;;  %v4853_v19 = vld [vmem:[#allocation11 + $0x1d0] sm:$0xf]  ;;  %v5803_v20 = vld [vmem:[#allocation11 + $0x1d4] sm:$0xf0] }
  0xf0   : > { %1687 = vmatpush.bf16.msra.mxu2 %v4546_v38  ;;  %v4367_v38 = vld [vmem:[#allocation8 + $0x108] sm:$0xf0]  ;;  %v4717_v26 = vld [vmem:[#allocation11 + $0xc0] sm:$0xf]  ;;  %v4854_v27 = vor.u32 %v5803_v20, %v4853_v19  ;;  %v5799_v43 = vld [vmem:[#allocation11 + $0x1b4] sm:$0xf0] }
  0xf1   : > { %1700 = vmatpush.bf16.msra.mxu3 %v4610_v42  ;;  %v4431_v42 = vld [vmem:[#allocation8 + $0x188] sm:$0xf0]  ;;  %v4370_v51 = vor.u32 %v5680_v37, %v4367_v38  ;;  %v4845_v30 = vld [vmem:[#allocation11 + $0x1c0] sm:$0xf]  ;;  %v4709_v37 = vld [vmem:[#allocation11 + $0xb0] sm:$0xf] }
  0xf2   : > { %1662 = vmatpush.bf16.msra.mxu0 %v4410_v48  ;;  %v4677_v48 = vld [vmem:[#allocation11 + $0x70] sm:$0xf]  ;;  %v4434_v55 = vor.u32 %v5696_v41, %v4431_v42  ;;  %v5783_v41 = vld [vmem:[#allocation11 + $0x134] sm:$0xf0]  ;;  %v4637_v47 = vld [vmem:[#allocation11 + $0x20] sm:$0xf] }
  0xf3   : > { %1675 = vmatpush.bf16.msra.mxu1 %v4474_v49  ;;  %v5759_v49 = vld [vmem:[#allocation11 + $0x74] sm:$0xf0]  ;;  %v4837_v42 = vld [vmem:[#allocation11 + $0x1b0] sm:$0xf]  ;;  %v5774_v19 = vld [vmem:[#allocation11 + $0xf4] sm:$0xf] }
  0xf4   : > { %1688 = vmatpush.bf16.msra.mxu2 %v4538_v50  ;;  %v4741_v50 = vld [vmem:[#allocation11 + $0xf0] sm:$0xf]  ;;  %s7504_s9 = sld [smem:[#allocation58_spill]]  ;;  %s6003_s13 = smul.u32 48, %s7500_s6 }
  0xf5   : > { %1701 = vmatpush.bf16.msra.mxu3 %v4602_v54  ;;  %v5791_v54 = vld [vmem:[#allocation11 + $0x174] sm:$0xf0]  ;;  %s7505_s1 = sld [smem:[#allocation59_spill]]  ;;  %s3967_s6 = sshll.u32 %s7365_s4, 4  ;;  %s3968_s6 = int_to_ptr.vmem [resolvable:$true] %s3967_s6 }
  0xf6   : > { %1663 = vmatpush.bf16.msra.mxu0 %v4402_v9  ;;  %v4678_v9 = vor.u32 %v5759_v49, %v4677_v48  ;;  %v5749_v48 = vld [vmem:[#allocation11 + $0x24] sm:$0xf0]  ;;  %v4701_v49 = vld [vmem:[#allocation11 + $0xa0] sm:$0xf]  ;;  %s7507_s11 = sld [smem:[#allocation61_spill]] }
  0xf7   : > { %1676 = vmatpush.bf16.msra.mxu1 %v4466_v60  ;;  %v4742_v60 = vor.u32 %v5775_v52, %v4741_v50  ;;  %v4838_v50 = vor.u32 %v5799_v43, %v4837_v42  ;;  %v4765_v52 = vld [vmem:[#allocation11 + $0x120] sm:$0xf]  ;;  %v5804_v43 = vld [vmem:[#allocation11 + $0x1e4] sm:$0xf] }
  0xf8   : > { %1689 = vmatpush.bf16.msra.mxu2 %v4530_v25  ;;  %v4806_v25 = vor.u32 %v5791_v54, %v4805_v53  ;;  %v5781_v53 = vld [vmem:[#allocation11 + $0x124] sm:$0xf0]  ;;  %v4829_v54 = vld [vmem:[#allocation11 + $0x1a0] sm:$0xf] }
  0xf9   : > { %1702 = vmatpush.bf16.msra.mxu3 %v4594_v0  ;;  %v4870_v0 = vor.u32 %v5807_v58, %v4869_v57  ;;  %v4766_v58 = vor.u32 %v5781_v53, %v4765_v52  ;;  %v4663_v52 = vld [vmem:[#allocation11 + $0x58] sm:$0xf0]  ;;  %v5770_v53 = vld [vmem:[#allocation11 + $0xd4] sm:$0xf] }
  0xfa   : > { %1664 = vmatpush.bf16.msra.mxu0 %v4394_v6  ;;  %v4670_v6 = vor.u32 %v5757_v62, %v4669_v61  ;;  %v5763_v61 = vld [vmem:[#allocation11 + $0x94] sm:$0xf0]  ;;  %v4757_v62 = vld [vmem:[#allocation11 + $0x110] sm:$0xf] }
  0xfb   : > { %1677 = vmatpush.bf16.msra.mxu1 %v4458_v7  ;;  %v4734_v7 = vor.u32 %v5773_v1, %v4733_v63  ;;  %v5779_v63 = vld [vmem:[#allocation11 + $0x114] sm:$0xf0] }
  0xfc   : > { %1690 = vmatpush.bf16.msra.mxu2 %v4522_v10  ;;  %v4798_v10 = vor.u32 %v5789_v3, %v4797_v2  ;;  %v5795_v1 = vld [vmem:[#allocation11 + $0x194] sm:$0xf0]  ;;  %v4621_v3 = vld [vmem:[#allocation11] sm:$0xf]  ;;  %s3965_s26 = scalar_lea.hbm %s7507_s11, %s6003_s13  ;;  %s6706_s8 = scalar_lea.hbm %s7507_s11, 96 }
  0xfd   : > { %1703 = vmatpush.bf16.msra.mxu3 %v4586_v14  ;;  %v4862_v14 = vor.u32 %v5805_v5, %v4861_v4  ;;  %v5745_v4 = vld [vmem:[#allocation11 + $0x4] sm:$0xf0] }
  0xfe   : > { %1665 = vmatpush.bf16.msra.mxu0 %v4386_v21  ;;  %v4662_v21 = vor.u32 %v5755_v12, %v4661_v11  ;;  %v4749_v11 = vld [vmem:[#allocation11 + $0x100] sm:$0xf]  ;;  %v4622_v20 = vor.u32 %v5745_v4, %v4621_v3  ;;  %v4783_v3 = vld [vmem:[#allocation11 + $0x148] sm:$0xf0]  ;;  %v5800_v4 = vld [vmem:[#allocation11 + $0x1c4] sm:$0xf] }
  0xff   : > { %1678 = vmatpush.bf16.msra.mxu1 %v4450_v22  ;;  %v4726_v22 = vor.u32 %v5771_v16, %v4725_v13  ;;  %v5777_v13 = vld [vmem:[#allocation11 + $0x104] sm:$0xf0] }
 0x100   : > { %1691 = vmatpush.bf16.msra.mxu2 %v4514_v23  ;;  %v4790_v23 = vor.u32 %v5787_v18, %v4789_v17  ;;  %v5793_v16 = vld [vmem:[#allocation11 + $0x184] sm:$0xf0]  ;;  %v5758_v17 = vld [vmem:[#allocation11 + $0x74] sm:$0xf]  ;;  %v4679_v18 = vld [vmem:[#allocation11 + $0x78] sm:$0xf0] }
 0x101   : > { %1704 = vmatpush.bf16.msra.mxu3 %v4578_v28  ;;  %v5769_v28 = vld [vmem:[#allocation11 + $0xc4] sm:$0xf0] }
 0x102   : > { %1666 = vmatpush.bf16.msra.mxu0 %v4378_v36  ;;  %v5751_v36 = vld [vmem:[#allocation11 + $0x34] sm:$0xf0] }
 0x103   : > { %1679 = vmatpush.bf16.msra.mxu1 %v4442_v39  ;;  %v5767_v39 = vld [vmem:[#allocation11 + $0xb4] sm:$0xf0] }
 0x104   : > { %1692 = vmatpush.bf16.msra.mxu2 %v4506_v40  ;;  %v4773_v40 = vld [vmem:[#allocation11 + $0x130] sm:$0xf]  ;;  %v4710_v45 = vor.u32 %v5767_v39, %v4709_v37  ;;  %v961_v37 = vld [vmem:[%s7138_s10 + $0x8] sm:$0xff] }
 0x105   : > { %1705 = vmatpush.bf16.msra.mxu3 %v4570_v44  ;;  %v4646_v44 = vor.u32 %v5751_v36, %v4645_v34  ;;  %v4774_v46 = vor.u32 %v5783_v41, %v4773_v40  ;;  %v4671_v34 = vld [vmem:[#allocation11 + $0x68] sm:$0xf0]  ;;  %v5772_v36 = vld [vmem:[#allocation11 + $0xe4] sm:$0xf] }
 0x106   : > { %1667 = vmatpush.bf16.msra.mxu0 %v4370_v51  ;;  %v5765_v51 = vld [vmem:[#allocation11 + $0xa4] sm:$0xf0]  ;;  %v4735_v39 = vld [vmem:[#allocation11 + $0xe8] sm:$0xf0]  ;;  %v5788_v40 = vld [vmem:[#allocation11 + $0x164] sm:$0xf] }
 0x107   : > { %1680 = vmatpush.bf16.msra.mxu1 %v4434_v55  ;;  %v5797_v55 = vld [vmem:[#allocation11 + $0x1a4] sm:$0xf0]  ;;  %v4702_v57 = vor.u32 %v5765_v51, %v4701_v49  ;;  %v4799_v41 = vld [vmem:[#allocation11 + $0x168] sm:$0xf0]  ;;  %v4738_v49 = vor.u32 %v5772_v36, %v4735_v39  ;;  %v5754_v51 = vld [vmem:[#allocation11 + $0x54] sm:$0xf] }
 0x108   : > { %1693 = vmatpush.bf16.msra.mxu2 %v4498_v56  ;;  %v4638_v56 = vor.u32 %v5749_v48, %v4637_v47  ;;  %v7216_v48 = vpack.c.bf16 %v961_v37, %v961_v37  ;;  %v4631_v36 = vld [vmem:[#allocation11 + $0x18] sm:$0xf0]  ;;  %v5762_v37 = vld [vmem:[#allocation11 + $0x94] sm:$0xf] }
 0x109   : > { %1706 = vmatpush.bf16.msra.mxu3 %v4562_v59  ;;  %1668 = vmatmul.bf16.vlgmr.msra.gmra.mxu0 %v7178_v8  ;;  %v5785_v8 = vld [vmem:[#allocation11 + $0x144] sm:$0xf0]  ;;  %v4629_v59 = vld [vmem:[#allocation11 + $0x10] sm:$0xf]  ;;  %v4695_v39 = vld [vmem:[#allocation11 + $0x98] sm:$0xf0] }
 0x10a   : > { %2152 = vmatpush.bf16.msrb.mxu0 %v4678_v9  ;;  %1681 = vmatmul.bf16.vlgmr.msra.gmra.mxu1 %v7183_v15  ;;  %v4718_v15 = vor.u32 %v5769_v28, %v4717_v26  ;;  %v4782_v33 = vor.u32 %v5785_v8, %v4781_v29  ;;  %v5747_v9 = vld [vmem:[#allocation11 + $0x14] sm:$0xf0]  ;;  %v5806_v26 = vld [vmem:[#allocation11 + $0x1f4] sm:$0xf]  ;;  %v4682_v8 = vor.u32 %v5758_v17, %v4679_v18  ;;  %v4775_v18 = vld [vmem:[#allocation11 + $0x138] sm:$0xf0] }
 0x10b   : > { %2165 = vmatpush.bf16.msrb.mxu1 %v4742_v60  ;;  %1694 = vmatmul.bf16.vlgmr.msra.gmra.mxu2 %v7194_v32  ;;  %v5753_v32 = vld [vmem:[#allocation11 + $0x44] sm:$0xf0]  ;;  %v4693_v60 = vld [vmem:[#allocation11 + $0x90] sm:$0xf]  ;;  %v4630_v2 = vor.u32 %v5747_v9, %v4629_v59  ;;  %v4855_v59 = vld [vmem:[#allocation11 + $0x1d8] sm:$0xf0]  ;;  %v4666_v9 = vor.u32 %v5754_v51, %v4663_v52 }
 0x10c   : > { %2178 = vmatpush.bf16.msrb.mxu2 %v4806_v25  ;;  %1707 = vmatmul.bf16.vlgmr.msra.gmra.mxu3 %v7196_v35  ;;  %v5801_v35 = vld [vmem:[#allocation11 + $0x1c4] sm:$0xf0]  ;;  %v4654_v31 = vor.u32 %v5753_v32, %v4653_v24  ;;  %v4830_v25 = vor.u32 %v5797_v55, %v4829_v54  ;;  %v4694_v5 = vor.u32 %v5763_v61, %v4693_v60  ;;  %v962_v28 = vld [vmem:[%s7138_s10 + $0x10] sm:$0xff]  ;;  %v4727_v55 = vld [vmem:[#allocation11 + $0xd8] sm:$0xf0] }
 0x10d   : > { %2191 = vmatpush.bf16.msrb.mxu3 %v4870_v0  ;;  %v4846_v38 = vor.u32 %v5801_v35, %v4845_v30  ;;  %v4821_v0 = vld [vmem:[#allocation11 + $0x190] sm:$0xf]  ;;  %v4750_v32 = vor.u32 %v5777_v13, %v4749_v11  ;;  %v5756_v30 = vld [vmem:[#allocation11 + $0x64] sm:$0xf]  ;;  %v7210_v42 = vpack.c.bf16 %v962_v28, %v962_v28  ;;  %v4730_v60 = vor.u32 %v5770_v53, %v4727_v55  ;;  %v5750_v11 = vld [vmem:[#allocation11 + $0x34] sm:$0xf] }
 0x10e   : > { %2153 = vmatpush.bf16.msrb.mxu0 %v4670_v6  ;;  %v4758_v6 = vor.u32 %v5779_v63, %v4757_v62  ;;  %v4822_v12 = vor.u32 %v5795_v1, %v4821_v0  ;;  %v960_v35 = vld [vmem:[%s7138_s10] sm:$0xff]  ;;  %v4674_v47 = vor.u32 %v5756_v30, %v4671_v34  ;;  %v4655_v62 = vld [vmem:[#allocation11 + $0x48] sm:$0xf0]  ;;  %v5766_v13 = vld [vmem:[#allocation11 + $0xb4] sm:$0xf] }
 0x10f   : > { %2166 = vmatpush.bf16.msrb.mxu1 %v4734_v7  ;;  %v4685_v7 = vld [vmem:[#allocation11 + $0x80] sm:$0xf]  ;;  %v5752_v61 = vld [vmem:[#allocation11 + $0x44] sm:$0xf]  ;;  %v4719_v1 = vld [vmem:[#allocation11 + $0xc8] sm:$0xf0] }
 0x110   : > { %2179 = vmatpush.bf16.msrb.mxu2 %v4798_v10  ;;  %v5761_v10 = vld [vmem:[#allocation11 + $0x84] sm:$0xf0]  ;;  %v5768_v63 = vld [vmem:[#allocation11 + $0xc4] sm:$0xf]  ;;  %v5782_v17 = vld [vmem:[#allocation11 + $0x134] sm:$0xf] }
 0x111   : > { %2192 = vmatpush.bf16.msrb.mxu3 %v4862_v14  ;;  %v4813_v14 = vld [vmem:[#allocation11 + $0x180] sm:$0xf]  ;;  %v4686_v24 = vor.u32 %v5761_v10, %v4685_v7  ;;  %v4722_v7 = vor.u32 %v5768_v63, %v4719_v1  ;;  %v4703_v28 = vld [vmem:[#allocation11 + $0xa8] sm:$0xf0]  ;;  %v5796_v30 = vld [vmem:[#allocation11 + $0x1a4] sm:$0xf] }
 0x112   : > { %2154 = vmatpush.bf16.msrb.mxu0 %v4662_v21  ;;  %v4743_v21 = vld [vmem:[#allocation11 + $0xf8] sm:$0xf0]  ;;  %v4814_v29 = vor.u32 %v5793_v16, %v4813_v14  ;;  %v5746_v34 = vld [vmem:[#allocation11 + $0x14] sm:$0xf]  ;;  %v5744_v51 = vld [vmem:[#allocation11 + $0x4] sm:$0xf] }
 0x113   : > { %2167 = vmatpush.bf16.msrb.mxu1 %v4726_v22  ;;  %v5790_v22 = vld [vmem:[#allocation11 + $0x174] sm:$0xf]  ;;  %v4711_v16 = vld [vmem:[#allocation11 + $0xb8] sm:$0xf0]  ;;  %v4623_v52 = vld [vmem:[#allocation11 + $0x8] sm:$0xf0] }
 0x114   : > { %2180 = vmatpush.bf16.msrb.mxu2 %v4790_v23  ;;  %v4807_v23 = vld [vmem:[#allocation11 + $0x178] sm:$0xf0]  ;;  %v5760_v53 = vld [vmem:[#allocation11 + $0x84] sm:$0xf]  ;;  %v4687_v55 = vld [vmem:[#allocation11 + $0x88] sm:$0xf0] }
 0x115   : > { %2193 = vmatpush.bf16.msrb.mxu3 %v4854_v27  ;;  %v4871_v27 = vld [vmem:[#allocation11 + $0x1f8] sm:$0xf0] }
 0x116   : > { %2155 = vmatpush.bf16.msrb.mxu0 %v4654_v31  ;;  %v963_v31 = vld [vmem:[%s7138_s10 + $0x18] sm:$0xff]  ;;  %s3954_s10 = scalar_lea.sflag [#allocation4], %s7124_s14 }
 0x117   : > { %2168 = vmatpush.bf16.msrb.mxu1 %v4718_v15  ;;  %v4746_v15 = vor.u32 %v5774_v19, %v4743_v21  ;;  %v5798_v19 = vld [vmem:[#allocation11 + $0x1b4] sm:$0xf] }
 0x118   : > { %2181 = vmatpush.bf16.msrb.mxu2 %v4782_v33  ;;  %v4810_v33 = vor.u32 %v5790_v22, %v4807_v23  ;;  %v4714_v22 = vor.u32 %v5766_v13, %v4711_v16  ;;  %v4778_v23 = vor.u32 %v5782_v17, %v4775_v18 }
 0x119   : > { %2194 = vmatpush.bf16.msrb.mxu3 %v4846_v38  ;;  %v4874_v38 = vor.u32 %v5806_v26, %v4871_v27  ;;  %v5764_v26 = vld [vmem:[#allocation11 + $0xa4] sm:$0xf] }
 0x11a   : > { %2156 = vmatpush.bf16.msrb.mxu0 %v4646_v44  ;;  %v4863_v44 = vld [vmem:[#allocation11 + $0x1e8] sm:$0xf0] }
 0x11b   : > { %2169 = vmatpush.bf16.msrb.mxu1 %v4710_v45  ;;  %v7212_v45 = vpack.c.bf16 %v960_v35, %v960_v35  ;;  %v4866_v54 = vor.u32 %v5804_v43, %v4863_v44  ;;  %v4831_v35 = vld [vmem:[#allocation11 + $0x1a8] sm:$0xf0]  ;;  %v5794_v43 = vld [vmem:[#allocation11 + $0x194] sm:$0xf]  ;;  %v4823_v44 = vld [vmem:[#allocation11 + $0x198] sm:$0xf0] }
 0x11c   : > { %2182 = vmatpush.bf16.msrb.mxu2 %v4774_v46  ;;  %v7214_v46 = vpack.c.bf16 %v963_v31, %v963_v31 }
 0x11d   : > { %2195 = vmatpush.bf16.msrb.mxu3 %v4838_v50  ;;  %v4802_v50 = vor.u32 %v5788_v40, %v4799_v41  ;;  %v5778_v40 = vld [vmem:[#allocation11 + $0x114] sm:$0xf]  ;;  %v4759_v41 = vld [vmem:[#allocation11 + $0x118] sm:$0xf0] }
 0x11e   : > { %2157 = vmatpush.bf16.msrb.mxu0 %v4638_v56  ;;  %v5786_v56 = vld [vmem:[#allocation11 + $0x154] sm:$0xf] }
 0x11f   : > { %2170 = vmatpush.bf16.msrb.mxu1 %v4702_v57  ;;  %v4791_v57 = vld [vmem:[#allocation11 + $0x158] sm:$0xf0] }
 0x120   : > { %2183 = vmatpush.bf16.msrb.mxu2 %v4766_v58  ;;  %v5802_v58 = vld [vmem:[#allocation11 + $0x1d4] sm:$0xf] }
 0x121   : > { %2196 = vmatpush.bf16.msrb.mxu3 %v4830_v25  ;;  %v4794_v25 = vor.u32 %v5786_v56, %v4791_v57  ;;  %v4858_v0 = vor.u32 %v5802_v58, %v4855_v59  ;;  %v5776_v56 = vld [vmem:[#allocation11 + $0x104] sm:$0xf]  ;;  %v4751_v57 = vld [vmem:[#allocation11 + $0x108] sm:$0xf0] }
 0x122   : > { %2158 = vmatpush.bf16.msrb.mxu0 %v4630_v2  ;;  %v5784_v2 = vld [vmem:[#allocation11 + $0x144] sm:$0xf]  ;;  %v4815_v59 = vld [vmem:[#allocation11 + $0x188] sm:$0xf0] }
 0x123   : > { %2171 = vmatpush.bf16.msrb.mxu1 %v4694_v5  ;;  %v4847_v5 = vld [vmem:[#allocation11 + $0x1c8] sm:$0xf0]  ;;  %v4786_v10 = vor.u32 %v5784_v2, %v4783_v3  ;;  %v5792_v58 = vld [vmem:[#allocation11 + $0x184] sm:$0xf] }
 0x124   : > { %2184 = vmatpush.bf16.msrb.mxu2 %v4758_v6  ;;  %v4658_v6 = vor.u32 %v5752_v61, %v4655_v62  ;;  %v4850_v14 = vor.u32 %v5800_v4, %v4847_v5  ;;  %v4818_v61 = vor.u32 %v5792_v58, %v4815_v59  ;;  %v1070_v62 = vld [vmem:[%s7501_s2] sm:$0x3]  ;;  %s2842_s2 = sld [smem:[#allocation27]] }
 0x125   : > { %2197 = vmatpush.bf16.msrb.mxu3 %v4822_v12  ;;  %v4647_v12 = vld [vmem:[#allocation11 + $0x38] sm:$0xf0]  ;;  %v1072_v63 = vperm.slane %v1070_v62, 0 }
 0x126   : > { %2159 = vmatpush.bf16.msrb.mxu0 %v4622_v20  ;;  %v4839_v20 = vld [vmem:[#allocation11 + $0x1b8] sm:$0xf0]  ;;  %v4650_v21 = vor.u32 %v5750_v11, %v4647_v12 }
 0x127   : > { %2172 = vmatpush.bf16.msrb.mxu1 %v4686_v24  ;;  %v5748_v24 = vld [vmem:[#allocation11 + $0x24] sm:$0xf]  ;;  %v4842_v27 = vor.u32 %v5798_v19, %v4839_v20 }
 0x128   : > { %2185 = vmatpush.bf16.msrb.mxu2 %v4750_v32  ;;  %v4639_v32 = vld [vmem:[#allocation11 + $0x28] sm:$0xf0] }
 0x129   : > { %2198 = vmatpush.bf16.msrb.mxu3 %v4814_v29  ;;  %2160 = vmatmul.bf16.vlgmr.msrb.gmra.mxu0 %v7212_v45  ;;  %v5780_v29 = vld [vmem:[#allocation11 + $0x124] sm:$0xf]  ;;  %v4642_v31 = vor.u32 %v5748_v24, %v4639_v32 }
 0x12a   : > { %2204 = vmatpush.bf16.msra.mxu0 %v4682_v8  ;;  %2173 = vmatmul.bf16.vlgmr.msrb.gmra.mxu1 %v7216_v48  ;;  %v4767_v8 = vld [vmem:[#allocation11 + $0x128] sm:$0xf0]  ;;  %s3933_s27 = ssub.f32 1.0, %s2842_s2 }
 0x12b   : > { %2217 = vmatpush.bf16.msra.mxu1 %v4746_v15  ;;  %2186 = vmatmul.bf16.vlgmr.msrb.gmra.mxu2 %v7210_v42  ;;  %v4706_v15 = vor.u32 %v5764_v26, %v4703_v28 }
 0x12c   : > { %2230 = vmatpush.bf16.msra.mxu2 %v4810_v33  ;;  %2199 = vmatmul.bf16.vlgmr.msrb.gmra.mxu3 %v7214_v46  ;;  %v4770_v33 = vor.u32 %v5780_v29, %v4767_v8 }
 0x12d   : > { %2243 = vmatpush.bf16.msra.mxu3 %v4874_v38  ;;  %v4834_v38 = vor.u32 %v5796_v30, %v4831_v35 }
 0x12e   : > { %2205 = vmatpush.bf16.msra.mxu0 %v4674_v47  ;;  %v4634_v47 = vor.u32 %v5746_v34, %v4631_v36 }
 0x12f   : > { %2218 = vmatpush.bf16.msra.mxu1 %v4738_v49  ;;  %v4698_v49 = vor.u32 %v5762_v37, %v4695_v39 }
 0x130   : > { %2231 = vmatpush.bf16.msra.mxu2 %v4802_v50  ;;  %v4762_v50 = vor.u32 %v5778_v40, %v4759_v41 }
 0x131   : > { %2244 = vmatpush.bf16.msra.mxu3 %v4866_v54  ;;  %v4826_v54 = vor.u32 %v5794_v43, %v4823_v44  ;;  %v1826_v44 = vld [vmem:[#allocation12] sm:$0x3] }
 0x132   : > { %2206 = vmatpush.bf16.msra.mxu0 %v4666_v9  ;;  %v4626_v9 = vor.u32 %v5744_v51, %v4623_v52 }
 0x133   : > { %2219 = vmatpush.bf16.msra.mxu1 %v4730_v60  ;;  %v4690_v60 = vor.u32 %v5760_v53, %v4687_v55 }
 0x134   : > { %2232 = vmatpush.bf16.msra.mxu2 %v4794_v25  ;;  %v4754_v25 = vor.u32 %v5776_v56, %v4751_v57 }
 0x135   : > { %2245 = vmatpush.bf16.msra.mxu3 %v4858_v0 }
 0x136   : > { %2207 = vmatpush.bf16.msra.mxu0 %v4658_v6 }
 0x137   : > { %2220 = vmatpush.bf16.msra.mxu1 %v4722_v7 }
 0x138   : > { %2233 = vmatpush.bf16.msra.mxu2 %v4786_v10 }
 0x139   : > { %2246 = vmatpush.bf16.msra.mxu3 %v4850_v14  ;;  %v1073_v14 = vperm.slane %v1070_v62, 1 }
 0x13a   : > { %2208 = vmatpush.bf16.msra.mxu0 %v4650_v21 }
 0x13b   : > { %2221 = vmatpush.bf16.msra.mxu1 %v4714_v22 }
 0x13c   : > { %2234 = vmatpush.bf16.msra.mxu2 %v4778_v23 }
 0x13d   : > { %2247 = vmatpush.bf16.msra.mxu3 %v4842_v27 }
 0x13e   : > { %2209 = vmatpush.bf16.msra.mxu0 %v4642_v31 }
 0x13f   : > { %2222 = vmatpush.bf16.msra.mxu1 %v4706_v15 }
 0x140   : > { %2235 = vmatpush.bf16.msra.mxu2 %v4770_v33 }
 0x141   : > { %2248 = vmatpush.bf16.msra.mxu3 %v4834_v38 }
 0x142   : > { %2210 = vmatpush.bf16.msra.mxu0 %v4634_v47  ;;  %v1828_v47 = vperm.slane %v1826_v44, 0 }
 0x143   : > { %2223 = vmatpush.bf16.msra.mxu1 %v4698_v49  ;;  %v1829_v49 = vperm.slane %v1826_v44, 1 }
 0x144   : > { %2236 = vmatpush.bf16.msra.mxu2 %v4762_v50 }
 0x145   : > { %2249 = vmatpush.bf16.msra.mxu3 %v4826_v54 }
 0x146   : > { %2211 = vmatpush.bf16.msra.mxu0 %v4626_v9  ;;  %v1565_v0 = vpop.f32.mrf.mxu0 }
 0x147   : > { %2224 = vmatpush.bf16.msra.mxu1 %v4690_v60  ;;  %v1566_v1 = vadd.f32 %v1565_v0, %v1072_v63 }
 0x148   : > { %2237 = vmatpush.bf16.msra.mxu2 %v4754_v25 }
 0x149   : > { %2250 = vmatpush.bf16.msra.mxu3 %v4818_v61  ;;  %2212 = vmatmul.bf16.vlgmr.msra.gmra.mxu0 %v7212_v45 }
 0x14a   : > { %2225 = vmatmul.bf16.vlgmr.msra.gmra.mxu1 %v7216_v48  ;;  %v1578_v2 = vpop.f32.mrf.mxu1 }
 0x14b   : > { %2238 = vmatmul.bf16.vlgmr.msra.gmra.mxu2 %v7210_v42  ;;  %v1579_v3 = vadd.f32 %v1578_v2, %v1566_v1  ;;  %v6808_v2 = vmov 256.0  }
 0x14c   : > { %2251 = vmatmul.bf16.vlgmr.msra.gmra.mxu3 %v7214_v46  ;;  %6201 = vrcp.f32 %v6808_v2  ;;  %v5848_v2 = vld [vmem:[#allocation17 + $0x144] sm:$0xf] }
 0x14e   : > { %v1591_v4 = vpop.f32.mrf.mxu2  ;;  %v1567_v7 = vpop.f32.mrf.mxu0 }
 0x14f   : > { %v1592_v5 = vadd.f32 %v1591_v4, %v1579_v3  ;;  %v1604_v6 = vpop.f32.mrf.mxu3  ;;  %v5855_v7 = vld [vmem:[#allocation17 + $0x174] sm:$0xf0] }
 0x151   : > { %v1605_v45 = vadd.f32 %v1604_v6, %v1592_v5  ;;  %v4933_v6 = vld [vmem:[#allocation17 + $0x170] sm:$0xf] }
 0x152   : > { %v1580_v10 = vpop.f32.mrf.mxu1  ;;  %v6202_v3 = vpop.eup %6201 }
 0x153   : > { %v1718_v4 = vmul.f32 256.0, %v6202_v3  ;;  %v4934_v10 = vor.u32 %v5855_v7, %v4933_v6  ;;  %vm1722_vm0 = vweird.f32 %v6202_v3  ;;  %v4901_v7 = vld [vmem:[#allocation17 + $0x130] sm:$0xf] }
 0x155   : > { %v1719_v5 = vsub.f32 1.0, %v1718_v4  ;;  %2527 = vmatpush.bf16.msrb.mxu0 %v4934_v10  ;;  %v4965_v10 = vld [vmem:[#allocation17 + $0x1b0] sm:$0xf] }
 0x156   : > { %v1593_v48 = vpop.f32.mrf.mxu2 }
 0x157   : > { %v1606_v11 = vpop.f32.mrf.mxu3  ;;  %v5871_v48 = vld [vmem:[#allocation17 + $0x1f4] sm:$0xf0] }
 0x158   : > { %v5854_v11 = vld [vmem:[#allocation17 + $0x174] sm:$0xf] }
 0x166   : > { %v1617_v42 = vpop.f32.mrf.mxu0 }
 0x167   : > { %v1618_v12 = vadd.f32 %v1617_v42, %v1605_v45  ;;  %v1630_v46 = vpop.f32.mrf.mxu1  ;;  %v4997_v45 = vld [vmem:[#allocation17 + $0x1f0] sm:$0xf]  ;;  %v4935_v42 = vld [vmem:[#allocation17 + $0x178] sm:$0xf0] }
 0x169   : > { %v7229_v13 = vadd.f32 %v1630_v46, %v1618_v12  ;;  %v4998_v12 = vor.u32 %v5871_v48, %v4997_v45  ;;  %v4938_v46 = vor.u32 %v5854_v11, %v4935_v42  ;;  %v5847_v45 = vld [vmem:[#allocation17 + $0x134] sm:$0xf0]  ;;  %v5846_v42 = vld [vmem:[#allocation17 + $0x134] sm:$0xf] }
 0x16a   : > { %v4902_v48 = vor.u32 %v5847_v45, %v4901_v7  ;;  %v5863_v11 = vld [vmem:[#allocation17 + $0x1b4] sm:$0xf0]  ;;  %v5053_v7 = vld [vmem:[#allocation17 + $0x60] sm:$0xf]  ;;  %v5821_v45 = vld [vmem:[#allocation17 + $0x64] sm:$0xf0] }
 0x16b   : > { %2540 = vmatpush.bf16.msrb.mxu1 %v4998_v12  ;;  %2553 = vmatpush.bf16.msrb.mxu2 %v4938_v46  ;;  %v4903_v12 = vld [vmem:[#allocation17 + $0x138] sm:$0xf0]  ;;  %v4966_v46 = vor.u32 %v5863_v11, %v4965_v10  ;;  %v5117_v11 = vld [vmem:[#allocation17 + $0xe0] sm:$0xf] }
 0x16e   : > { %v1643_v16 = vpop.f32.mrf.mxu2  ;;  %v1619_v19 = vpop.f32.mrf.mxu0 }
 0x16f   : > { %v1644_v17 = vadd.f32 %v1643_v16, %v1073_v14  ;;  %v1656_v18 = vpop.f32.mrf.mxu3  ;;  %v1632_v20 = vpop.f32.mrf.mxu1  ;;  %v5870_v14 = vld [vmem:[#allocation17 + $0x1f4] sm:$0xf]  ;;  %v4999_v16 = vld [vmem:[#allocation17 + $0x1f8] sm:$0xf0]  ;;  %v5853_v19 = vld [vmem:[#allocation17 + $0x164] sm:$0xf0] }
 0x170   : > { %v4989_v20 = vld [vmem:[#allocation17 + $0x1e0] sm:$0xf] }
 0x171   : > { %v1657_v21 = vadd.f32 %v1656_v18, %v1644_v17  ;;  %v4925_v17 = vld [vmem:[#allocation17 + $0x160] sm:$0xf]  ;;  %v5002_v18 = vor.u32 %v5870_v14, %v4999_v16  ;;  %v4906_v14 = vor.u32 %v5846_v42, %v4903_v12  ;;  %v5862_v16 = vld [vmem:[#allocation17 + $0x1b4] sm:$0xf]  ;;  %v5837_v42 = vld [vmem:[#allocation17 + $0xe4] sm:$0xf0] }
 0x172   : > { %v5820_v12 = vld [vmem:[#allocation17 + $0x64] sm:$0xf] }
 0x173   : > { %2566 = vmatpush.bf16.msrb.mxu3 %v5002_v18 }
 0x176   : > { %v1645_v22 = vpop.f32.mrf.mxu2 }
 0x177   : > { %v1658_v23 = vpop.f32.mrf.mxu3  ;;  %v4926_v22 = vor.u32 %v5853_v19, %v4925_v17  ;;  %v4967_v17 = vld [vmem:[#allocation17 + $0x1b8] sm:$0xf0]  ;;  %v4893_v19 = vld [vmem:[#allocation17 + $0x120] sm:$0xf] }
 0x178   : > { %v4970_v18 = vor.u32 %v5862_v16, %v4967_v17  ;;  %v5836_v16 = vld [vmem:[#allocation17 + $0xe4] sm:$0xf]  ;;  %v5119_v17 = vld [vmem:[#allocation17 + $0xe8] sm:$0xf0] }
 0x179   : > { %2528 = vmatpush.bf16.msrb.mxu0 %v4926_v22 }
 0x186   : > { %v1669_v24 = vpop.f32.mrf.mxu0 }
 0x187   : > { %v1670_v32 = vadd.f32 %v1669_v24, %v1657_v21  ;;  %v1682_v26 = vpop.f32.mrf.mxu1  ;;  %v5869_v21 = vld [vmem:[#allocation17 + $0x1e4] sm:$0xf0]  ;;  %v5852_v24 = vld [vmem:[#allocation17 + $0x164] sm:$0xf] }
 0x188   : > { %v4990_v23 = vor.u32 %v5869_v21, %v4989_v20  ;;  %v5845_v20 = vld [vmem:[#allocation17 + $0x124] sm:$0xf0]  ;;  %v4957_v21 = vld [vmem:[#allocation17 + $0x1a0] sm:$0xf] }
 0x189   : > { %v1683_v27 = vadd.f32 %v1682_v26, %v1670_v32  ;;  %v4927_v32 = vld [vmem:[#allocation17 + $0x168] sm:$0xf0]  ;;  %v5868_v26 = vld [vmem:[#allocation17 + $0x1e4] sm:$0xf]  ;;  %v4894_v22 = vor.u32 %v5845_v20, %v4893_v19  ;;  %v5122_v19 = vor.u32 %v5836_v16, %v5119_v17  ;;  %v5045_v20 = vld [vmem:[#allocation17 + $0x50] sm:$0xf] }
 0x18a   : > { %2541 = vmatpush.bf16.msrb.mxu1 %v4990_v23  ;;  %v5861_v23 = vld [vmem:[#allocation17 + $0x1a4] sm:$0xf0]  ;;  %v5810_v16 = vld [vmem:[#allocation17 + $0x14] sm:$0xf]  ;;  %v5015_v17 = vld [vmem:[#allocation17 + $0x18] sm:$0xf0] }
 0x18e   : > { %v1695_v28 = vpop.f32.mrf.mxu2  ;;  %v1671_v35 = vpop.f32.mrf.mxu0 }
 0x18f   : > { %v1696_v29 = vadd.f32 %v1695_v28, %v1683_v27  ;;  %v1708_v8 = vpop.f32.mrf.mxu3  ;;  %v1684_v31 = vpop.f32.mrf.mxu1  ;;  %v1720_v27 = vmul.f32 %v6202_v3, %v1719_v5  ;;  %v4930_v28 = vor.u32 %v5852_v24, %v4927_v32  ;;  %v5851_v35 = vld [vmem:[#allocation17 + $0x154] sm:$0xf0]  ;;  %v5864_v5 = vld [vmem:[#allocation17 + $0x1c4] sm:$0xf]  ;;  %v4895_v32 = vld [vmem:[#allocation17 + $0x128] sm:$0xf0] }
 0x190   : > { %v5844_v24 = vld [vmem:[#allocation17 + $0x124] sm:$0xf] }
 0x191   : > { %v7231_v30 = vadd.f32 %v1708_v8, %v1696_v29  ;;  %v4991_v29 = vld [vmem:[#allocation17 + $0x1e8] sm:$0xf0]  ;;  %v4917_v8 = vld [vmem:[#allocation17 + $0x150] sm:$0xf]  ;;  %2554 = vmatpush.bf16.msrb.mxu2 %v4930_v28  ;;  %v5860_v28 = vld [vmem:[#allocation17 + $0x1a4] sm:$0xf] }
 0x192   : > { %v4994_v31 = vor.u32 %v5868_v26, %v4991_v29  ;;  %v4958_v26 = vor.u32 %v5861_v23, %v4957_v21  ;;  %v4959_v29 = vld [vmem:[#allocation17 + $0x1a8] sm:$0xf0]  ;;  %v5819_v21 = vld [vmem:[#allocation17 + $0x54] sm:$0xf0] }
 0x193   : > { %v1714_v1 = vadd.f32 %v7231_v30, %v7229_v13  ;;  %v5046_v23 = vor.u32 %v5819_v21, %v5045_v20  ;;  %v5079_v20 = vld [vmem:[#allocation17 + $0x98] sm:$0xf0] }
 0x194   : > { %2567 = vmatpush.bf16.msrb.mxu3 %v4994_v31  ;;  %v5843_v31 = vld [vmem:[#allocation17 + $0x114] sm:$0xf0] }
 0x196   : > { %v1697_v15 = vpop.f32.mrf.mxu2 }
 0x197   : > { %v1710_v33 = vpop.f32.mrf.mxu3  ;;  %v4981_v15 = vld [vmem:[#allocation17 + $0x1d0] sm:$0xf] }
 0x198   : > { %v5867_v33 = vld [vmem:[#allocation17 + $0x1d4] sm:$0xf0] }
 0x1a6   : > { %v2161_v34 = vpop.f32.mrf.mxu0 }
 0x1a7   : > { %v2174_v36 = vpop.f32.mrf.mxu1  ;;  %v2162_v50 = vadd.f32 %v2161_v34, %v1828_v47  ;;  %v5850_v34 = vld [vmem:[#allocation17 + $0x154] sm:$0xf] }
 0x1a9   : > { %v2175_v54 = vadd.f32 %v2174_v36, %v2162_v50  ;;  %v4918_v36 = vor.u32 %v5851_v35, %v4917_v8  ;;  %v4962_v8 = vor.u32 %v5860_v28, %v4959_v29  ;;  %v4885_v35 = vld [vmem:[#allocation17 + $0x110] sm:$0xf]  ;;  %v5834_v28 = vld [vmem:[#allocation17 + $0xd4] sm:$0xf] }
 0x1ab   : > { %2529 = vmatpush.bf16.msrb.mxu0 %v4918_v36  ;;  %v5842_v36 = vld [vmem:[#allocation17 + $0x114] sm:$0xf] }
 0x1ae   : > { %v2187_v37 = vpop.f32.mrf.mxu2  ;;  %v2163_v39 = vpop.f32.mrf.mxu0 }
 0x1af   : > { %v2200_v38 = vpop.f32.mrf.mxu3  ;;  %v2176_v40 = vpop.f32.mrf.mxu1  ;;  %v2188_v56 = vadd.f32 %v2187_v37, %v2175_v54  ;;  %v4919_v37 = vld [vmem:[#allocation17 + $0x158] sm:$0xf0] }
 0x1b0   : > { %v4983_v39 = vld [vmem:[#allocation17 + $0x1d8] sm:$0xf0]  ;;  %v4982_v40 = vor.u32 %v5867_v33, %v4981_v15  ;;  %v4949_v15 = vld [vmem:[#allocation17 + $0x190] sm:$0xf]  ;;  %v4886_v33 = vor.u32 %v5843_v31, %v4885_v35  ;;  %v5037_v31 = vld [vmem:[#allocation17 + $0x40] sm:$0xf] }
 0x1b1   : > { %v7233_v25 = vadd.f32 %v2200_v38, %v2188_v56  ;;  %v5866_v38 = vld [vmem:[#allocation17 + $0x1d4] sm:$0xf] }
 0x1b2   : > { %v4986_v44 = vor.u32 %v5866_v38, %v4983_v39  ;;  %2542 = vmatpush.bf16.msrb.mxu1 %v4982_v40  ;;  %v5858_v40 = vld [vmem:[#allocation17 + $0x194] sm:$0xf] }
 0x1b4   : > { %2568 = vmatpush.bf16.msrb.mxu3 %v4986_v44  ;;  %v4877_v44 = vld [vmem:[#allocation17 + $0x100] sm:$0xf] }
 0x1b6   : > { %v2189_v41 = vpop.f32.mrf.mxu2 }
 0x1b7   : > { %v2202_v43 = vpop.f32.mrf.mxu3  ;;  %v4922_v41 = vor.u32 %v5850_v34, %v4919_v37  ;;  %v5859_v34 = vld [vmem:[#allocation17 + $0x194] sm:$0xf0]  ;;  %v4887_v37 = vld [vmem:[#allocation17 + $0x118] sm:$0xf0] }
 0x1b8   : > { %v1721_v43 = vadd.f32 %v6202_v3, %v1720_v27  ;;  %v4898_v27 = vor.u32 %v5844_v24, %v4895_v32  ;;  %v4950_v38 = vor.u32 %v5859_v34, %v4949_v15  ;;  %v4890_v39 = vor.u32 %v5842_v36, %v4887_v37  ;;  %v5835_v24 = vld [vmem:[#allocation17 + $0xd4] sm:$0xf0]  ;;  %v5818_v32 = vld [vmem:[#allocation17 + $0x54] sm:$0xf]  ;;  %v5817_v15 = vld [vmem:[#allocation17 + $0x44] sm:$0xf0] }
 0x1b9   : > { %2555 = vmatpush.bf16.msrb.mxu2 %v4922_v41  ;;  %v4951_v41 = vld [vmem:[#allocation17 + $0x198] sm:$0xf0]  ;;  %v5038_v34 = vor.u32 %v5817_v15, %v5037_v31  ;;  %v5833_v36 = vld [vmem:[#allocation17 + $0xc4] sm:$0xf0]  ;;  %v5816_v37 = vld [vmem:[#allocation17 + $0x44] sm:$0xf] }
 0x1ba   : > { %v7241_v47 = vsel %vm1722_vm0, %v6202_v3, %v1721_v43  ;;  %v4911_v3 = vld [vmem:[#allocation17 + $0x148] sm:$0xf0]  ;;  %v4954_v43 = vor.u32 %v5858_v40, %v4951_v41  ;;  %v5832_v41 = vld [vmem:[#allocation17 + $0xc4] sm:$0xf] }
 0x1bb   : > { %v4914_v4 = vor.u32 %v5848_v2, %v4911_v3  ;;  %v5808_v31 = vld [vmem:[#allocation17 + $0x4] sm:$0xf]  ;;  %v5007_v15 = vld [vmem:[#allocation17 + $0x8] sm:$0xf0] }
 0x1bd   : > { %2556 = vmatpush.bf16.msrb.mxu2 %v4914_v4  ;;  %v5063_v4 = vld [vmem:[#allocation17 + $0x78] sm:$0xf0] }
 0x1c1   : > { %2557 = vmatpush.bf16.msrb.mxu2 %v4906_v14  ;;  %v5055_v14 = vld [vmem:[#allocation17 + $0x68] sm:$0xf0] }
 0x1c5   : > { %2558 = vmatpush.bf16.msrb.mxu2 %v4898_v27  ;;  %v5047_v27 = vld [vmem:[#allocation17 + $0x58] sm:$0xf0] }
 0x1c6   : > { %v2213_v51 = vpop.f32.mrf.mxu0  ;;  %v5050_v29 = vor.u32 %v5818_v32, %v5047_v27  ;;  %v5018_v32 = vor.u32 %v5810_v16, %v5015_v17  ;;  %v5069_v27 = vld [vmem:[#allocation17 + $0x80] sm:$0xf] }
 0x1c7   : > { %v2214_v52 = vadd.f32 %v2213_v51, %v1829_v49  ;;  %v2226_v53 = vpop.f32.mrf.mxu1 }
 0x1c9   : > { %v2227_v55 = vadd.f32 %v2226_v53, %v2214_v52  ;;  %2559 = vmatpush.bf16.msrb.mxu2 %v4890_v39 }
 0x1ce   : > { %v2239_v57 = vpop.f32.mrf.mxu2  ;;  %v2215_v9 = vpop.f32.mrf.mxu0 }
 0x1cf   : > { %v2240_v58 = vadd.f32 %v2239_v57, %v2227_v55  ;;  %v2252_v59 = vpop.f32.mrf.mxu3  ;;  %v2228_v60 = vpop.f32.mrf.mxu1 }
 0x1d1   : > { %v7235_v61 = vadd.f32 %v2252_v59, %v2240_v58 }
 0x1d3   : > { %v2258_v62 = vadd.f32 %v7235_v61, %v7233_v25 }
 0x1d5   : > { %2259 = vadd.xlane.f32.xlu0 %v2258_v62  ;;  %v5849_v62 = vld [vmem:[#allocation17 + $0x144] sm:$0xf0] }
 0x1d6   : > { %v2241_v63 = vpop.f32.mrf.mxu2 }
 0x1d7   : > { %v2254_v0 = vpop.f32.mrf.mxu3  ;;  %v4973_v63 = vld [vmem:[#allocation17 + $0x1c0] sm:$0xf] }
 0x1dd   : > { %1715 = vadd.xlane.f32.xlu0 %v1714_v1  ;;  %v5865_v1 = vld [vmem:[#allocation17 + $0x1c4] sm:$0xf0] }
 0x248   : > { %v2260_v49 = vpop.xlane.xlu0 %2259 }
 0x249   : > { %v2261_v50 = vmul.f32 %v2260_v49, %v7241_v47  ;;  %v5841_v49 = vld [vmem:[#allocation17 + $0x104] sm:$0xf0] }
 0x24b   : > { %v7245_v51 = vsub.f32 %v7233_v25, %v2261_v50  ;;  %v7248_v52 = vsub.f32 %v7235_v61, %v2261_v50  ;;  %v4909_v61 = vld [vmem:[#allocation17 + $0x140] sm:$0xf] }
 0x24c   : > { %v4910_v0 = vor.u32 %v5849_v62, %v4909_v61  ;;  %v4941_v50 = vld [vmem:[#allocation17 + $0x180] sm:$0xf]  ;;  %v5061_v61 = vld [vmem:[#allocation17 + $0x70] sm:$0xf] }
 0x24d   : > { %v2264_v53 = vmul.f32 %v7245_v51, %v7245_v51  ;;  %v2265_v54 = vmul.f32 %v7248_v52, %v7248_v52 }
 0x24e   : > { %2530 = vmatpush.bf16.msrb.mxu0 %v4910_v0  ;;  %v5125_v0 = vld [vmem:[#allocation17 + $0xf0] sm:$0xf] }
 0x24f   : > { %v2266_v55 = vadd.f32 %v2265_v54, %v2264_v53  ;;  %v4878_v53 = vor.u32 %v5841_v49, %v4877_v44  ;;  %v5857_v54 = vld [vmem:[#allocation17 + $0x184] sm:$0xf0] }
 0x250   : > { %v1716_v56 = vpop.xlane.xlu0 %1715 }
 0x251   : > { %v1724_v57 = vmul.f32 %v7241_v47, %v1716_v56  ;;  %2267 = vadd.xlane.f32.xlu1 %v2266_v55  ;;  %v5840_v55 = vld [vmem:[#allocation17 + $0x104] sm:$0xf]  ;;  %v4879_v56 = vld [vmem:[#allocation17 + $0x108] sm:$0xf0] }
 0x252   : > { %2531 = vmatpush.bf16.msrb.mxu0 %v4902_v48  ;;  %v5054_v48 = vor.u32 %v5821_v45, %v5053_v7  ;;  %v5828_v45 = vld [vmem:[#allocation17 + $0xa4] sm:$0xf] }
 0x253   : > { %v7256_v58 = vsub.f32 %v7229_v13, %v1724_v57  ;;  %v7259_v59 = vsub.f32 %v7231_v30, %v1724_v57  ;;  %v4974_v13 = vor.u32 %v5865_v1, %v4973_v63  ;;  %v4975_v30 = vld [vmem:[#allocation17 + $0x1c8] sm:$0xf0]  ;;  %v4942_v57 = vor.u32 %v5857_v54, %v4941_v50  ;;  %v5823_v63 = vld [vmem:[#allocation17 + $0x74] sm:$0xf0]  ;;  %v5029_v50 = vld [vmem:[#allocation17 + $0x30] sm:$0xf] }
 0x254   : > { %v4978_v6 = vor.u32 %v5864_v5, %v4975_v30  ;;  %v5839_v1 = vld [vmem:[#allocation17 + $0xf4] sm:$0xf0]  ;;  %v5062_v2 = vor.u32 %v5823_v63, %v5061_v61  ;;  %v5838_v5 = vld [vmem:[#allocation17 + $0xf4] sm:$0xf]  ;;  %v5093_v54 = vld [vmem:[#allocation17 + $0xb0] sm:$0xf] }
 0x255   : > { %v1727_v9 = vmul.f32 %v7256_v58, %v7256_v58  ;;  %v1728_v60 = vmul.f32 %v7259_v59, %v7259_v59  ;;  %2543 = vmatpush.bf16.msrb.mxu1 %v4974_v13  ;;  %v5126_v3 = vor.u32 %v5839_v1, %v5125_v0  ;;  %v5822_v13 = vld [vmem:[#allocation17 + $0x74] sm:$0xf]  ;;  %v5095_v63 = vld [vmem:[#allocation17 + $0xb8] sm:$0xf0]  ;;  %v5021_v0 = vld [vmem:[#allocation17 + $0x20] sm:$0xf] }
 0x256   : > { %2569 = vmatpush.bf16.msrb.mxu3 %v4978_v6  ;;  %2532 = vmatpush.bf16.msrb.mxu0 %v4894_v22  ;;  %v5066_v30 = vor.u32 %v5822_v13, %v5063_v4  ;;  %v5127_v6 = vld [vmem:[#allocation17 + $0xf8] sm:$0xf0]  ;;  %v5109_v22 = vld [vmem:[#allocation17 + $0xd0] sm:$0xf]  ;;  %v5085_v13 = vld [vmem:[#allocation17 + $0xa0] sm:$0xf] }
 0x257   : > { %v1729_v25 = vadd.f32 %v1728_v60, %v1727_v9  ;;  %v4882_v9 = vor.u32 %v5840_v55, %v4879_v56  ;;  %v5856_v60 = vld [vmem:[#allocation17 + $0x184] sm:$0xf]  ;;  %v5130_v10 = vor.u32 %v5838_v5, %v5127_v6  ;;  %v5829_v4 = vld [vmem:[#allocation17 + $0xa4] sm:$0xf0] }
 0x258   : > { %v5812_v5 = vld [vmem:[#allocation17 + $0x24] sm:$0xf]  ;;  %v5086_v7 = vor.u32 %v5829_v4, %v5085_v13  ;;  %v1712_v4 = vld [vmem:[#allocation9] sm:$0x3] }
 0x259   : > { %1730 = vadd.xlane.f32.xlu1 %v1729_v25  ;;  %2544 = vmatpush.bf16.msrb.mxu1 %v4966_v46  ;;  %v4943_v25 = vld [vmem:[#allocation17 + $0x188] sm:$0xf0]  ;;  %v5118_v46 = vor.u32 %v5837_v42, %v5117_v11  ;;  %v5811_v42 = vld [vmem:[#allocation17 + $0x14] sm:$0xf0] }
 0x25a   : > { %2570 = vmatpush.bf16.msrb.mxu3 %v4970_v18  ;;  %2533 = vmatpush.bf16.msrb.mxu0 %v4886_v33  ;;  %v4946_v62 = vor.u32 %v5856_v60, %v4943_v25  ;;  %v5058_v18 = vor.u32 %v5820_v12, %v5055_v14  ;;  %v5101_v33 = vld [vmem:[#allocation17 + $0xc0] sm:$0xf]  ;;  %v5031_v60 = vld [vmem:[#allocation17 + $0x38] sm:$0xf0]  ;;  %v5077_v12 = vld [vmem:[#allocation17 + $0x90] sm:$0xf] }
 0x25b   : > { %2560 = vmatpush.bf16.msrb.mxu2 %v4882_v9  ;;  %v5102_v39 = vor.u32 %v5833_v36, %v5101_v33  ;;  %v5814_v9 = vld [vmem:[#allocation17 + $0x34] sm:$0xf]  ;;  %v5071_v36 = vld [vmem:[#allocation17 + $0x88] sm:$0xf0] }
 0x25c   : > { %v5034_v61 = vor.u32 %v5814_v9, %v5031_v60 }
 0x25d   : > { %2545 = vmatpush.bf16.msrb.mxu1 %v4958_v26  ;;  %v5110_v26 = vor.u32 %v5835_v24, %v5109_v22  ;;  %v5005_v24 = vld [vmem:[#allocation17] sm:$0xf] }
 0x25e   : > { %2571 = vmatpush.bf16.msrb.mxu3 %v4962_v8  ;;  %2534 = vmatpush.bf16.msrb.mxu0 %v4878_v53  ;;  %v5111_v8 = vld [vmem:[#allocation17 + $0xd8] sm:$0xf0]  ;;  %v5815_v53 = vld [vmem:[#allocation17 + $0x34] sm:$0xf0] }
 0x25f   : > { %2765 = vmatpush.bf16.msra.mxu2 %v5066_v30  ;;  %v5114_v35 = vor.u32 %v5834_v28, %v5111_v8  ;;  %v5030_v56 = vor.u32 %v5815_v53, %v5029_v50  ;;  %v5023_v30 = vld [vmem:[#allocation17 + $0x28] sm:$0xf0]  ;;  %v5825_v28 = vld [vmem:[#allocation17 + $0x84] sm:$0xf0] }
 0x260   : > { %v5026_v11 = vor.u32 %v5812_v5, %v5023_v30 }
 0x261   : > { %2546 = vmatpush.bf16.msrb.mxu1 %v4950_v38  ;;  %v5039_v38 = vld [vmem:[#allocation17 + $0x48] sm:$0xf0] }
 0x262   : > { %2572 = vmatpush.bf16.msrb.mxu3 %v4954_v43  ;;  %2739 = vmatpush.bf16.msra.mxu0 %v5062_v2  ;;  %v5042_v40 = vor.u32 %v5816_v37, %v5039_v38  ;;  %v5103_v43 = vld [vmem:[#allocation17 + $0xc8] sm:$0xf0]  ;;  %v5070_v38 = vor.u32 %v5825_v28, %v5069_v27 }
 0x263   : > { %2766 = vmatpush.bf16.msra.mxu2 %v5058_v18  ;;  %v5106_v44 = vor.u32 %v5832_v41, %v5103_v43 }
 0x265   : > { %2547 = vmatpush.bf16.msrb.mxu1 %v4942_v57  ;;  %v5831_v57 = vld [vmem:[#allocation17 + $0xb4] sm:$0xf0] }
 0x266   : > { %2573 = vmatpush.bf16.msrb.mxu3 %v4946_v62  ;;  %2740 = vmatpush.bf16.msra.mxu0 %v5054_v48  ;;  %v5094_v25 = vor.u32 %v5831_v57, %v5093_v54  ;;  %v5830_v62 = vld [vmem:[#allocation17 + $0xb4] sm:$0xf]  ;;  %v5013_v48 = vld [vmem:[#allocation17 + $0x10] sm:$0xf] }
 0x267   : > { %2767 = vmatpush.bf16.msra.mxu2 %v5050_v29  ;;  %v5098_v2 = vor.u32 %v5830_v62, %v5095_v63  ;;  %v5014_v22 = vor.u32 %v5811_v42, %v5013_v48 }
 0x269   : > { %2752 = vmatpush.bf16.msra.mxu1 %v5126_v3  ;;  %v5813_v3 = vld [vmem:[#allocation17 + $0x24] sm:$0xf0] }
 0x26a   : > { %2778 = vmatpush.bf16.msra.mxu3 %v5130_v10  ;;  %2741 = vmatpush.bf16.msra.mxu0 %v5046_v23  ;;  %v5022_v6 = vor.u32 %v5813_v3, %v5021_v0  ;;  %v5087_v10 = vld [vmem:[#allocation17 + $0xa8] sm:$0xf0] }
 0x26b   : > { %2768 = vmatpush.bf16.msra.mxu2 %v5042_v40  ;;  %v5090_v14 = vor.u32 %v5828_v45, %v5087_v10  ;;  %v5010_v40 = vor.u32 %v5808_v31, %v5007_v15  ;;  %v1748_v45 = vperm.slane %v1712_v4, 1 }
 0x26d   : > { %2753 = vmatpush.bf16.msra.mxu1 %v5118_v46  ;;  %v5827_v46 = vld [vmem:[#allocation17 + $0x94] sm:$0xf0] }
 0x26e   : > { %2779 = vmatpush.bf16.msra.mxu3 %v5122_v19  ;;  %2742 = vmatpush.bf16.msra.mxu0 %v5038_v34  ;;  %v5826_v19 = vld [vmem:[#allocation17 + $0x94] sm:$0xf]  ;;  %v5078_v23 = vor.u32 %v5827_v46, %v5077_v12  ;;  %v5824_v34 = vld [vmem:[#allocation17 + $0x84] sm:$0xf]  ;;  %v1713_v12 = vld [vmem:[%s7502_s22] sm:$0x3] }
 0x26f   : > { %2769 = vmatpush.bf16.msra.mxu2 %v5034_v61  ;;  %v5074_v41 = vor.u32 %v5824_v34, %v5071_v36  ;;  %v1754_v16 = vperm.slane %v1713_v12, 0  ;;  %s7506_s22 = sld [smem:[#allocation60_spill]] }
 0x271   : > { %2754 = vmatpush.bf16.msra.mxu1 %v5110_v26  ;;  %v5809_v26 = vld [vmem:[#allocation17 + $0x4] sm:$0xf0] }
 0x272   : > { %2780 = vmatpush.bf16.msra.mxu3 %v5114_v35  ;;  %2743 = vmatpush.bf16.msra.mxu0 %v5030_v56  ;;  %v5082_v35 = vor.u32 %v5826_v19, %v5079_v20  ;;  %v5006_v37 = vor.u32 %v5809_v26, %v5005_v24 }
 0x273   : > { %2770 = vmatpush.bf16.msra.mxu2 %v5026_v11 }
 0x275   : > { %2755 = vmatpush.bf16.msra.mxu1 %v5102_v39 }
 0x276   : > { %2781 = vmatpush.bf16.msra.mxu3 %v5106_v44  ;;  %2744 = vmatpush.bf16.msra.mxu0 %v5022_v6  ;;  %v2256_v44 = vld [vmem:[#allocation14] sm:$0x3] }
 0x277   : > { %2771 = vmatpush.bf16.msra.mxu2 %v5018_v32  ;;  %v2284_v56 = vperm.slane %v2256_v44, 0  ;;  %v2285_v57 = vperm.slane %v2256_v44, 1 }
 0x279   : > { %2756 = vmatpush.bf16.msra.mxu1 %v5094_v25 }
 0x27a   : > { %2782 = vmatpush.bf16.msra.mxu3 %v5098_v2  ;;  %2745 = vmatpush.bf16.msra.mxu0 %v5014_v22 }
 0x27b   : > { %2772 = vmatpush.bf16.msra.mxu2 %v5010_v40 }
 0x27d   : > { %2757 = vmatpush.bf16.msra.mxu1 %v5086_v7 }
 0x27e   : > { %2783 = vmatpush.bf16.msra.mxu3 %v5090_v14  ;;  %2746 = vmatpush.bf16.msra.mxu0 %v5006_v37 }
 0x281   : > { %2758 = vmatpush.bf16.msra.mxu1 %v5078_v23 }
 0x282   : > { %2784 = vmatpush.bf16.msra.mxu3 %v5082_v35 }
 0x285   : > { %2759 = vmatpush.bf16.msra.mxu1 %v5070_v38 }
 0x286   : > { %2785 = vmatpush.bf16.msra.mxu3 %v5074_v41 }
 0x2c4   : > { %v2268_v49 = vpop.xlane.xlu1 %2267 }
 0x2c5   : > { %v2269_v55 = vmul.f32 %v2268_v49, %v7241_v47 }
 0x2c7   : > { %v7266_v1 = vadd.f32 1e-05, %v2269_v55  ;;  %v2257_v55 = vld [vmem:[#allocation15] sm:$0x3] }
 0x2c8   : > { %v2291_v62 = vperm.slane %v2257_v55, 0  ;;  %v2292_v63 = vperm.slane %v2257_v55, 1 }
 0x2c9   : > { %6203 = vrsqrt.f32 %v7266_v1  ;;  %vm2277_vm2 = vweird.f32 %v7266_v1 }
 0x2cc   : > { %v1731_v18 = vpop.xlane.xlu1 %1730 }
 0x2cd   : > { %v1732_v21 = vmul.f32 %v1731_v18, %v7241_v47 }
 0x2cf   : > { %v6204_v29 = vpop.eup %6203  ;;  %v1733_v8 = vadd.f32 1e-05, %v1732_v21 }
 0x2d0   : > { %v2272_v33 = vmul.f32 %v6204_v29, %v7266_v1  ;;  %vm2278_vm1 = vweird.f32 %v6204_v29 }
 0x2d1   : > { %6205 = vrsqrt.f32 %v1733_v8  ;;  %vm2279_vm3 = vmor %vm2277_vm2, %vm2278_vm1  ;;  %vm1740_vm5 = vweird.f32 %v1733_v8 }
 0x2d2   : > { %v2273_v39 = vmul.f32 %v6204_v29, %v2272_v33  ;;  %v2791_v33 = vld [vmem:[#allocation18] sm:$0x3] }
 0x2d3   : > { %v2794_v44 = vperm.slane %v2791_v33, 1 }
 0x2d4   : > { %v2274_v43 = vmul.f32 0.5, %v2273_v39 }
 0x2d6   : > { %v2275_v49 = vsub.f32 1.5, %v2274_v43  ;;  %v2793_v43 = vperm.slane %v2791_v33, 0  ;;  %v5192_v33 = vld [vmem:[#allocation23 + $0x78] sm:$0xf0] }
 0x2d7   : > { %v6206_v50 = vpop.eup %6205 }
 0x2d8   : > { %v2276_v53 = vmul.f32 %v6204_v29, %v2275_v49  ;;  %v1735_v54 = vmul.f32 %v6206_v50, %v1733_v8  ;;  %vm1741_vm4 = vweird.f32 %v6206_v50 }
 0x2d9   : > { %vm1742_vm6 = vmor %vm1740_vm5, %vm1741_vm4 }
 0x2da   : > { %v2280_v9 = vsel %vm2279_vm3, %v6204_v29, %v2276_v53  ;;  %v1736_v60 = vmul.f32 %v6206_v50, %v1735_v54 }
 0x2db   : > { %v2281_v25 = vmul.f32 %v2280_v9, %v7245_v51  ;;  %v2282_v61 = vmul.f32 %v2280_v9, %v7248_v52  ;;  %v1747_v51 = vperm.slane %v1712_v4, 0 }
 0x2dc   : > { %v1737_v0 = vmul.f32 0.5, %v1736_v60 }
 0x2dd   : > { %v2288_v2 = vmul.f32 %v2284_v56, %v2281_v25  ;;  %v2289_v3 = vmul.f32 %v2285_v57, %v2282_v61 }
 0x2de   : > { %v1738_v13 = vsub.f32 1.5, %v1737_v0 }
 0x2df   : > { %v2295_v1 = vadd.f32 %v2291_v62, %v2288_v2  ;;  %v2296_v5 = vadd.f32 %v2292_v63, %v2289_v3 }
 0x2e0   : > { %v1739_v30 = vmul.f32 %v6206_v50, %v1738_v13 }
 0x2e1   : > { %v7274_v6 = vmax.f32 %v2295_v1, 0.0  ;;  %v7276_v7 = vmax.f32 %v2296_v5, 0.0 }
 0x2e2   : > { %v1743_v52 = vsel %vm1742_vm6, %v6206_v50, %v1739_v30 }
 0x2e3   : > { %v1744_v10 = vmul.f32 %v1743_v52, %v7256_v58  ;;  %v1745_v48 = vmul.f32 %v1743_v52, %v7259_v59  ;;  %v2301_v11 = vpack.c.bf16 %v7274_v6, %v7274_v6  ;;  %v2302_v42 = vpack.c.bf16 %v7276_v7, %v7276_v7  ;;  %v2800_v52 = vld [vmem:[%s7503_s12] sm:$0x3] }
 0x2e4   : > { %v1755_v58 = vperm.slane %v1713_v12, 1 }
 0x2e5   : > { %2535 = vmatmul.bf16.vlgmr.msrb.gmra.mxu0 %v2301_v11  ;;  %2548 = vmatmul.bf16.vlgmr.msrb.gmra.mxu1 %v2302_v42  ;;  %v1751_v46 = vmul.f32 %v1747_v51, %v1744_v10  ;;  %v1752_v14 = vmul.f32 %v1748_v45, %v1745_v48  ;;  %v2799_v51 = vld [vmem:[#allocation20] sm:$0x3] }
 0x2e6   : > { %2561 = vmatmul.bf16.vlgmr.msrb.gmra.mxu2 %v2301_v11  ;;  %2574 = vmatmul.bf16.vlgmr.msrb.gmra.mxu3 %v2302_v42  ;;  %v2827_v10 = vperm.slane %v2799_v51, 0  ;;  %v2828_v48 = vperm.slane %v2799_v51, 1  ;;  %v5881_v51 = vld [vmem:[#allocation23 + $0x44] sm:$0xf0] }
 0x2e7   : > { %v1758_v17 = vadd.f32 %v1754_v16, %v1751_v46  ;;  %v1759_v59 = vadd.f32 %v1755_v58, %v1752_v14  ;;  %v2834_v46 = vperm.slane %v2800_v52, 0  ;;  %v2835_v14 = vperm.slane %v2800_v52, 1  ;;  %v2844_v16 = vld [vmem:[#allocation21] sm:$0x3] }
 0x2e9   : > { %v7287_v18 = vmax.f32 %v1758_v17, 0.0  ;;  %v7289_v19 = vmax.f32 %v1759_v59, 0.0 }
 0x2eb   : > { %v2299_v20 = vpack.c.bf16 %v7287_v18, %v7287_v18  ;;  %v2300_v21 = vpack.c.bf16 %v7289_v19, %v7289_v19 }
 0x2f5   : > { %2747 = vmatmul.bf16.vlgmr.msra.gmra.mxu0 %v2299_v20  ;;  %2760 = vmatmul.bf16.vlgmr.msra.gmra.mxu1 %v2300_v21 }
 0x2f6   : > { %2773 = vmatmul.bf16.vlgmr.msra.gmra.mxu2 %v2299_v20  ;;  %2786 = vmatmul.bf16.vlgmr.msra.gmra.mxu3 %v2300_v21  ;;  %v2846_v21 = vperm.slane %v2844_v16, 0 }
 0x362   : > { %v2536_v22 = vpop.f32.mrf.mxu0  ;;  %v2549_v23 = vpop.f32.mrf.mxu1 }
 0x363   : > { %v2550_v31 = vadd.f32 %v2549_v23, %v2536_v22  ;;  %v2847_v22 = vperm.slane %v2844_v16, 1 }
 0x369   : > { %v2562_v24 = vpop.f32.mrf.mxu2  ;;  %v2575_v32 = vpop.f32.mrf.mxu3 }
 0x36a   : > { %v2538_v26 = vpop.f32.mrf.mxu0  ;;  %v2551_v27 = vpop.f32.mrf.mxu1  ;;  %v2576_v34 = vadd.f32 %v2575_v32, %v2562_v24 }
 0x371   : > { %v2564_v28 = vpop.f32.mrf.mxu2  ;;  %v2577_v29 = vpop.f32.mrf.mxu3 }
 0x372   : > { %v2748_v8 = vpop.f32.mrf.mxu0  ;;  %v2761_v35 = vpop.f32.mrf.mxu1  ;;  %v5190_v28 = vld [vmem:[#allocation23 + $0x70] sm:$0xf]  ;;  %v5887_v29 = vld [vmem:[#allocation23 + $0x74] sm:$0xf0] }
 0x373   : > { %v2749_v15 = vadd.f32 %v2748_v8, %v2550_v31  ;;  %v5254_v8 = vld [vmem:[#allocation23 + $0xf0] sm:$0xf]  ;;  %v5903_v31 = vld [vmem:[#allocation23 + $0xf4] sm:$0xf0] }
 0x375   : > { %v2762_v38 = vadd.f32 %v2761_v35, %v2749_v15  ;;  %v5191_v35 = vor.u32 %v5887_v29, %v5190_v28  ;;  %v5886_v15 = vld [vmem:[#allocation23 + $0x74] sm:$0xf]  ;;  %v5150_v29 = vld [vmem:[#allocation23 + $0x20] sm:$0xf] }
 0x377   : > { %v2797_v50 = vadd.f32 %v2793_v43, %v2762_v38  ;;  %v5256_v38 = vld [vmem:[#allocation23 + $0xf8] sm:$0xf0]  ;;  %3083 = vmatpush.bf16.msrb.mxu0 %v5191_v35  ;;  %v5246_v43 = vld [vmem:[#allocation23 + $0xe0] sm:$0xf] }
 0x378   : > { %v5214_v35 = vld [vmem:[#allocation23 + $0xa0] sm:$0xf] }
 0x379   : > { %v2774_v36 = vpop.f32.mrf.mxu2  ;;  %v2787_v37 = vpop.f32.mrf.mxu3 }
 0x37a   : > { %v2775_v39 = vadd.f32 %v2774_v36, %v2576_v34  ;;  %v2750_v40 = vpop.f32.mrf.mxu0  ;;  %v2763_v41 = vpop.f32.mrf.mxu1  ;;  %v5255_v34 = vor.u32 %v5903_v31, %v5254_v8  ;;  %v5195_v36 = vor.u32 %v5886_v15, %v5192_v33  ;;  %v5877_v8 = vld [vmem:[#allocation23 + $0x24] sm:$0xf0]  ;;  %v5876_v33 = vld [vmem:[#allocation23 + $0x24] sm:$0xf] }
 0x37b   : > { %v5182_v40 = vld [vmem:[#allocation23 + $0x60] sm:$0xf]  ;;  %v5885_v41 = vld [vmem:[#allocation23 + $0x64] sm:$0xf0]  ;;  %v5151_v31 = vor.u32 %v5877_v8, %v5150_v29 }
 0x37c   : > { %v2788_v49 = vadd.f32 %v2787_v37, %v2775_v39  ;;  %v5902_v37 = vld [vmem:[#allocation23 + $0xf4] sm:$0xf]  ;;  %3096 = vmatpush.bf16.msrb.mxu1 %v5255_v34  ;;  %3109 = vmatpush.bf16.msrb.mxu2 %v5195_v36  ;;  %v5893_v15 = vld [vmem:[#allocation23 + $0xa4] sm:$0xf0]  ;;  %v5152_v34 = vld [vmem:[#allocation23 + $0x28] sm:$0xf0] }
 0x37d   : > { %v5259_v39 = vor.u32 %v5902_v37, %v5256_v38  ;;  %v5215_v36 = vor.u32 %v5893_v15, %v5214_v35  ;;  %v5155_v37 = vor.u32 %v5876_v33, %v5152_v34  ;;  %v5892_v38 = vld [vmem:[#allocation23 + $0xa4] sm:$0xf] }
 0x37e   : > { %v2798_v53 = vadd.f32 %v2794_v44, %v2788_v49  ;;  %v5183_v44 = vor.u32 %v5885_v41, %v5182_v40  ;;  %v5901_v49 = vld [vmem:[#allocation23 + $0xe4] sm:$0xf0]  ;;  %v5142_v40 = vld [vmem:[#allocation23 + $0x10] sm:$0xf]  ;;  %v2855_v41 = vstv %s7300_s16 }
 0x37f   : > { %3122 = vmatpush.bf16.msrb.mxu3 %v5259_v39  ;;  %v5216_v39 = vld [vmem:[#allocation23 + $0xa8] sm:$0xf0] }
 0x380   : > { %v2801_v54 = vadd.f32 %v2798_v53, %v2797_v50  ;;  %3084 = vmatpush.bf16.msrb.mxu0 %v5183_v44  ;;  %v5875_v44 = vld [vmem:[#allocation23 + $0x14] sm:$0xf0] }
 0x381   : > { %v2776_v55 = vpop.f32.mrf.mxu2  ;;  %v2789_v56 = vpop.f32.mrf.mxu3 }
 0x382   : > { %2802 = vadd.xlane.f32.xlu2 %v2801_v54  ;;  %v5247_v54 = vor.u32 %v5901_v49, %v5246_v43  ;;  %v5900_v56 = vld [vmem:[#allocation23 + $0xe4] sm:$0xf]  ;;  %v5219_v43 = vor.u32 %v5892_v38, %v5216_v39  ;;  %v5206_v49 = vld [vmem:[#allocation23 + $0x90] sm:$0xf] }
 0x384   : > { %3097 = vmatpush.bf16.msrb.mxu1 %v5247_v54 }
 0x3f5   : > { %v2803_v57 = vpop.xlane.xlu2 %2802 }
 0x3f6   : > { %v2804_v9 = vmul.f32 %v2803_v57, %v7241_v47  ;;  %v5248_v57 = vld [vmem:[#allocation23 + $0xe8] sm:$0xf0] }
 0x3f8   : > { %v2805_v60 = vsub.f32 %v2797_v50, %v2804_v9  ;;  %v2806_v25 = vsub.f32 %v2798_v53, %v2804_v9  ;;  %v5884_v50 = vld [vmem:[#allocation23 + $0x64] sm:$0xf]  ;;  %v5184_v53 = vld [vmem:[#allocation23 + $0x68] sm:$0xf0]  ;;  %v5251_v9 = vor.u32 %v5900_v56, %v5248_v57  ;;  %v5144_v56 = vld [vmem:[#allocation23 + $0x18] sm:$0xf0] }
 0x3f9   : > { %v5187_v55 = vor.u32 %v5884_v50, %v5184_v53  ;;  %v5891_v50 = vld [vmem:[#allocation23 + $0x94] sm:$0xf0]  ;;  %v5143_v53 = vor.u32 %v5875_v44, %v5142_v40  ;;  %v5890_v57 = vld [vmem:[#allocation23 + $0x94] sm:$0xf] }
 0x3fa   : > { %v2807_v61 = vmul.f32 %v2805_v60, %v2805_v60  ;;  %v2808_v62 = vmul.f32 %v2806_v25, %v2806_v25  ;;  %3123 = vmatpush.bf16.msrb.mxu3 %v5251_v9  ;;  %v5207_v54 = vor.u32 %v5891_v50, %v5206_v49  ;;  %v5430_v49 = vld [vmem:[#allocation26 + $0x150] sm:$0xf]  ;;  %v5949_v50 = vld [vmem:[#allocation26 + $0x164] sm:$0xf0] }
 0x3fb   : > { %3110 = vmatpush.bf16.msrb.mxu2 %v5187_v55  ;;  %v5874_v55 = vld [vmem:[#allocation23 + $0x14] sm:$0xf] }
 0x3fc   : > { %v2809_v63 = vadd.f32 %v2808_v62, %v2807_v61  ;;  %v5238_v61 = vld [vmem:[#allocation23 + $0xd0] sm:$0xf] }
 0x3fe   : > { %2810 = vadd.xlane.f32.xlu2 %v2809_v63  ;;  %v5899_v63 = vld [vmem:[#allocation23 + $0xd4] sm:$0xf0] }
 0x471   : > { %v2811_v0 = vpop.xlane.xlu2 %2810 }
 0x472   : > { %v2812_v2 = vmul.f32 %v2811_v0, %v7241_v47  ;;  %v5882_v0 = vld [vmem:[#allocation23 + $0x54] sm:$0xf] }
 0x474   : > { %v2813_v3 = vadd.f32 1e-05, %v2812_v2  ;;  %v5176_v2 = vld [vmem:[#allocation23 + $0x58] sm:$0xf0] }
 0x476   : > { %6207 = vrsqrt.f32 %v2813_v3  ;;  %vm2820_vm8 = vweird.f32 %v2813_v3 }
 0x47c   : > { %v6208_v13 = vpop.eup %6207 }
 0x47d   : > { %v2815_v4 = vmul.f32 %v6208_v13, %v2813_v3  ;;  %vm2821_vm7 = vweird.f32 %v6208_v13  ;;  %v5239_v3 = vor.u32 %v5899_v63, %v5238_v61  ;;  %v5134_v61 = vld [vmem:[#allocation23] sm:$0xf] }
 0x47e   : > { %vm2822_vm9 = vmor %vm2820_vm8, %vm2821_vm7 }
 0x47f   : > { %v2816_v1 = vmul.f32 %v6208_v13, %v2815_v4  ;;  %v5898_v4 = vld [vmem:[#allocation23 + $0xd4] sm:$0xf]  ;;  %3098 = vmatpush.bf16.msrb.mxu1 %v5239_v3  ;;  %v5889_v3 = vld [vmem:[#allocation23 + $0x84] sm:$0xf0] }
 0x481   : > { %v2817_v5 = vmul.f32 0.5, %v2816_v1  ;;  %v5240_v1 = vld [vmem:[#allocation23 + $0xd8] sm:$0xf0] }
 0x483   : > { %v2818_v30 = vsub.f32 1.5, %v2817_v5  ;;  %v5243_v5 = vor.u32 %v5898_v4, %v5240_v1  ;;  %v5136_v1 = vld [vmem:[#allocation23 + $0x8] sm:$0xf0] }
 0x485   : > { %v2819_v45 = vmul.f32 %v6208_v13, %v2818_v30  ;;  %v5166_v30 = vld [vmem:[#allocation23 + $0x40] sm:$0xf]  ;;  %3124 = vmatpush.bf16.msrb.mxu3 %v5243_v5  ;;  %v5888_v5 = vld [vmem:[#allocation23 + $0x84] sm:$0xf] }
 0x486   : > { %v5167_v52 = vor.u32 %v5881_v51, %v5166_v30  ;;  %v5200_v30 = vld [vmem:[#allocation23 + $0x88] sm:$0xf0] }
 0x487   : > { %v2823_v11 = vsel %vm2822_vm9, %v6208_v13, %v2819_v45  ;;  %v5179_v13 = vor.u32 %v5882_v0, %v5176_v2  ;;  %v5230_v45 = vld [vmem:[#allocation23 + $0xc0] sm:$0xf] }
 0x488   : > { %v2824_v42 = vmul.f32 %v2823_v11, %v2805_v60  ;;  %v2825_v12 = vmul.f32 %v2823_v11, %v2806_v25  ;;  %v5174_v60 = vld [vmem:[#allocation23 + $0x50] sm:$0xf]  ;;  %v5883_v25 = vld [vmem:[#allocation23 + $0x54] sm:$0xf0]  ;;  %v5168_v11 = vld [vmem:[#allocation23 + $0x48] sm:$0xf0] }
 0x489   : > { %v5175_v62 = vor.u32 %v5883_v25, %v5174_v60  ;;  %3111 = vmatpush.bf16.msrb.mxu2 %v5179_v13  ;;  %v5147_v60 = vor.u32 %v5874_v55, %v5144_v56  ;;  %v5208_v25 = vld [vmem:[#allocation23 + $0x98] sm:$0xf0]  ;;  %v5198_v2 = vld [vmem:[#allocation23 + $0x80] sm:$0xf]  ;;  %v5872_v13 = vld [vmem:[#allocation23 + $0x4] sm:$0xf] }
 0x48a   : > { %v2831_v58 = vmul.f32 %v2827_v10, %v2824_v42  ;;  %v2832_v17 = vmul.f32 %v2828_v48, %v2825_v12  ;;  %v5897_v10 = vld [vmem:[#allocation23 + $0xc4] sm:$0xf0]  ;;  %v5880_v48 = vld [vmem:[#allocation23 + $0x44] sm:$0xf]  ;;  %v5211_v0 = vor.u32 %v5890_v57, %v5208_v25  ;;  %v5946_v56 = vld [vmem:[#allocation26 + $0x154] sm:$0xf] }
 0x48b   : > { %3085 = vmatpush.bf16.msrb.mxu0 %v5175_v62  ;;  %v5231_v42 = vor.u32 %v5897_v10, %v5230_v45  ;;  %v5171_v12 = vor.u32 %v5880_v48, %v5168_v11  ;;  %v5873_v62 = vld [vmem:[#allocation23 + $0x4] sm:$0xf0]  ;;  %v5199_v45 = vor.u32 %v5889_v3, %v5198_v2  ;;  %v5203_v10 = vor.u32 %v5888_v5, %v5200_v30  ;;  %v5432_v57 = vld [vmem:[#allocation26 + $0x168] sm:$0xf0]  ;;  %v5994_v25 = vld [vmem:[#allocation26 + $0x2d4] sm:$0xf] }
 0x48c   : > { %v2838_v59 = vadd.f32 %v2834_v46, %v2831_v58  ;;  %v2839_v20 = vadd.f32 %v2835_v14, %v2832_v17  ;;  %v5896_v46 = vld [vmem:[#allocation23 + $0xc4] sm:$0xf]  ;;  %v5232_v14 = vld [vmem:[#allocation23 + $0xc8] sm:$0xf0]  ;;  %v5158_v58 = vld [vmem:[#allocation23 + $0x30] sm:$0xf]  ;;  %v5135_v4 = vor.u32 %v5873_v62, %v5134_v61 }
 0x48d   : > { %v5235_v16 = vor.u32 %v5896_v46, %v5232_v14  ;;  %3099 = vmatpush.bf16.msrb.mxu1 %v5231_v42  ;;  %3112 = vmatpush.bf16.msrb.mxu2 %v5171_v12  ;;  %v5879_v17 = vld [vmem:[#allocation23 + $0x34] sm:$0xf0]  ;;  %v5997_v55 = vld [vmem:[#allocation26 + $0x2e4] sm:$0xf0]  ;;  %v5624_v61 = vld [vmem:[#allocation26 + $0x2e8] sm:$0xf0] }
 0x48e   : > { %v2840_v23 = vmax.f32 %v2838_v59, 0.0  ;;  %v2841_v24 = vmax.f32 %v2839_v20, 0.0  ;;  %v5222_v59 = vld [vmem:[#allocation23 + $0xb0] sm:$0xf]  ;;  %v5159_v20 = vor.u32 %v5879_v17, %v5158_v58  ;;  %v5406_v62 = vld [vmem:[#allocation26 + $0x120] sm:$0xf] }
 0x48f   : > { %3086 = vmatpush.bf16.msrb.mxu0 %v5167_v52  ;;  %3125 = vmatpush.bf16.msrb.mxu3 %v5235_v16  ;;  %v5139_v52 = vor.u32 %v5872_v13, %v5136_v1  ;;  %v5598_v2 = vld [vmem:[#allocation26 + $0x2a0] sm:$0xf]  ;;  %v5991_v3 = vld [vmem:[#allocation26 + $0x2b4] sm:$0xf0]  ;;  %v5940_v1 = vld [vmem:[#allocation26 + $0x124] sm:$0xf] }
 0x490   : > { %v2850_v32 = vmul.f32 %v2846_v21, %v2840_v23  ;;  %v2851_v26 = vmul.f32 %v2847_v22, %v2841_v24  ;;  %v5895_v21 = vld [vmem:[#allocation23 + $0xb4] sm:$0xf0]  ;;  %v5878_v22 = vld [vmem:[#allocation23 + $0x34] sm:$0xf]  ;;  %v5160_v23 = vld [vmem:[#allocation23 + $0x38] sm:$0xf0] }
 0x491   : > { %v5223_v24 = vor.u32 %v5895_v21, %v5222_v59  ;;  %v5408_v5 = vld [vmem:[#allocation26 + $0x138] sm:$0xf0]  ;;  %v5988_v30 = vld [vmem:[#allocation26 + $0x2a4] sm:$0xf] }
 0x492   : > { %v2852_v27 = vadd.f32 %v2851_v26, %v2850_v32  ;;  %v5163_v32 = vor.u32 %v5878_v22, %v5160_v23  ;;  %v5894_v26 = vld [vmem:[#allocation23 + $0xb4] sm:$0xf] }
 0x493   : > { %3087 = vmatpush.bf16.msrb.mxu0 %v5159_v20  ;;  %3100 = vmatpush.bf16.msrb.mxu1 %v5223_v24 }
 0x494   : > { %2853 = vadd.xlane.f32.xlu0 %v2852_v27  ;;  %v5224_v27 = vld [vmem:[#allocation23 + $0xb8] sm:$0xf0]  ;;  %3113 = vmatpush.bf16.msrb.mxu2 %v5163_v32 }
 0x495   : > { %v5227_v28 = vor.u32 %v5894_v26, %v5224_v27 }
 0x497   : > { %3126 = vmatpush.bf16.msrb.mxu3 %v5227_v28  ;;  %3088 = vmatpush.bf16.msrb.mxu0 %v5151_v31  ;;  %v2917_v31 = vld [vmem:[%s7504_s9] sm:$0x3]  ;;  %s3969_s9 = sshll.u32 %s3965_s26, 4  ;;  %s3970_s9 = int_to_ptr.hbm [resolvable:$true] %s3969_s9 }
 0x498   : > { %3101 = vmatpush.bf16.msrb.mxu1 %v5215_v36  ;;  %3114 = vmatpush.bf16.msrb.mxu2 %v5155_v37  ;;  %v2919_v33 = vperm.slane %v2917_v31, 0  ;;  %s6700_s0 = sshra.s32 %s3970_s9, 4  ;;  %s6701_s0 = int_to_ptr.hbm [resolvable:$true] %s6700_s0 }
 0x499   : > { %p6707_p7 = scmp.lt.s32.totalorder %s6701_s0, %s7507_s11 }
 0x49b   : > { %3127 = vmatpush.bf16.msrb.mxu3 %v5219_v43  ;;  %3089 = vmatpush.bf16.msrb.mxu0 %v5143_v53  ;;  %v5622_v53 = vld [vmem:[#allocation26 + $0x2d0] sm:$0xf] }
 0x49c   : > { %3102 = vmatpush.bf16.msrb.mxu1 %v5207_v54  ;;  %3115 = vmatpush.bf16.msrb.mxu2 %v5147_v60  ;;  %v5431_v54 = vor.u32 %v5949_v50, %v5430_v49  ;;  %v5435_v60 = vor.u32 %v5946_v56, %v5432_v57  ;;  %v5502_v49 = vld [vmem:[#allocation26 + $0x1e0] sm:$0xf]  ;;  %v5964_v56 = vld [vmem:[#allocation26 + $0x1e4] sm:$0xf]  ;;  %v5504_v57 = vld [vmem:[#allocation26 + $0x1f8] sm:$0xf0] }
 0x49f   : > { %3128 = vmatpush.bf16.msrb.mxu3 %v5211_v0  ;;  %3090 = vmatpush.bf16.msrb.mxu0 %v5135_v4  ;;  %v5943_v0 = vld [vmem:[#allocation26 + $0x134] sm:$0xf0]  ;;  %v5599_v4 = vor.u32 %v5991_v3, %v5598_v2  ;;  %v5961_v2 = vld [vmem:[#allocation26 + $0x1c4] sm:$0xf0]  ;;  %v5910_v3 = vld [vmem:[#allocation26 + $0x34] sm:$0xf] }
 0x4a0   : > { %3103 = vmatpush.bf16.msrb.mxu1 %v5199_v45  ;;  %3116 = vmatpush.bf16.msrb.mxu2 %v5139_v52  ;;  %v5407_v13 = vor.u32 %v5943_v0, %v5406_v62  ;;  %v5600_v45 = vld [vmem:[#allocation26 + $0x2b8] sm:$0xf0]  ;;  %v5382_v52 = vld [vmem:[#allocation26 + $0xf0] sm:$0xf]  ;;  %v5913_v62 = vld [vmem:[#allocation26 + $0x44] sm:$0xf0]  ;;  %v5507_v0 = vor.u32 %v5964_v56, %v5504_v57 }
 0x4a1   : > { %v5582_v56 = vld [vmem:[#allocation26 + $0x278] sm:$0xf] }
 0x4a3   : > { %3129 = vmatpush.bf16.msrb.mxu3 %v5203_v10  ;;  %3770 = vmatpush.bf16.msra.mxu0 %v5431_v54  ;;  %v5937_v10 = vld [vmem:[#allocation26 + $0x104] sm:$0xf0]  ;;  %v5916_v54 = vld [vmem:[#allocation26 + $0x64] sm:$0xf] }
 0x4a4   : > { %3796 = vmatpush.bf16.msra.mxu2 %v5435_v60 }
 0x4a7   : > { %3771 = vmatpush.bf16.msra.mxu0 %v5407_v13  ;;  %v5288_v13 = vld [vmem:[#allocation26 + $0x48] sm:$0xf0] }
 0x507   : > { %v2854_v9 = vpop.xlane.xlu0 %2853 }
 0x508   : > { %v2856_v63 = vadd.f32 %v2855_v41, %v2854_v9  ;;  %v5623_v9 = vor.u32 %v5997_v55, %v5622_v53  ;;  %v5967_v53 = vld [vmem:[#allocation26 + $0x1f4] sm:$0xf0]  ;;  %v5312_v55 = vld [vmem:[#allocation26 + $0x78] sm:$0xf0] }
 0x509   : > { %v5503_v60 = vor.u32 %v5967_v53, %v5502_v49  ;;  %v5608_v49 = vld [vmem:[#allocation26 + $0x2c0] sm:$0xf0] }
 0x50a   : > { %v2857_v51 = vsub.f32 0.0, %v2856_v63  ;;  %v5627_v63 = vor.u32 %v5994_v25, %v5624_v61  ;;  %3783 = vmatpush.bf16.msra.mxu1 %v5623_v9  ;;  %v5315_v25 = vor.u32 %v5916_v54, %v5312_v55  ;;  %v5286_v61 = vld [vmem:[#allocation26 + $0x30] sm:$0xf]  ;;  %v5390_v54 = vld [vmem:[#allocation26 + $0xf8] sm:$0xf] }
 0x50b   : > { %v5938_v55 = vld [vmem:[#allocation26 + $0x10c] sm:$0xf0] }
 0x50c   : > { %v2858_v48 = vmul.f32 1.442695, %v2857_v51  ;;  %3809 = vmatpush.bf16.msra.mxu3 %v5627_v63  ;;  %v5411_v51 = vor.u32 %v5940_v1, %v5408_v5  ;;  %v5478_v63 = vld [vmem:[#allocation26 + $0x1b0] sm:$0xf]  ;;  %v5480_v1 = vld [vmem:[#allocation26 + $0x1c8] sm:$0xf0]  ;;  %v5391_v57 = vor.u32 %v5938_v55, %v5390_v54 }
 0x50d   : > { %v5908_v54 = vld [vmem:[#allocation26 + $0x1c] sm:$0xf0]  ;;  %v5462_v55 = vld [vmem:[#allocation26 + $0x188] sm:$0xf] }
 0x50e   : > { %6209 = vpow2.f32 %v2858_v48  ;;  %v5603_v48 = vor.u32 %v5988_v30, %v5600_v45  ;;  %3784 = vmatpush.bf16.msra.mxu1 %v5599_v4  ;;  %3797 = vmatpush.bf16.msra.mxu2 %v5411_v51  ;;  %v5958_v4 = vld [vmem:[#allocation26 + $0x1b4] sm:$0xf]  ;;  %v5287_v30 = vor.u32 %v5913_v62, %v5286_v61  ;;  %v5479_v45 = vor.u32 %v5961_v2, %v5478_v63  ;;  %v5983_v63 = vld [vmem:[#allocation26 + $0x27c] sm:$0xf] }
 0x510   : > { %3810 = vmatpush.bf16.msra.mxu3 %v5603_v48 }
 0x514   : > { %v6210_v11 = vpop.eup %6209 }
 0x515   : > { %v2860_v42 = vadd.f32 1.0, %v6210_v11  ;;  %v5574_v11 = vld [vmem:[#allocation26 + $0x270] sm:$0xf] }
 0x517   : > { %6211 = vrcp.f32 %v2860_v42  ;;  %v2872_v16 = vand.u32 2147483648, %v2860_v42  ;;  %v2870_v17 = vand.u32 2147483647, %v2860_v42  ;;  %vm2866_vm11 = vweird.f32 %v2860_v42 }
 0x519   : > { %v2873_v20 = vor.u32 1.1754944e-38, %v2872_v16  ;;  %vm2871_vm13 = vcmp.eq.f32.partialorder %v2870_v17, 8.507059e+37  ;;  %v5982_v16 = vld [vmem:[#allocation26 + $0x274] sm:$0xf] }
 0x51d   : > { %v6212_v12 = vpop.eup %6211 }
 0x51e   : > { %v2862_v46 = vmul.f32 %v6212_v12, %v2860_v42  ;;  %vm2867_vm10 = vweird.f32 %v6212_v12  ;;  %v5985_v42 = vld [vmem:[#allocation26 + $0x284] sm:$0xf0] }
 0x51f   : > { %vm2868_vm12 = vmor %vm2866_vm11, %vm2867_vm10  ;;  %v5575_v17 = vor.u32 %v5985_v42, %v5574_v11 }
 0x520   : > { %v2863_v14 = vsub.f32 1.0, %v2862_v46  ;;  %v5383_v46 = vor.u32 %v5937_v10, %v5382_v52  ;;  %v5291_v52 = vor.u32 %v5910_v3, %v5288_v13  ;;  %v5483_v10 = vor.u32 %v5958_v4, %v5480_v1  ;;  %v5366_v3 = vld [vmem:[#allocation26 + $0xc8] sm:$0xf]  ;;  %v5932_v13 = vld [vmem:[#allocation26 + $0xdc] sm:$0xf0] }
 0x521   : > { %3785 = vmatpush.bf16.msra.mxu1 %v5575_v17  ;;  %v5955_v17 = vld [vmem:[#allocation26 + $0x194] sm:$0xf0]  ;;  %v5558_v4 = vld [vmem:[#allocation26 + $0x248] sm:$0xf]  ;;  %v5367_v1 = vor.u32 %v5932_v13, %v5366_v3 }
 0x522   : > { %v2864_v58 = vmul.f32 %v6212_v12, %v2863_v14  ;;  %v5384_v14 = vld [vmem:[#allocation26 + $0x108] sm:$0xf0]  ;;  %3772 = vmatpush.bf16.msra.mxu0 %v5383_v46 }
 0x524   : > { %v2865_v59 = vadd.f32 %v6212_v12, %v2864_v58  ;;  %v5576_v58 = vld [vmem:[#allocation26 + $0x288] sm:$0xf0] }
 0x526   : > { %v2869_v21 = vsel %vm2868_vm12, %v6212_v12, %v2865_v59  ;;  %v5934_v12 = vld [vmem:[#allocation26 + $0xf4] sm:$0xf] }
 0x527   : > { %v2874_v22 = vsel %vm2871_vm13, %v2873_v20, %v2869_v21  ;;  %v5387_v59 = vor.u32 %v5934_v12, %v5384_v14  ;;  %v5358_v20 = vld [vmem:[#allocation26 + $0xc0] sm:$0xf]  ;;  %v5931_v21 = vld [vmem:[#allocation26 + $0xd4] sm:$0xf0] }
 0x528   : > { %v2876_v23 = vsub.f32 1.0, %v2874_v22  ;;  %v2877_v24 = vmul.f32 %v2874_v22, %v7287_v18  ;;  %v2878_v26 = vmul.f32 %v2874_v22, %v7289_v19  ;;  %v5550_v22 = vld [vmem:[#allocation26 + $0x240] sm:$0xf] }
 0x529   : > { %3798 = vmatpush.bf16.msra.mxu2 %v5387_v59  ;;  %v5262_v14 = vld [vmem:[#allocation26] sm:$0xf]  ;;  %v5904_v59 = vld [vmem:[#allocation26 + $0x4] sm:$0xf] }
 0x52a   : > { %v2879_v32 = vmul.f32 %v2876_v23, %v7274_v6  ;;  %v2880_v27 = vmul.f32 %v2876_v23, %v7276_v7  ;;  %v2920_v6 = vperm.slane %v2917_v31, 1  ;;  %v5579_v23 = vor.u32 %v5982_v16, %v5576_v58  ;;  %v5334_v31 = vld [vmem:[#allocation26 + $0x90] sm:$0xf]  ;;  %v5907_v16 = vld [vmem:[#allocation26 + $0x14] sm:$0xf0] }
 0x52b   : > { %v5454_v58 = vld [vmem:[#allocation26 + $0x180] sm:$0xf] }
 0x52c   : > { %v2881_v28 = vadd.f32 %v2879_v32, %v2877_v24  ;;  %v2882_v29 = vadd.f32 %v2880_v27, %v2878_v26  ;;  %v5979_v24 = vld [vmem:[#allocation26 + $0x254] sm:$0xf0]  ;;  %v5928_v32 = vld [vmem:[#allocation26 + $0xc4] sm:$0xf]  ;;  %v5360_v26 = vld [vmem:[#allocation26 + $0xd8] sm:$0xf0]  ;;  %3811 = vmatpush.bf16.msra.mxu3 %v5579_v23 }
 0x52d   : > { %v5976_v27 = vld [vmem:[#allocation26 + $0x244] sm:$0xf]  ;;  %v5456_v23 = vld [vmem:[#allocation26 + $0x198] sm:$0xf0] }
 0x52e   : > { %v2883_v8 = vpack.c.bf16 %v2881_v28, %v2881_v28  ;;  %v2884_v35 = vpack.c.bf16 %v2882_v29, %v2882_v29  ;;  %v5552_v28 = vld [vmem:[#allocation26 + $0x258] sm:$0xf0]  ;;  %v5359_v29 = vor.u32 %v5931_v21, %v5358_v20  ;;  %v5455_v20 = vor.u32 %v5955_v17, %v5454_v58 }
 0x52f   : > { %v5923_v17 = vld [vmem:[#allocation26 + $0x9c] sm:$0xf] }
 0x530   : > { %3091 = vmatmul.bf16.vlgmr.msrb.gmra.mxu0 %v2883_v8  ;;  %3104 = vmatmul.bf16.vlgmr.msrb.gmra.mxu1 %v2884_v35 }
 0x531   : > { %3117 = vmatmul.bf16.vlgmr.msrb.gmra.mxu2 %v2883_v8  ;;  %3130 = vmatmul.bf16.vlgmr.msrb.gmra.mxu3 %v2884_v35  ;;  %v5551_v8 = vor.u32 %v5979_v24, %v5550_v22  ;;  %v5363_v35 = vor.u32 %v5928_v32, %v5360_v26  ;;  %v5952_v22 = vld [vmem:[#allocation26 + $0x184] sm:$0xf]  ;;  %v5438_v24 = vld [vmem:[#allocation26 + $0x158] sm:$0xf]  ;;  %v5950_v26 = vld [vmem:[#allocation26 + $0x16c] sm:$0xf0] }
 0x532   : > { %3773 = vmatpush.bf16.msra.mxu0 %v5359_v29  ;;  %v5459_v32 = vor.u32 %v5952_v22, %v5456_v23  ;;  %v5439_v29 = vor.u32 %v5950_v26, %v5438_v24  ;;  %v5536_v22 = vld [vmem:[#allocation26 + $0x230] sm:$0xf0]  ;;  %v5318_v24 = vld [vmem:[#allocation26 + $0x68] sm:$0xf] }
 0x533   : > { %3786 = vmatpush.bf16.msra.mxu1 %v5551_v8  ;;  %3799 = vmatpush.bf16.msra.mxu2 %v5363_v35  ;;  %v5947_v35 = vld [vmem:[#allocation26 + $0x15c] sm:$0xf]  ;;  %v5510_v26 = vld [vmem:[#allocation26 + $0x1e8] sm:$0xf] }
 0x5ad   : > { %v3092_v15 = vpop.f32.mrf.mxu0  ;;  %v3105_v18 = vpop.f32.mrf.mxu1 }
 0x5ae   : > { %v3093_v34 = vadd.f32 %v3092_v15, %v2919_v33  ;;  %v5925_v15 = vld [vmem:[#allocation26 + $0xa4] sm:$0xf0]  ;;  %v5555_v33 = vor.u32 %v5976_v27, %v5552_v28  ;;  %v5630_v27 = vld [vmem:[#allocation26 + $0x2d8] sm:$0xf]  ;;  %v5998_v28 = vld [vmem:[#allocation26 + $0x2ec] sm:$0xf0] }
 0x5af   : > { %v5631_v8 = vor.u32 %v5998_v28, %v5630_v27  ;;  %v5968_v28 = vld [vmem:[#allocation26 + $0x1fc] sm:$0xf0] }
 0x5b0   : > { %v7310_v39 = vadd.f32 %v3105_v18, %v3093_v34  ;;  %v5526_v18 = vld [vmem:[#allocation26 + $0x210] sm:$0xf]  ;;  %v5922_v34 = vld [vmem:[#allocation26 + $0x94] sm:$0xf]  ;;  %3812 = vmatpush.bf16.msra.mxu3 %v5555_v33 }
 0x5b1   : > { %v5632_v33 = vld [vmem:[#allocation26 + $0x2f0] sm:$0xf0] }
 0x5b4   : > { %v3118_v19 = vpop.f32.mrf.mxu2  ;;  %v3131_v36 = vpop.f32.mrf.mxu3 }
 0x5b5   : > { %v3119_v7 = vadd.f32 %v3118_v19, %v2920_v6  ;;  %v3094_v37 = vpop.f32.mrf.mxu0  ;;  %v3107_v38 = vpop.f32.mrf.mxu1  ;;  %v5973_v6 = vld [vmem:[#allocation26 + $0x224] sm:$0xf0]  ;;  %v5336_v19 = vld [vmem:[#allocation26 + $0xa8] sm:$0xf0] }
 0x5b6   : > { %v5335_v37 = vor.u32 %v5925_v15, %v5334_v31  ;;  %v5527_v38 = vor.u32 %v5973_v6, %v5526_v18  ;;  %v5440_v31 = vld [vmem:[#allocation26 + $0x170] sm:$0xf0]  ;;  %v5995_v15 = vld [vmem:[#allocation26 + $0x2dc] sm:$0xf]  ;;  %v5414_v6 = vld [vmem:[#allocation26 + $0x128] sm:$0xf] }
 0x5b7   : > { %v7312_v40 = vadd.f32 %v3131_v36, %v3119_v7  ;;  %v5970_v36 = vld [vmem:[#allocation26 + $0x214] sm:$0xf]  ;;  %v5528_v7 = vld [vmem:[#allocation26 + $0x228] sm:$0xf0]  ;;  %v5443_v18 = vor.u32 %v5947_v35, %v5440_v31  ;;  %v5511_v35 = vor.u32 %v5968_v28, %v5510_v26  ;;  %v5996_v28 = vld [vmem:[#allocation26 + $0x2e4] sm:$0xf] }
 0x5b8   : > { %v5531_v50 = vor.u32 %v5970_v36, %v5528_v7  ;;  %3774 = vmatpush.bf16.msra.mxu0 %v5335_v37  ;;  %3787 = vmatpush.bf16.msra.mxu1 %v5527_v38  ;;  %v5606_v7 = vld [vmem:[#allocation26 + $0x2a8] sm:$0xf]  ;;  %v5992_v37 = vld [vmem:[#allocation26 + $0x2bc] sm:$0xf0]  ;;  %v5941_v38 = vld [vmem:[#allocation26 + $0x12c] sm:$0xf] }
 0x5b9   : > { %v3137_v41 = vadd.f32 %v7312_v40, %v7310_v39 }
 0x5ba   : > { %3813 = vmatpush.bf16.msra.mxu3 %v5531_v50 }
 0x5bb   : > { %3138 = vadd.xlane.f32.xlu1 %v3137_v41  ;;  %v5339_v41 = vor.u32 %v5922_v34, %v5336_v19  ;;  %v5944_v34 = vld [vmem:[#allocation26 + $0x13c] sm:$0xf0]  ;;  %v5635_v19 = vor.u32 %v5995_v15, %v5632_v33  ;;  %v5965_v15 = vld [vmem:[#allocation26 + $0x1ec] sm:$0xf] }
 0x5bc   : > { %v3120_v43 = vpop.f32.mrf.mxu2  ;;  %v3133_v44 = vpop.f32.mrf.mxu3  ;;  %3788 = vmatpush.bf16.msra.mxu1 %v5503_v60  ;;  %v5415_v36 = vor.u32 %v5944_v34, %v5414_v6  ;;  %v5935_v60 = vld [vmem:[#allocation26 + $0xfc] sm:$0xf]  ;;  %v5294_v6 = vld [vmem:[#allocation26 + $0x38] sm:$0xf]  ;;  %v5914_v34 = vld [vmem:[#allocation26 + $0x4c] sm:$0xf0] }
 0x5bd   : > { %v5310_v43 = vld [vmem:[#allocation26 + $0x60] sm:$0xf]  ;;  %v5919_v44 = vld [vmem:[#allocation26 + $0x74] sm:$0xf0]  ;;  %3800 = vmatpush.bf16.msra.mxu2 %v5339_v41  ;;  %v5607_v41 = vor.u32 %v5992_v37, %v5606_v7  ;;  %v5962_v7 = vld [vmem:[#allocation26 + $0x1cc] sm:$0xf0] }
 0x5be   : > { %v5311_v9 = vor.u32 %v5919_v44, %v5310_v43  ;;  %3814 = vmatpush.bf16.msra.mxu3 %v5507_v0  ;;  %v5416_v43 = vld [vmem:[#allocation26 + $0x140] sm:$0xf0]  ;;  %v5989_v44 = vld [vmem:[#allocation26 + $0x2ac] sm:$0xf]  ;;  %v5584_v0 = vld [vmem:[#allocation26 + $0x290] sm:$0xf0] }
 0x5bf   : > { %v5419_v50 = vor.u32 %v5941_v38, %v5416_v43  ;;  %v5611_v53 = vor.u32 %v5989_v44, %v5608_v49  ;;  %v5587_v2 = vor.u32 %v5983_v63, %v5584_v0  ;;  %v5911_v37 = vld [vmem:[#allocation26 + $0x3c] sm:$0xf]  ;;  %v5296_v38 = vld [vmem:[#allocation26 + $0x50] sm:$0xf0]  ;;  %v5953_v0 = vld [vmem:[#allocation26 + $0x18c] sm:$0xf] }
 0x5c0   : > { %3775 = vmatpush.bf16.msra.mxu0 %v5311_v9  ;;  %3789 = vmatpush.bf16.msra.mxu1 %v5479_v45  ;;  %v5986_v9 = vld [vmem:[#allocation26 + $0x28c] sm:$0xf0]  ;;  %v5299_v43 = vor.u32 %v5911_v37, %v5296_v38  ;;  %v5959_v44 = vld [vmem:[#allocation26 + $0x1bc] sm:$0xf]  ;;  %v5488_v49 = vld [vmem:[#allocation26 + $0x1d0] sm:$0xf0] }
 0x5c1   : > { %3801 = vmatpush.bf16.msra.mxu2 %v5315_v25  ;;  %v5392_v25 = vld [vmem:[#allocation26 + $0x110] sm:$0xf0]  ;;  %v5583_v61 = vor.u32 %v5986_v9, %v5582_v56  ;;  %v5956_v9 = vld [vmem:[#allocation26 + $0x19c] sm:$0xf0]  ;;  %v5616_v37 = vld [vmem:[#allocation26 + $0x2c8] sm:$0xf0] }
 0x5c2   : > { %3815 = vmatpush.bf16.msra.mxu3 %v5483_v10  ;;  %v5395_v62 = vor.u32 %v5935_v60, %v5392_v25  ;;  %v5977_v10 = vld [vmem:[#allocation26 + $0x24c] sm:$0xf]  ;;  %v5272_v25 = vld [vmem:[#allocation26 + $0x20] sm:$0xf0] }
 0x5c3   : > { %v5905_v60 = vld [vmem:[#allocation26 + $0xc] sm:$0xf] }
 0x5c4   : > { %3776 = vmatpush.bf16.msra.mxu0 %v5287_v30  ;;  %3790 = vmatpush.bf16.msra.mxu1 %v5455_v20  ;;  %v5929_v30 = vld [vmem:[#allocation26 + $0xcc] sm:$0xf]  ;;  %v5275_v63 = vor.u32 %v5905_v60, %v5272_v25 }
 0x5c5   : > { %3802 = vmatpush.bf16.msra.mxu2 %v5291_v52 }
 0x5c6   : > { %3816 = vmatpush.bf16.msra.mxu3 %v5459_v32  ;;  %v5920_v32 = vld [vmem:[#allocation26 + $0x7c] sm:$0xf0] }
 0x5c7   : > { %v5319_v27 = vor.u32 %v5920_v32, %v5318_v24  ;;  %v5948_v24 = vld [vmem:[#allocation26 + $0x164] sm:$0xf]  ;;  %v5448_v32 = vld [vmem:[#allocation26 + $0x178] sm:$0xf0] }
 0x5c8   : > { %3835 = vmatpush.bf16.msrb.mxu1 %v5631_v8  ;;  %v5320_v8 = vld [vmem:[#allocation26 + $0x80] sm:$0xf0] }
 0x5ca   : > { %3861 = vmatpush.bf16.msrb.mxu3 %v5635_v19  ;;  %v5486_v19 = vld [vmem:[#allocation26 + $0x1b8] sm:$0xf] }
 0x5cc   : > { %3836 = vmatpush.bf16.msrb.mxu1 %v5607_v41  ;;  %v5487_v41 = vor.u32 %v5962_v7, %v5486_v19  ;;  %v5942_v19 = vld [vmem:[#allocation26 + $0x134] sm:$0xf] }
 0x5cd   : > { %v5990_v7 = vld [vmem:[#allocation26 + $0x2b4] sm:$0xf] }
 0x5ce   : > { %3862 = vmatpush.bf16.msrb.mxu3 %v5611_v53  ;;  %v5270_v53 = vld [vmem:[#allocation26 + $0x8] sm:$0xf] }
 0x5d0   : > { %3837 = vmatpush.bf16.msrb.mxu1 %v5583_v61 }
 0x5d2   : > { %3863 = vmatpush.bf16.msrb.mxu3 %v5587_v2  ;;  %v5464_v2 = vld [vmem:[#allocation26 + $0x1a0] sm:$0xf0] }
 0x5d3   : > { %v5467_v3 = vor.u32 %v5953_v0, %v5464_v2  ;;  %v5566_v2 = vld [vmem:[#allocation26 + $0x250] sm:$0xf] }
 0x62e   : > { %v3139_v5 = vpop.xlane.xlu1 %3138 }
 0x62f   : > { %v3140_v51 = vmul.f32 %v3139_v5, %v7241_v47  ;;  %v5980_v5 = vld [vmem:[#allocation26 + $0x25c] sm:$0xf0] }
 0x630   : > { %v5559_v45 = vor.u32 %v5980_v5, %v5558_v4 }
 0x631   : > { %v7318_v48 = vsub.f32 %v7310_v39, %v3140_v51  ;;  %v7321_v11 = vsub.f32 %v7312_v40, %v3140_v51  ;;  %v5263_v39 = vor.u32 %v5907_v16, %v5262_v14  ;;  %v5264_v40 = vld [vmem:[#allocation26 + $0x18] sm:$0xf0]  ;;  %v5368_v51 = vld [vmem:[#allocation26 + $0xe0] sm:$0xf0]  ;;  %v5926_v14 = vld [vmem:[#allocation26 + $0xac] sm:$0xf0] }
 0x632   : > { %v5267_v21 = vor.u32 %v5904_v59, %v5264_v40  ;;  %v5371_v52 = vor.u32 %v5929_v30, %v5368_v51  ;;  %v5534_v16 = vld [vmem:[#allocation26 + $0x218] sm:$0xf]  ;;  %3838 = vmatpush.bf16.msrb.mxu1 %v5559_v45  ;;  %v5344_v59 = vld [vmem:[#allocation26 + $0xb0] sm:$0xf0]  ;;  %v3136_v45 = vld [vmem:[#allocation24] sm:$0x3] }
 0x633   : > { %v3143_v42 = vmul.f32 %v7318_v48, %v7318_v48  ;;  %v3144_v12 = vmul.f32 %v7321_v11, %v7321_v11  ;;  %3777 = vmatpush.bf16.msra.mxu0 %v5263_v39  ;;  %v5974_v39 = vld [vmem:[#allocation26 + $0x22c] sm:$0xf0]  ;;  %v5347_v20 = vor.u32 %v5923_v17, %v5344_v59 }
 0x634   : > { %3803 = vmatpush.bf16.msra.mxu2 %v5267_v21  ;;  %v5535_v40 = vor.u32 %v5974_v39, %v5534_v16  ;;  %v5971_v21 = vld [vmem:[#allocation26 + $0x21c] sm:$0xf] }
 0x635   : > { %v3145_v46 = vadd.f32 %v3144_v12, %v3143_v42  ;;  %v5560_v42 = vld [vmem:[#allocation26 + $0x260] sm:$0xf0]  ;;  %v5539_v23 = vor.u32 %v5971_v21, %v5536_v22  ;;  %v5951_v21 = vld [vmem:[#allocation26 + $0x174] sm:$0xf0]  ;;  %v5638_v22 = vld [vmem:[#allocation26 + $0x2e0] sm:$0xf] }
 0x636   : > { %v5563_v12 = vor.u32 %v5977_v10, %v5560_v42  ;;  %3839 = vmatpush.bf16.msrb.mxu1 %v5535_v40 }
 0x637   : > { %3146 = vadd.xlane.f32.xlu2 %v3145_v46  ;;  %3822 = vmatpush.bf16.msrb.mxu0 %v5439_v29  ;;  %v5342_v46 = vld [vmem:[#allocation26 + $0x98] sm:$0xf]  ;;  %v5917_v29 = vld [vmem:[#allocation26 + $0x6c] sm:$0xf] }
 0x638   : > { %3848 = vmatpush.bf16.msrb.mxu2 %v5443_v18  ;;  %v5343_v58 = vor.u32 %v5926_v14, %v5342_v46  ;;  %3864 = vmatpush.bf16.msrb.mxu3 %v5563_v12  ;;  %v5323_v31 = vor.u32 %v5917_v29, %v5320_v8  ;;  %v5512_v18 = vld [vmem:[#allocation26 + $0x200] sm:$0xf0]  ;;  %v3170_v46 = vperm.slane %v3136_v45, 0  ;;  %v3171_v14 = vperm.slane %v3136_v45, 1  ;;  %v5640_v29 = vld [vmem:[#allocation26 + $0x2f8] sm:$0xf0] }
 0x639   : > { %v5515_v33 = vor.u32 %v5965_v15, %v5512_v18  ;;  %v5945_v15 = vld [vmem:[#allocation26 + $0x144] sm:$0xf0]  ;;  %v5451_v18 = vor.u32 %v5948_v24, %v5448_v32  ;;  %v5927_v45 = vld [vmem:[#allocation26 + $0xb4] sm:$0xf0]  ;;  %v5918_v24 = vld [vmem:[#allocation26 + $0x74] sm:$0xf] }
 0x63a   : > { %3840 = vmatpush.bf16.msrb.mxu1 %v5511_v35  ;;  %v5328_v32 = vld [vmem:[#allocation26 + $0x88] sm:$0xf0] }
 0x63b   : > { %3823 = vmatpush.bf16.msrb.mxu0 %v5415_v36  ;;  %v5295_v36 = vor.u32 %v5914_v34, %v5294_v6  ;;  %v5614_v6 = vld [vmem:[#allocation26 + $0x2b0] sm:$0xf]  ;;  %v5993_v34 = vld [vmem:[#allocation26 + $0x2c4] sm:$0xf0] }
 0x63c   : > { %3849 = vmatpush.bf16.msrb.mxu2 %v5419_v50  ;;  %3865 = vmatpush.bf16.msrb.mxu3 %v5539_v23  ;;  %v5491_v50 = vor.u32 %v5959_v44, %v5488_v49  ;;  %v5999_v23 = vld [vmem:[#allocation26 + $0x2f4] sm:$0xf0] }
 0x63d   : > { %v5939_v44 = vld [vmem:[#allocation26 + $0x114] sm:$0xf0] }
 0x63e   : > { %3841 = vmatpush.bf16.msrb.mxu1 %v5487_v41  ;;  %v5615_v41 = vor.u32 %v5993_v34, %v5614_v6  ;;  %v5912_v6 = vld [vmem:[#allocation26 + $0x44] sm:$0xf]  ;;  %v5304_v34 = vld [vmem:[#allocation26 + $0x58] sm:$0xf0] }
 0x63f   : > { %3824 = vmatpush.bf16.msrb.mxu0 %v5391_v57  ;;  %v5271_v57 = vor.u32 %v5908_v54, %v5270_v53  ;;  %v5590_v53 = vld [vmem:[#allocation26 + $0x280] sm:$0xf]  ;;  %v5987_v54 = vld [vmem:[#allocation26 + $0x294] sm:$0xf0] }
 0x640   : > { %3850 = vmatpush.bf16.msrb.mxu2 %v5395_v62  ;;  %3866 = vmatpush.bf16.msrb.mxu3 %v5515_v33  ;;  %v5463_v62 = vor.u32 %v5956_v9, %v5462_v55  ;;  %v5643_v33 = vor.u32 %v5996_v28, %v5640_v29  ;;  %v5936_v55 = vld [vmem:[#allocation26 + $0x104] sm:$0xf]  ;;  %v5592_v9 = vld [vmem:[#allocation26 + $0x298] sm:$0xf0]  ;;  %v5591_v25 = vor.u32 %v5987_v54, %v5590_v53  ;;  %v5906_v53 = vld [vmem:[#allocation26 + $0x14] sm:$0xf] }
 0x641   : > { %v5280_v54 = vld [vmem:[#allocation26 + $0x28] sm:$0xf0] }
 0x642   : > { %3842 = vmatpush.bf16.msrb.mxu1 %v5463_v62  ;;  %v5933_v62 = vld [vmem:[#allocation26 + $0xe4] sm:$0xf0] }
 0x643   : > { %3825 = vmatpush.bf16.msrb.mxu0 %v5367_v1 }
 0x644   : > { %3851 = vmatpush.bf16.msrb.mxu2 %v5371_v52  ;;  %3867 = vmatpush.bf16.msrb.mxu3 %v5491_v50  ;;  %v5619_v50 = vor.u32 %v5990_v7, %v5616_v37 }
 0x647   : > { %3826 = vmatpush.bf16.msrb.mxu0 %v5343_v58 }
 0x648   : > { %3852 = vmatpush.bf16.msrb.mxu2 %v5347_v20  ;;  %3868 = vmatpush.bf16.msrb.mxu3 %v5467_v3  ;;  %v5446_v20 = vld [vmem:[#allocation26 + $0x160] sm:$0xf]  ;;  %v5981_v3 = vld [vmem:[#allocation26 + $0x264] sm:$0xf0] }
 0x64b   : > { %3827 = vmatpush.bf16.msrb.mxu0 %v5319_v27 }
 0x64c   : > { %3853 = vmatpush.bf16.msrb.mxu2 %v5323_v31  ;;  %v5422_v31 = vld [vmem:[#allocation26 + $0x130] sm:$0xf] }
 0x64d   : > { %v5423_v38 = vor.u32 %v5945_v15, %v5422_v31  ;;  %v5331_v31 = vor.u32 %v5918_v24, %v5328_v32 }
 0x64f   : > { %3828 = vmatpush.bf16.msrb.mxu0 %v5295_v36  ;;  %v5424_v36 = vld [vmem:[#allocation26 + $0x148] sm:$0xf0] }
 0x650   : > { %3854 = vmatpush.bf16.msrb.mxu2 %v5299_v43  ;;  %v5398_v43 = vld [vmem:[#allocation26 + $0x100] sm:$0xf]  ;;  %v5427_v49 = vor.u32 %v5942_v19, %v5424_v36  ;;  %v5960_v19 = vld [vmem:[#allocation26 + $0x1c4] sm:$0xf]  ;;  %v5496_v36 = vld [vmem:[#allocation26 + $0x1d8] sm:$0xf0] }
 0x651   : > { %v5399_v60 = vor.u32 %v5939_v44, %v5398_v43  ;;  %v5307_v43 = vor.u32 %v5912_v6, %v5304_v34  ;;  %v5499_v44 = vor.u32 %v5960_v19, %v5496_v36 }
 0x653   : > { %3829 = vmatpush.bf16.msrb.mxu0 %v5271_v57  ;;  %v5984_v57 = vld [vmem:[#allocation26 + $0x284] sm:$0xf] }
 0x654   : > { %3855 = vmatpush.bf16.msrb.mxu2 %v5275_v63  ;;  %v5595_v0 = vor.u32 %v5984_v57, %v5592_v9 }
 0x6aa   : > { %v3147_v56 = vpop.xlane.xlu2 %3146 }
 0x6ab   : > { %v3148_v61 = vmul.f32 %v3147_v56, %v7241_v47  ;;  %v3135_v47 = vld [vmem:[%s7505_s1] sm:$0x3]  ;;  %v5400_v56 = vld [vmem:[#allocation26 + $0x118] sm:$0xf0]  ;;  %s6702_s1 = scalar_lea.hbm %s6701_s0, 48 }
 0x6ac   : > { %v3163_v10 = vperm.slane %v3135_v47, 0  ;;  %v3164_v42 = vperm.slane %v3135_v47, 1  ;;  %v5403_v63 = vor.u32 %v5936_v55, %v5400_v56  ;;  %v5567_v47 = vor.u32 %v5981_v3, %v5566_v2  ;;  %v5954_v55 = vld [vmem:[#allocation26 + $0x194] sm:$0xf]  ;;  %v5472_v56 = vld [vmem:[#allocation26 + $0x1a8] sm:$0xf0]  ;;  %p6703_p1 = scmp.ne.s32.totalorder %s6701_s0, %s6702_s1  ;;  %p6708_p9 = scmp.lt.s32.totalorder %s6706_s8, %s6702_s1 }
 0x6ad   : > { %v3149_v13 = vadd.f32 1e-05, %v3148_v61  ;;  %v5374_v61 = vld [vmem:[#allocation26 + $0xd0] sm:$0xf] }
 0x6ae   : > { %p6704_p3 = pnand %p6703_p1, %p7071_p4  ;;  %p6709_p5 = por %p6708_p9, %p6707_p7 }
 0x6af   : > { %6213 = vrsqrt.f32 %v3149_v13  ;;  %vm3156_vm15 = vweird.f32 %v3149_v13 }
 0x6b0   : > { %p6705_p12 = pneg %p6704_p3 }
 0x6b2   : > { %p6710_p8 = pnand %p6709_p5, %p6705_p12 }
 0x6b5   : > { %v6214_v4 = vpop.eup %6213 }
 0x6b6   : > { %v3151_v1 = vmul.f32 %v6214_v4, %v3149_v13  ;;  %vm3157_vm14 = vweird.f32 %v6214_v4  ;;  %v5930_v13 = vld [vmem:[#allocation26 + $0xd4] sm:$0xf] }
 0x6b7   : > { %vm3158_vm0 = vmor %vm3156_vm15, %vm3157_vm14 }
 0x6b8   : > { %v3152_v5 = vmul.f32 %v6214_v4, %v3151_v1  ;;  %v5978_v1 = vld [vmem:[#allocation26 + $0x254] sm:$0xf] }
 0x6ba   : > { %v3153_v30 = vmul.f32 0.5, %v3152_v5  ;;  %v5568_v5 = vld [vmem:[#allocation26 + $0x268] sm:$0xf0] }
 0x6bc   : > { %v3154_v51 = vsub.f32 1.5, %v3153_v30  ;;  %v5375_v30 = vor.u32 %v5933_v62, %v5374_v61  ;;  %v7352_v61 = vld [vmem:[%s7506_s22] sm:$0x3f] }
 0x6bd   : > { %v3278_v62 = vperm.slane %v7352_v61, 0  ;;  %v3281_v24 = vperm.slane %v7352_v61, 3  ;;  %v3282_v34 = vperm.slane %v7352_v61, 4 }
 0x6be   : > { %v3155_v52 = vmul.f32 %v6214_v4, %v3154_v51  ;;  %v5350_v51 = vld [vmem:[#allocation26 + $0xa0] sm:$0xf] }
 0x6c0   : > { %v3159_v12 = vsel %vm3158_vm0, %v6214_v4, %v3155_v52  ;;  %v5376_v4 = vld [vmem:[#allocation26 + $0xe8] sm:$0xf0] }
 0x6c1   : > { %v3160_v16 = vmul.f32 %v3159_v12, %v7318_v48  ;;  %v3161_v58 = vmul.f32 %v3159_v12, %v7321_v11  ;;  %v5447_v48 = vor.u32 %v5951_v21, %v5446_v20  ;;  %v5639_v11 = vor.u32 %v5999_v23, %v5638_v22  ;;  %v5975_v12 = vld [vmem:[#allocation26 + $0x234] sm:$0xf0]  ;;  %v5518_v22 = vld [vmem:[#allocation26 + $0x1f0] sm:$0xf]  ;;  %v5969_v23 = vld [vmem:[#allocation26 + $0x204] sm:$0xf0] }
 0x6c2   : > { %v5379_v52 = vor.u32 %v5930_v13, %v5376_v4  ;;  %v5519_v29 = vor.u32 %v5969_v23, %v5518_v22  ;;  %v7357_v13 = vstv %s2842_s2 }
 0x6c3   : > { %v3167_v39 = vmul.f32 %v3163_v10, %v3160_v16  ;;  %v3168_v17 = vmul.f32 %v3164_v42, %v3161_v58  ;;  %v5571_v10 = vor.u32 %v5978_v1, %v5568_v5  ;;  %v5542_v42 = vld [vmem:[#allocation26 + $0x220] sm:$0xf]  ;;  %v5972_v16 = vld [vmem:[#allocation26 + $0x224] sm:$0xf]  ;;  %v5544_v58 = vld [vmem:[#allocation26 + $0x238] sm:$0xf0] }
 0x6c4   : > { %v5547_v21 = vor.u32 %v5972_v16, %v5544_v58  ;;  %v3279_v1 = vperm.slane %v7352_v61, 1  ;;  %v3280_v16 = vperm.slane %v7352_v61, 2 }
 0x6c5   : > { %v3174_v59 = vadd.f32 %v3170_v46, %v3167_v39  ;;  %v3175_v40 = vadd.f32 %v3171_v14, %v3168_v17  ;;  %v5924_v46 = vld [vmem:[#allocation26 + $0xa4] sm:$0xf]  ;;  %v5352_v14 = vld [vmem:[#allocation26 + $0xb8] sm:$0xf0]  ;;  %v5351_v39 = vor.u32 %v5927_v45, %v5350_v51  ;;  %v5543_v17 = vor.u32 %v5975_v12, %v5542_v42 }
 0x6c6   : > { %v5355_v20 = vor.u32 %v5924_v46, %v5352_v14  ;;  %v6216_v42 = vld [vmem:[%s7130_s15 + $0x8] sm:$0xff] }
 0x6c7   : > { %v3176_v26 = vmax.f32 %v3174_v59, 0.0  ;;  %v3177_v27 = vmax.f32 %v3175_v40, 0.0  ;;  %v5326_v59 = vld [vmem:[#allocation26 + $0x70] sm:$0xf]  ;;  %v5921_v40 = vld [vmem:[#allocation26 + $0x84] sm:$0xf0] }
 0x6c8   : > { %v5327_v28 = vor.u32 %v5921_v40, %v5326_v59 }
 0x6c9   : > { %v7333_v8 = vpack.c.bf16 %v3176_v26, %v3176_v26  ;;  %v7335_v35 = vpack.c.bf16 %v3177_v27, %v3177_v27  ;;  %v5966_v26 = vld [vmem:[#allocation26 + $0x1f4] sm:$0xf]  ;;  %v5520_v27 = vld [vmem:[#allocation26 + $0x208] sm:$0xf0] }
 0x6ca   : > { %v5523_v15 = vor.u32 %v5966_v26, %v5520_v27 }
 0x6cb   : > { %3778 = vmatmul.bf16.vlgmr.msra.gmra.mxu0 %v7333_v8  ;;  %3791 = vmatmul.bf16.vlgmr.msra.gmra.mxu1 %v7335_v35 }
 0x6cc   : > { %3804 = vmatmul.bf16.vlgmr.msra.gmra.mxu2 %v7333_v8  ;;  %3817 = vmatmul.bf16.vlgmr.msra.gmra.mxu3 %v7335_v35 }
 0x6cd   : > { %3874 = vmatpush.bf16.msra.mxu0 %v5447_v48  ;;  %3887 = vmatpush.bf16.msra.mxu1 %v5639_v11  ;;  %v5302_v48 = vld [vmem:[#allocation26 + $0x40] sm:$0xf]  ;;  %v5915_v11 = vld [vmem:[#allocation26 + $0x54] sm:$0xf0] }
 0x6ce   : > { %3900 = vmatpush.bf16.msra.mxu2 %v5451_v18  ;;  %3913 = vmatpush.bf16.msra.mxu3 %v5643_v33  ;;  %v5494_v18 = vld [vmem:[#allocation26 + $0x1c0] sm:$0xf]  ;;  %v5963_v33 = vld [vmem:[#allocation26 + $0x1d4] sm:$0xf0]  ;;  %v5303_v7 = vor.u32 %v5915_v11, %v5302_v48 }
 0x6cf   : > { %v5495_v37 = vor.u32 %v5963_v33, %v5494_v18 }
 0x6d1   : > { %3875 = vmatpush.bf16.msra.mxu0 %v5423_v38  ;;  %3888 = vmatpush.bf16.msra.mxu1 %v5615_v41  ;;  %v5278_v38 = vld [vmem:[#allocation26 + $0x10] sm:$0xf]  ;;  %v5909_v41 = vld [vmem:[#allocation26 + $0x24] sm:$0xf0] }
 0x6d2   : > { %3901 = vmatpush.bf16.msra.mxu2 %v5427_v49  ;;  %3914 = vmatpush.bf16.msra.mxu3 %v5619_v50  ;;  %v5470_v49 = vld [vmem:[#allocation26 + $0x190] sm:$0xf]  ;;  %v5957_v50 = vld [vmem:[#allocation26 + $0x1a4] sm:$0xf0]  ;;  %v5279_v57 = vor.u32 %v5909_v41, %v5278_v38 }
 0x6d3   : > { %v5471_v9 = vor.u32 %v5957_v50, %v5470_v49  ;;  %v6219_v41 = vld [vmem:[%s7130_s15 + $0x20] sm:$0xff]  ;;  %v3283_v49 = vperm.slane %v7352_v61, 5 }
 0x6d5   : > { %3876 = vmatpush.bf16.msra.mxu0 %v5399_v60  ;;  %3889 = vmatpush.bf16.msra.mxu1 %v5591_v25  ;;  %v5283_v60 = vor.u32 %v5906_v53, %v5280_v54  ;;  %v5475_v25 = vor.u32 %v5954_v55, %v5472_v56 }
 0x6d6   : > { %3902 = vmatpush.bf16.msra.mxu2 %v5403_v63  ;;  %3915 = vmatpush.bf16.msra.mxu3 %v5595_v0  ;;  %v7355_v63 = vstv %s3933_s27 }
 0x6d7   : > { %v3936_v12 = vmul.f32 %v6216_v42, %v7355_v63 }
 0x6d9   : > { %3877 = vmatpush.bf16.msra.mxu0 %v5375_v30  ;;  %3890 = vmatpush.bf16.msra.mxu1 %v5567_v47 }
 0x6da   : > { %3903 = vmatpush.bf16.msra.mxu2 %v5379_v52  ;;  %3916 = vmatpush.bf16.msra.mxu3 %v5571_v10 }
 0x6db   : > { %3830 = vmatmul.bf16.vlgmr.msrb.gmra.mxu0 %v7333_v8  ;;  %3843 = vmatmul.bf16.vlgmr.msrb.gmra.mxu1 %v7335_v35 }
 0x6dc   : > { %3856 = vmatmul.bf16.vlgmr.msrb.gmra.mxu2 %v7333_v8  ;;  %3869 = vmatmul.bf16.vlgmr.msrb.gmra.mxu3 %v7335_v35 }
 0x6dd   : > { %3878 = vmatpush.bf16.msra.mxu0 %v5351_v39  ;;  %3891 = vmatpush.bf16.msra.mxu1 %v5543_v17 }
 0x6de   : > { %3904 = vmatpush.bf16.msra.mxu2 %v5355_v20  ;;  %3917 = vmatpush.bf16.msra.mxu3 %v5547_v21  ;;  %v6217_v21 = vld [vmem:[%s7130_s15 + $0x10] sm:$0xff] }
 0x6df   : > { %v3937_v22 = vmul.f32 %v6217_v21, %v7355_v63 }
 0x6e1   : > { %3879 = vmatpush.bf16.msra.mxu0 %v5327_v28  ;;  %3892 = vmatpush.bf16.msra.mxu1 %v5519_v29 }
 0x6e2   : > { %3905 = vmatpush.bf16.msra.mxu2 %v5331_v31  ;;  %3918 = vmatpush.bf16.msra.mxu3 %v5523_v15  ;;  %v6218_v31 = vld [vmem:[%s7130_s15 + $0x18] sm:$0xff] }
 0x6e3   : > { %v3938_v15 = vmul.f32 %v6218_v31, %v7355_v63 }
 0x6e5   : > { %3880 = vmatpush.bf16.msra.mxu0 %v5303_v7  ;;  %3893 = vmatpush.bf16.msra.mxu1 %v5495_v37 }
 0x6e6   : > { %3906 = vmatpush.bf16.msra.mxu2 %v5307_v43  ;;  %3919 = vmatpush.bf16.msra.mxu3 %v5499_v44  ;;  %v3939_v43 = vmul.f32 %v6219_v41, %v7355_v63 }
 0x6e9   : > { %3881 = vmatpush.bf16.msra.mxu0 %v5279_v57  ;;  %3894 = vmatpush.bf16.msra.mxu1 %v5471_v9 }
 0x6ea   : > { %3907 = vmatpush.bf16.msra.mxu2 %v5283_v60  ;;  %3920 = vmatpush.bf16.msra.mxu3 %v5475_v25  ;;  %v6220_v60 = vld [vmem:[%s7130_s15 + $0x28] sm:$0xff] }
 0x6eb   : > { %v3940_v25 = vmul.f32 %v6220_v60, %v7355_v63 }
 0x6ec   : > { %3882 = vmatmul.bf16.vlgmr.msra.gmra.mxu0 %v7333_v8  ;;  %3895 = vmatmul.bf16.vlgmr.msra.gmra.mxu1 %v7335_v35 }
 0x6ed   : > { %3908 = vmatmul.bf16.vlgmr.msra.gmra.mxu2 %v7333_v8  ;;  %3921 = vmatmul.bf16.vlgmr.msra.gmra.mxu3 %v7335_v35  ;;  %v6215_v8 = vld [vmem:[%s7130_s15] sm:$0xff] }
 0x6ee   : > { %v3935_v35 = vmul.f32 %v6215_v8, %v7355_v63 }
 0x748   : > { %v3779_v0 = vpop.f32.mrf.mxu0  ;;  %v3792_v2 = vpop.f32.mrf.mxu1 }
 0x749   : > { %v3780_v3 = vadd.f32 %v3779_v0, %v3278_v62 }
 0x74b   : > { %v3793_v4 = vadd.f32 %v3792_v2, %v3780_v3 }
 0x74d   : > { %v3927_v5 = vmul.f32 %v7357_v13, %v3793_v4 }
 0x74f   : > { %v3941_v30 = vadd.f32 %v3935_v35, %v3927_v5  ;;  %v3805_v47 = vpop.f32.mrf.mxu2  ;;  %v3818_v51 = vpop.f32.mrf.mxu3 }
 0x750   : > { %v3806_v45 = vadd.f32 %v3805_v47, %v3279_v1  ;;  %v3781_v52 = vpop.f32.mrf.mxu0  ;;  %v3794_v10 = vpop.f32.mrf.mxu1 }
 0x751   : > { %3947 = vst [vmem:[%s7365_s4] sm:$0xff] %v3941_v30 }
 0x752   : > { %v3819_v46 = vadd.f32 %v3818_v51, %v3806_v45 }
 0x754   : > { %v3928_v14 = vmul.f32 %v7357_v13, %v3819_v46 }
 0x756   : > { %v3942_v58 = vadd.f32 %v3936_v12, %v3928_v14 }
 0x757   : > { %v3807_v39 = vpop.f32.mrf.mxu2  ;;  %v3820_v17 = vpop.f32.mrf.mxu3 }
 0x758   : > { %3948 = vst [vmem:[%s7365_s4 + $0x8] sm:$0xff] %v3942_v58  ;;  %v3831_v59 = vpop.f32.mrf.mxu0  ;;  %v3844_v40 = vpop.f32.mrf.mxu1 }
 0x759   : > { %v3832_v20 = vadd.f32 %v3831_v59, %v3280_v16 }
 0x75b   : > { %v3845_v23 = vadd.f32 %v3844_v40, %v3832_v20 }
 0x75d   : > { %v3929_v32 = vmul.f32 %v7357_v13, %v3845_v23 }
 0x75f   : > { %v3943_v26 = vadd.f32 %v3937_v22, %v3929_v32  ;;  %v3857_v27 = vpop.f32.mrf.mxu2  ;;  %v3870_v28 = vpop.f32.mrf.mxu3 }
 0x760   : > { %v3858_v29 = vadd.f32 %v3857_v27, %v3281_v24  ;;  %v3833_v48 = vpop.f32.mrf.mxu0  ;;  %v3846_v11 = vpop.f32.mrf.mxu1 }
 0x761   : > { %3949 = vst [vmem:[%s7365_s4 + $0x10] sm:$0xff] %v3943_v26 }
 0x762   : > { %v3871_v18 = vadd.f32 %v3870_v28, %v3858_v29 }
 0x764   : > { %v3930_v33 = vmul.f32 %v7357_v13, %v3871_v18 }
 0x766   : > { %v3944_v6 = vadd.f32 %v3938_v15, %v3930_v33 }
 0x767   : > { %v3859_v19 = vpop.f32.mrf.mxu2  ;;  %v3872_v36 = vpop.f32.mrf.mxu3 }
 0x768   : > { %3950 = vst [vmem:[%s7365_s4 + $0x18] sm:$0xff] %v3944_v6 }
 0x769   : > { %v3883_v7 = vpop.f32.mrf.mxu0  ;;  %v3896_v37 = vpop.f32.mrf.mxu1 }
 0x76a   : > { %v3884_v38 = vadd.f32 %v3883_v7, %v3282_v34 }
 0x76c   : > { %v3897_v44 = vadd.f32 %v3896_v37, %v3884_v38 }
 0x76e   : > { %v3931_v50 = vmul.f32 %v7357_v13, %v3897_v44 }
 0x770   : > { %v3945_v53 = vadd.f32 %v3939_v43, %v3931_v50  ;;  %v3909_v54 = vpop.f32.mrf.mxu2  ;;  %v3922_v55 = vpop.f32.mrf.mxu3 }
 0x771   : > { %v3910_v56 = vadd.f32 %v3909_v54, %v3283_v49  ;;  %v3885_v57 = vpop.f32.mrf.mxu0  ;;  %v3898_v9 = vpop.f32.mrf.mxu1 }
 0x772   : > { %3951 = vst [vmem:[%s7365_s4 + $0x20] sm:$0xff] %v3945_v53 }
 0x773   : > { %v3923_v61 = vadd.f32 %v3922_v55, %v3910_v56 }
 0x775   : > { %v3932_v62 = vmul.f32 %v7357_v13, %v3923_v61 }
 0x777   : > { %v3946_v0 = vadd.f32 %v3940_v25, %v3932_v62 }
 0x778   : > { %v3911_v2 = vpop.f32.mrf.mxu2  ;;  %v3924_v3 = vpop.f32.mrf.mxu3 }
 0x779   : > { %3952 = vst [vmem:[%s7365_s4 + $0x28] sm:$0xff] %v3946_v0 }
 0x77a   : > { %6713 = shalt.err (!%p6710_p8)
}
 0x77b   : > { %6064 = dma.vmem_to_hbm [thread:$0]  (%p7071_p4), %s3968_s6, 768, %s3970_s9, %s3954_s10  }
 0x77c PF: > { %s3981_s14 = sand.u32 1, %s6776_s3   ;;  %p7508_p10 = scmp.ge.s32.totalorder %s6788_s30, 2 }
 0x77d   : > { %s3982_s27 = scalar_lea.sflag [#allocation4], %s3981_s14 }
 0x77e   : > { %p6117_p11 = pnand %p7508_p10, %p7075_p6 }
 0x780   : > { %p6118_p13 = pneg %p6117_p11 }
 0x782   : > { %6771 = dma.done.wait (%p6118_p13), %s3982_s27, 768  }
 0x783   : > { %6773 = vsyncadd (%p6118_p13), %s3982_s27, 4294966528  ;;  %p45_p0 = scmp.ge.s32.totalorder %s7047_s5, 4   ;;  %s7509_s3 = smov %s6780_s28 }
 0x784   : > { %s7510_s28 = smov %s6784_s29  ;;  %s7511_s29 = smov %s7058_s23 }
 0x785   : > { %s7512_s30 = smov %s7047_s5  ;;  %47 = sbr.rel (!%p45_p0) target bundleno = 35 (0x23), region = 223 }
 0x78a   :  { %3988 = vsyncpa [#allocation3], 1 }
 0x78b   :  { %3990 = vsyncpa [#allocation3 + $0x1], 1 }
 0x78c   :  { %3991 = vsyncpa [#allocation7], 1 }
 0x78d   :  { %3993 = vsyncpa [#allocation7 + $0x1], 1 }
 0x78e   :  { %3994 = vsyncpa [#allocation10], 1 }
 0x78f   :  { %3995 = vsyncpa [#allocation13], 1 }
 0x790   :  { %3996 = vsyncpa [#allocation16], 1 }
 0x791   :  { %3997 = vsyncpa [#allocation19], 1 }
 0x792   :  { %3998 = vsyncpa [#allocation22], 1 }
 0x793   :  { %3999 = vsyncpa [#allocation25], 1 }
 0x794   :  { %4000 = vsyncpa [#allocation4], 1 }
 0x795   :  { %4002 = vsyncpa [#allocation4 + $0x1], 1 }
 0x796   :  { %4003 = vsyncpa [#allocation5], 1 }
 0x797   :  { %4005 = vsyncpa [#allocation5 + $0x1], 1 }

</bundles_post_ra>
